<compile_context>
chip_gen: v5e
topology: v5e:2x2
jax: 0.10.0
libtpu: 0.0.40
codegen_flags: <defaults>
</compile_context>

<pallas_src>
import functools
import math

import jax
import jax.numpy as jnp
from jax.experimental import pallas as pl
from jax.experimental.pallas import tpu as pltpu

# ----------------------------- configuration (small) -----------------------------
IMG_SIZE = 16
PATCH = 4
IN_CHANS = 4
EMBED_DIM = 32
ENCODER_DEPTH = 2
PREDICTOR_DEPTH = 1
NUM_HEADS = 4
MLP_RATIO = 4
MLP_DIM = EMBED_DIM * MLP_RATIO
BATCH = 2
N_PATCH_SIDE = IMG_SIZE // PATCH
N_PATCHES = N_PATCH_SIDE * N_PATCH_SIDE
SEQ = BATCH * N_PATCHES                        # rows of the (S, D) activation slab
PATCH_DIM = IN_CHANS * PATCH * PATCH
HEAD_DIM = EMBED_DIM // NUM_HEADS
LN_EPS = 1e-5

_N_BLOCK_PARAMS = 12                           # params per transformer block
_GELU_C = math.sqrt(2.0 / math.pi)


# ----------------------------- in-kernel building blocks -----------------------------
def _layer_norm(x, g, b):
    mu = jnp.mean(x, axis=-1, keepdims=True)
    ex2 = jnp.mean(x * x, axis=-1, keepdims=True)
    var = ex2 - mu * mu                        # two independent XLU reductions
    return (x - mu) * jax.lax.rsqrt(var + LN_EPS) * g + b


def _mlp(xn, w1, b1, w2, b2):
    h = jnp.dot(xn.astype(jnp.bfloat16), w1, preferred_element_type=jnp.float32) + b1
    # TODO(synk): nn.GELU() default is the exact erf form; the tanh approximation
    # is used here (|err| ~1e-3, below the bf16-matmul noise of this kernel)
    # because erf has no guaranteed Mosaic lowering.
    h = 0.5 * h * (1.0 + jnp.tanh(_GELU_C * (h + 0.044715 * h * h * h)))
    return jnp.dot(h.astype(jnp.bfloat16), w2, preferred_element_type=jnp.float32) + b2


def _row_roll(x, rows):
    """Static rotation of the (S, D) slab along the row (sublane) axis."""
    if rows == 0:
        return x
    return jnp.concatenate([x[rows:, :], x[:rows, :]], axis=0)


def _attention(xn, w_qkv, b_qkv, w_o, b_o, head_mask, *, n_patch, batch):
    """MHA over the image-batch axis (PyTorch batch_first=False on (B, N, D)).

    Rows of xn are (batch-major, patch-minor); all B keys/values for a query row
    are reachable by static row rotations of j*N rows.  head_mask is the (D, D)
    block-diagonal ones matrix: (q*k) @ head_mask performs the per-head segment
    sum AND broadcasts the score back across that head's lanes in one matmul, so
    the whole softmax stays elementwise at the (S, D) layout (no head relayouts,
    no tiny MXU einsums).  The 1/sqrt(head_dim) query scale is folded into
    w_qkv / b_qkv at init.
    """
    qkv = jnp.dot(xn.astype(jnp.bfloat16), w_qkv,
                  preferred_element_type=jnp.float32) + b_qkv            # (S, 3D) f32
    D = xn.shape[-1]
    q = qkv[:, 0 * D:1 * D]
    k = qkv[:, 1 * D:2 * D]
    v = qkv[:, 2 * D:3 * D]

    scores, values = [], []
    for j in range(batch):
        kj = _row_roll(k, j * n_patch)
        # s_j[r, d] = sum_{d' in head(d)} q[r, d'] * kj[r, d']
        scores.append(jnp.dot(q * kj, head_mask, preferred_element_type=jnp.float32))
        values.append(_row_roll(v, j * n_patch))

    m = scores[0]
    for s in scores[1:]:
        m = jnp.maximum(m, s)
    probs = [jnp.exp(s - m) for s in scores]
    denom = probs[0]
    acc = probs[0] * values[0]
    for p, vj in zip(probs[1:], values[1:]):
        denom = denom + p
        acc = acc + p * vj
    o = acc * pl.reciprocal(denom, approx=True)                          # EUP divide
    return jnp.dot(o.astype(jnp.bfloat16), w_o,
                   preferred_element_type=jnp.float32) + b_o


def _transformer_block(x, block_refs, d, head_mask, *, n_patch, batch):
    """Pre-norm transformer block; block_refs are the 12 depth-stacked param refs."""
    (ln1g, ln1b, wqkv, bqkv, wo, bo, ln2g, ln2b, w1, b1, w2, b2) = block_refs
    xn = _layer_norm(x, ln1g[d], ln1b[d])
    x = x + _attention(xn, wqkv[d], bqkv[d], wo[d], bo[d], head_mask,
                       n_patch=n_patch, batch=batch)
    xn2 = _layer_norm(x, ln2g[d], ln2b[d])
    x = x + _mlp(xn2, w1[d], b1[d], w2[d], b2[d])
    return x


# ----------------------------- fused kernel -----------------------------
def ijepa_tower_kernel(patches_ref, pw_ref, pb_ref, hm_ref, *refs,
                       enc_depth, pred_depth, n_patch, batch):
    """One grid step = one full encoder tower; tower 0 also runs the predictor."""
    enc_refs = refs[:_N_BLOCK_PARAMS]
    pred_refs = refs[_N_BLOCK_PARAMS:2 * _N_BLOCK_PARAMS]
    o_ref = refs[2 * _N_BLOCK_PARAMS]

    head_mask = hm_ref[...]                                     # (D, D) f32, loaded once

    # Patch embedding (Conv2d k=p, stride=p == matmul on flattened patches).
    x = jnp.dot(patches_ref[...].astype(jnp.bfloat16), pw_ref[...],
                preferred_element_type=jnp.float32) + pb_ref[...]        # (S, D)

    for d in range(enc_depth):
        x = _transformer_block(x, enc_refs, d, head_mask,
                               n_patch=n_patch, batch=batch)
    o_ref[...] = x

    # Tower 0 is the context tower: run the predictor on its freshly computed
    # output in-place, so the whole forward is one pallas_call (no HBM re-read).
    @pl.when(pl.program_id(0) == 0)
    def _():
        y = o_ref[...]
        for d in range(pred_depth):
            y = _transformer_block(y, pred_refs, d, head_mask,
                                   n_patch=n_patch, batch=batch)
        o_ref[...] = y


def run_ijepa(patches, patch_w, patch_b, head_mask, enc_blocks, pred_blocks):
    """enc_blocks: 12 arrays (n_towers, depth, ...); pred_blocks: 12 arrays (depth, ...)."""
    n_towers, enc_depth = enc_blocks[0].shape[:2]
    pred_depth = pred_blocks[0].shape[0]

    def shared_spec(shape):
        nd = len(shape)
        return pl.BlockSpec(tuple(shape), lambda t: (0,) * nd)

    enc_specs = [pl.BlockSpec((None,) + tuple(p.shape[1:]),
                              lambda t: (t, 0, 0, 0)) for p in enc_blocks]
    pred_specs = [shared_spec(p.shape) for p in pred_blocks]
    in_specs = ([shared_spec(patches.shape), shared_spec(patch_w.shape),
                 shared_spec(patch_b.shape), shared_spec(head_mask.shape)]
                + enc_specs + pred_specs)
    out_specs = pl.BlockSpec((None, SEQ, EMBED_DIM), lambda t: (t, 0, 0))

    return pl.pallas_call(
        functools.partial(ijepa_tower_kernel, enc_depth=enc_depth,
                          pred_depth=pred_depth, n_patch=N_PATCHES, batch=BATCH),
        grid=(n_towers,),
        out_shape=jax.ShapeDtypeStruct((n_towers, SEQ, EMBED_DIM), jnp.float32),
        in_specs=in_specs,
        out_specs=out_specs,
        # The two towers are independent; on single-TC chips this axis is just a
        # serial loop.  TODO(synk): use pltpu.CORE_PARALLEL / pl.core_map on v7x
        # to guarantee the two towers shard across its two TensorCores.
        compiler_params=pltpu.CompilerParams(
            dimension_semantics=("arbitrary",)),
    )(patches, patch_w, patch_b, head_mask, *enc_blocks, *pred_blocks)


# ----------------------------- parameter init -----------------------------
def xavier_uniform(key, shape):
    fan_out, fan_in = shape
    limit = math.sqrt(6.0 / (fan_in + fan_out))
    return jax.random.uniform(key, shape, jnp.float32, -limit, limit)


def make_head_mask(dim, num_heads):
    """(D, D) block-diagonal ones: M[i, j] = 1 iff lanes i and j are in the same head."""
    hd = dim // num_heads
    idx = jnp.arange(dim) // hd
    return (idx[:, None] == idx[None, :]).astype(jnp.float32)


def init_block_params(key, dim, mlp_dim, num_heads):
    """Per-block params; weights pre-transposed to (in, out) layout and cast to bf16."""
    ks = jax.random.split(key, 4)
    hd = dim // num_heads
    ln1_g = jnp.ones((1, dim), jnp.float32)
    ln1_b = jnp.zeros((1, dim), jnp.float32)
    # fused in-projection: PyTorch stores (3D, D) and computes x @ W.T; fold the
    # 1/sqrt(head_dim) query scaling into the Q columns (and the Q bias).
    w_qkv = xavier_uniform(ks[0], (3 * dim, dim)).T                      # (D, 3D) f32
    q_scale = jnp.concatenate(
        [jnp.full((1, dim), 1.0 / math.sqrt(hd), jnp.float32),
         jnp.ones((1, 2 * dim), jnp.float32)], axis=1)                   # (1, 3D)
    w_qkv = (w_qkv * q_scale).astype(jnp.bfloat16)
    b_qkv = jnp.zeros((1, 3 * dim), jnp.float32) * q_scale               # zeros
    w_o = xavier_uniform(ks[1], (dim, dim)).T.astype(jnp.bfloat16)       # (D, D)
    b_o = jnp.zeros((1, dim), jnp.float32)
    ln2_g = jnp.ones((1, dim), jnp.float32)
    ln2_b = jnp.zeros((1, dim), jnp.float32)
    w_fc1 = xavier_uniform(ks[2], (mlp_dim, dim)).T.astype(jnp.bfloat16) # (D, MLP)
    b_fc1 = jnp.zeros((1, mlp_dim), jnp.float32)
    w_fc2 = xavier_uniform(ks[3], (dim, mlp_dim)).T.astype(jnp.bfloat16) # (MLP, D)
    b_fc2 = jnp.zeros((1, dim), jnp.float32)
    return (ln1_g, ln1_b, w_qkv, b_qkv, w_o, b_o,
            ln2_g, ln2_b, w_fc1, b_fc1, w_fc2, b_fc2)


def stack_blocks(block_list):
    """list over depth of per-block tuples -> list of 12 (depth, ...) arrays."""
    return [jnp.stack([blk[i] for blk in block_list], axis=0)
            for i in range(_N_BLOCK_PARAMS)]


def init_params(key):
    k_patch, k_ctx, k_tgt, k_pred = jax.random.split(key, 4)
    params = {}
    # Conv2d(in, D, kernel=p, stride=p) == matmul of flattened (C*p*p) patches.
    # TODO(synk): PyTorch Conv2d default init is kaiming-uniform; xavier kept here.
    params["patch_w"] = xavier_uniform(
        k_patch, (EMBED_DIM, PATCH_DIM)).T.astype(jnp.bfloat16)          # (C*p*p, D)
    params["patch_b"] = jnp.zeros((1, EMBED_DIM), jnp.float32)
    params["head_mask"] = make_head_mask(EMBED_DIM, NUM_HEADS)

    ctx = stack_blocks([init_block_params(k, EMBED_DIM, MLP_DIM, NUM_HEADS)
                        for k in jax.random.split(k_ctx, ENCODER_DEPTH)])
    tgt = stack_blocks([init_block_params(k, EMBED_DIM, MLP_DIM, NUM_HEADS)
                        for k in jax.random.split(k_tgt, ENCODER_DEPTH)])
    # tower 0 = context (the predictor runs on its output), tower 1 = target
    params["ctx_tgt"] = [jnp.stack([c, t], axis=0) for c, t in zip(ctx, tgt)]
    params["predictor"] = stack_blocks(
        [init_block_params(k, EMBED_DIM, MLP_DIM, NUM_HEADS)
         for k in jax.random.split(k_pred, PREDICTOR_DEPTH)])
    return params


# ----------------------------- glue (plain JAX) -----------------------------
def extract_targets(features, boxes):
    """features: (B, N, D); boxes: python list [B][n_boxes][4] of (x1, y1, x2, y2)."""
    B, N, D = features.shape
    H = W = int(math.isqrt(N))
    f = features.reshape(B, H, W, D)                 # '(h w)' order -> [h][w]
    outs = []
    for b in range(B):
        per = []
        for (x1, y1, x2, y2) in boxes[b]:
            region = f[b, y1:y2, x1:x2, :]           # adaptive_avg_pool2d((1,1)) == mean
            per.append(jnp.mean(region, axis=(0, 1)))
        outs.append(jnp.stack(per))
    return jnp.stack(outs)                           # (B, n_boxes, D)


def ijepa_forward(images, boxes, params):
    B, C, H, W = images.shape
    nh, nw = H // PATCH, W // PATCH
    # Flatten to patches: rows ordered (batch-major, patch-minor), columns (c, dy, dx).
    patches = images.reshape(B, C, nh, PATCH, nw, PATCH)
    patches = jnp.transpose(patches, (0, 2, 4, 1, 3, 5))     # (B, nh, nw, C, p, p)
    patches = patches.reshape(B * nh * nw, C * PATCH * PATCH)

    towers = run_ijepa(patches, params["patch_w"], params["patch_b"],
                       params["head_mask"], params["ctx_tgt"],
                       params["predictor"])                   # (2, S, D)
    pred_slab, tgt_slab = towers[0], towers[1]                # predictor(ctx), target

    def to_bnd(feat):                                         # rows are batch-major
        return feat.reshape(B, N_PATCHES, EMBED_DIM)

    predicted_features = extract_targets(to_bnd(pred_slab), boxes)
    target_features = extract_targets(to_bnd(tgt_slab), boxes)
    return predicted_features, target_features


# ----------------------------- main -----------------------------
if __name__ == "__main__":
    key = jax.random.PRNGKey(0)
    k_param, k_img = jax.random.split(key)
    params = init_params(k_param)

    images = jax.random.normal(k_img, (BATCH, IN_CHANS, IMG_SIZE, IMG_SIZE), jnp.float32)

    # Deterministic target boxes (valid for the 4x4 patch grid); in the PyTorch
    # module these come from get_random_boxes when boxes is None.
    boxes = [
        [[0, 0, 2, 2], [1, 1, 3, 4], [2, 0, 4, 3]],
        [[0, 1, 3, 3], [1, 0, 4, 2], [0, 0, 4, 4]],
    ]

    fwd = jax.jit(lambda imgs: ijepa_forward(imgs, boxes, params))
    predicted, target = fwd(images)
    jax.block_until_ready((predicted, target))

    assert predicted.shape == (BATCH, len(boxes[0]), EMBED_DIM)
    assert target.shape == (BATCH, len(boxes[0]), EMBED_DIM)
    print("KERNEL_OK")
</pallas_src>

<mosaic_0001>
module attributes {stable_mosaic.version = 11 : i64} {
  func.func @ijepa_tower_kernel(%arg0: i32, %arg1: memref<32x64xf32, #tpu.memory_space<vmem>>, %arg2: memref<64x32xbf16, #tpu.memory_space<vmem>>, %arg3: memref<1x32xf32, #tpu.memory_space<vmem>>, %arg4: memref<32x32xf32, #tpu.memory_space<vmem>>, %arg5: memref<1x2x1x32xf32, #tpu.memory_space<vmem>>, %arg6: memref<1x2x1x32xf32, #tpu.memory_space<vmem>>, %arg7: memref<1x2x32x96xbf16, #tpu.memory_space<vmem>>, %arg8: memref<1x2x1x96xf32, #tpu.memory_space<vmem>>, %arg9: memref<1x2x32x32xbf16, #tpu.memory_space<vmem>>, %arg10: memref<1x2x1x32xf32, #tpu.memory_space<vmem>>, %arg11: memref<1x2x1x32xf32, #tpu.memory_space<vmem>>, %arg12: memref<1x2x1x32xf32, #tpu.memory_space<vmem>>, %arg13: memref<1x2x32x128xbf16, #tpu.memory_space<vmem>>, %arg14: memref<1x2x1x128xf32, #tpu.memory_space<vmem>>, %arg15: memref<1x2x128x32xbf16, #tpu.memory_space<vmem>>, %arg16: memref<1x2x1x32xf32, #tpu.memory_space<vmem>>, %arg17: memref<1x1x32xf32, #tpu.memory_space<vmem>>, %arg18: memref<1x1x32xf32, #tpu.memory_space<vmem>>, %arg19: memref<1x32x96xbf16, #tpu.memory_space<vmem>>, %arg20: memref<1x1x96xf32, #tpu.memory_space<vmem>>, %arg21: memref<1x32x32xbf16, #tpu.memory_space<vmem>>, %arg22: memref<1x1x32xf32, #tpu.memory_space<vmem>>, %arg23: memref<1x1x32xf32, #tpu.memory_space<vmem>>, %arg24: memref<1x1x32xf32, #tpu.memory_space<vmem>>, %arg25: memref<1x32x128xbf16, #tpu.memory_space<vmem>>, %arg26: memref<1x1x128xf32, #tpu.memory_space<vmem>>, %arg27: memref<1x128x32xbf16, #tpu.memory_space<vmem>>, %arg28: memref<1x1x32xf32, #tpu.memory_space<vmem>>, %arg29: memref<1x32x32xf32, #tpu.memory_space<vmem>>) attributes {dimension_semantics = [#tpu.dimension_semantics<arbitrary>], iteration_bounds = array<i64: 2>, scalar_prefetch = 0 : i64, scratch_operands = 0 : i64, tpu.core_type = #tpu.core_type<tc>, window_params = [{pipeline_mode = #tpu.pipeline_mode<synchronous>, transform_indices = @transform_0, window_bounds = array<i64: 32, 64>}, {pipeline_mode = #tpu.pipeline_mode<synchronous>, transform_indices = @transform_1, window_bounds = array<i64: 64, 32>}, {pipeline_mode = #tpu.pipeline_mode<synchronous>, transform_indices = @transform_2, window_bounds = array<i64: 1, 32>}, {pipeline_mode = #tpu.pipeline_mode<synchronous>, transform_indices = @transform_3, window_bounds = array<i64: 32, 32>}, {transform_indices = @transform_4, window_bounds = array<i64: 1, 2, 1, 32>}, {transform_indices = @transform_5, window_bounds = array<i64: 1, 2, 1, 32>}, {transform_indices = @transform_6, window_bounds = array<i64: 1, 2, 32, 96>}, {transform_indices = @transform_7, window_bounds = array<i64: 1, 2, 1, 96>}, {transform_indices = @transform_8, window_bounds = array<i64: 1, 2, 32, 32>}, {transform_indices = @transform_9, window_bounds = array<i64: 1, 2, 1, 32>}, {transform_indices = @transform_10, window_bounds = array<i64: 1, 2, 1, 32>}, {transform_indices = @transform_11, window_bounds = array<i64: 1, 2, 1, 32>}, {transform_indices = @transform_12, window_bounds = array<i64: 1, 2, 32, 128>}, {transform_indices = @transform_13, window_bounds = array<i64: 1, 2, 1, 128>}, {transform_indices = @transform_14, window_bounds = array<i64: 1, 2, 128, 32>}, {transform_indices = @transform_15, window_bounds = array<i64: 1, 2, 1, 32>}, {pipeline_mode = #tpu.pipeline_mode<synchronous>, transform_indices = @transform_16, window_bounds = array<i64: 1, 1, 32>}, {pipeline_mode = #tpu.pipeline_mode<synchronous>, transform_indices = @transform_17, window_bounds = array<i64: 1, 1, 32>}, {pipeline_mode = #tpu.pipeline_mode<synchronous>, transform_indices = @transform_18, window_bounds = array<i64: 1, 32, 96>}, {pipeline_mode = #tpu.pipeline_mode<synchronous>, transform_indices = @transform_19, window_bounds = array<i64: 1, 1, 96>}, {pipeline_mode = #tpu.pipeline_mode<synchronous>, transform_indices = @transform_20, window_bounds = array<i64: 1, 32, 32>}, {pipeline_mode = #tpu.pipeline_mode<synchronous>, transform_indices = @transform_21, window_bounds = array<i64: 1, 1, 32>}, {pipeline_mode = #tpu.pipeline_mode<synchronous>, transform_indices = @transform_22, window_bounds = array<i64: 1, 1, 32>}, {pipeline_mode = #tpu.pipeline_mode<synchronous>, transform_indices = @transform_23, window_bounds = array<i64: 1, 1, 32>}, {pipeline_mode = #tpu.pipeline_mode<synchronous>, transform_indices = @transform_24, window_bounds = array<i64: 1, 32, 128>}, {pipeline_mode = #tpu.pipeline_mode<synchronous>, transform_indices = @transform_25, window_bounds = array<i64: 1, 1, 128>}, {pipeline_mode = #tpu.pipeline_mode<synchronous>, transform_indices = @transform_26, window_bounds = array<i64: 1, 128, 32>}, {pipeline_mode = #tpu.pipeline_mode<synchronous>, transform_indices = @transform_27, window_bounds = array<i64: 1, 1, 32>}, {transform_indices = @transform_28, window_bounds = array<i64: 1, 32, 32>}]} {
    %c0 = arith.constant 0 : index
    %c0_0 = arith.constant 0 : index
    %0 = vector.load %arg4[%c0, %c0_0] : memref<32x32xf32, #tpu.memory_space<vmem>>, vector<32x32xf32>
    %c0_1 = arith.constant 0 : index
    %c0_2 = arith.constant 0 : index
    %1 = vector.load %arg1[%c0_1, %c0_2] : memref<32x64xf32, #tpu.memory_space<vmem>>, vector<32x64xf32>
    %2 = arith.truncf %1 : vector<32x64xf32> to vector<32x64xbf16>
    %c0_3 = arith.constant 0 : index
    %c0_4 = arith.constant 0 : index
    %3 = vector.load %arg2[%c0_3, %c0_4] : memref<64x32xbf16, #tpu.memory_space<vmem>>, vector<64x32xbf16>
    %cst = arith.constant dense<0.000000e+00> : vector<32x32xf32>
    %4 = tpu.matmul %2, %3, %cst {dimension_numbers = #tpu.dot_dimension_numbers<[1], [0], [0], [1], [0, 0, 1, 1], [], []>} : vector<32x64xbf16>, vector<64x32xbf16>, vector<32x32xf32> -> vector<32x32xf32>
    %c0_5 = arith.constant 0 : index
    %c0_6 = arith.constant 0 : index
    %5 = vector.load %arg3[%c0_5, %c0_6] : memref<1x32xf32, #tpu.memory_space<vmem>>, vector<1x32xf32>
    %6 = vector.broadcast %5 : vector<1x32xf32> to vector<32x32xf32>
    %7 = arith.addf %4, %6 : vector<32x32xf32>
    %c0_7 = arith.constant 0 : index
    %c0_8 = arith.constant 0 : index
    %c0_9 = arith.constant 0 : index
    %c0_10 = arith.constant 0 : index
    %8 = vector.load %arg5[%c0_7, %c0_8, %c0_9, %c0_10] : memref<1x2x1x32xf32, #tpu.memory_space<vmem>>, vector<1x1x1x32xf32>
    %9 = vector.shape_cast %8 : vector<1x1x1x32xf32> to vector<1x32xf32>
    %c0_11 = arith.constant 0 : index
    %c0_12 = arith.constant 0 : index
    %c0_13 = arith.constant 0 : index
    %c0_14 = arith.constant 0 : index
    %10 = vector.load %arg6[%c0_11, %c0_12, %c0_13, %c0_14] : memref<1x2x1x32xf32, #tpu.memory_space<vmem>>, vector<1x1x1x32xf32>
    %11 = vector.shape_cast %10 : vector<1x1x1x32xf32> to vector<1x32xf32>
    %cst_15 = arith.constant dense<0.000000e+00> : vector<32xf32>
    %12 = vector.multi_reduction <add>, %7, %cst_15 [1] : vector<32x32xf32> to vector<32xf32>
    %13 = vector.shape_cast %12 : vector<32xf32> to vector<32x1xf32>
    %cst_16 = arith.constant 3.200000e+01 : f32
    %14 = vector.broadcast %cst_16 : f32 to vector<32x1xf32>
    %15 = arith.divf %13, %14 : vector<32x1xf32>
    %16 = arith.mulf %7, %7 : vector<32x32xf32>
    %cst_17 = arith.constant dense<0.000000e+00> : vector<32xf32>
    %17 = vector.multi_reduction <add>, %16, %cst_17 [1] : vector<32x32xf32> to vector<32xf32>
    %18 = vector.shape_cast %17 : vector<32xf32> to vector<32x1xf32>
    %cst_18 = arith.constant 3.200000e+01 : f32
    %19 = vector.broadcast %cst_18 : f32 to vector<32x1xf32>
    %20 = arith.divf %18, %19 : vector<32x1xf32>
    %21 = arith.mulf %15, %15 : vector<32x1xf32>
    %22 = arith.subf %20, %21 : vector<32x1xf32>
    %23 = vector.broadcast %15 : vector<32x1xf32> to vector<32x32xf32>
    %24 = arith.subf %7, %23 : vector<32x32xf32>
    %cst_19 = arith.constant 9.99999974E-6 : f32
    %25 = vector.broadcast %cst_19 : f32 to vector<32x1xf32>
    %26 = arith.addf %22, %25 : vector<32x1xf32>
    %27 = math.rsqrt %26 : vector<32x1xf32>
    %28 = vector.broadcast %27 : vector<32x1xf32> to vector<32x32xf32>
    %29 = arith.mulf %24, %28 : vector<32x32xf32>
    %30 = vector.broadcast %9 : vector<1x32xf32> to vector<32x32xf32>
    %31 = arith.mulf %29, %30 : vector<32x32xf32>
    %32 = vector.broadcast %11 : vector<1x32xf32> to vector<32x32xf32>
    %33 = arith.addf %31, %32 : vector<32x32xf32>
    %c0_20 = arith.constant 0 : index
    %c0_21 = arith.constant 0 : index
    %c0_22 = arith.constant 0 : index
    %c0_23 = arith.constant 0 : index
    %34 = vector.load %arg7[%c0_20, %c0_21, %c0_22, %c0_23] : memref<1x2x32x96xbf16, #tpu.memory_space<vmem>>, vector<1x1x32x96xbf16>
    %35 = vector.shape_cast %34 : vector<1x1x32x96xbf16> to vector<32x96xbf16>
    %c0_24 = arith.constant 0 : index
    %c0_25 = arith.constant 0 : index
    %c0_26 = arith.constant 0 : index
    %c0_27 = arith.constant 0 : index
    %36 = vector.load %arg8[%c0_24, %c0_25, %c0_26, %c0_27] : memref<1x2x1x96xf32, #tpu.memory_space<vmem>>, vector<1x1x1x96xf32>
    %37 = vector.shape_cast %36 : vector<1x1x1x96xf32> to vector<1x96xf32>
    %c0_28 = arith.constant 0 : index
    %c0_29 = arith.constant 0 : index
    %c0_30 = arith.constant 0 : index
    %c0_31 = arith.constant 0 : index
    %38 = vector.load %arg9[%c0_28, %c0_29, %c0_30, %c0_31] : memref<1x2x32x32xbf16, #tpu.memory_space<vmem>>, vector<1x1x32x32xbf16>
    %39 = vector.shape_cast %38 : vector<1x1x32x32xbf16> to vector<32x32xbf16>
    %c0_32 = arith.constant 0 : index
    %c0_33 = arith.constant 0 : index
    %c0_34 = arith.constant 0 : index
    %c0_35 = arith.constant 0 : index
    %40 = vector.load %arg10[%c0_32, %c0_33, %c0_34, %c0_35] : memref<1x2x1x32xf32, #tpu.memory_space<vmem>>, vector<1x1x1x32xf32>
    %41 = vector.shape_cast %40 : vector<1x1x1x32xf32> to vector<1x32xf32>
    %42 = arith.truncf %33 : vector<32x32xf32> to vector<32x32xbf16>
    %cst_36 = arith.constant dense<0.000000e+00> : vector<32x96xf32>
    %43 = tpu.matmul %42, %35, %cst_36 {dimension_numbers = #tpu.dot_dimension_numbers<[1], [0], [0], [1], [0, 0, 1, 1], [], []>} : vector<32x32xbf16>, vector<32x96xbf16>, vector<32x96xf32> -> vector<32x96xf32>
    %44 = vector.broadcast %37 : vector<1x96xf32> to vector<32x96xf32>
    %45 = arith.addf %43, %44 : vector<32x96xf32>
    %46 = vector.extract_strided_slice %45 {offsets = [0, 0], sizes = [32, 32], strides = [1, 1]} : vector<32x96xf32> to vector<32x32xf32>
    %47 = vector.extract_strided_slice %45 {offsets = [0, 32], sizes = [32, 32], strides = [1, 1]} : vector<32x96xf32> to vector<32x32xf32>
    %48 = vector.extract_strided_slice %45 {offsets = [0, 64], sizes = [32, 32], strides = [1, 1]} : vector<32x96xf32> to vector<32x32xf32>
    %49 = arith.mulf %46, %47 : vector<32x32xf32>
    %cst_37 = arith.constant dense<0.000000e+00> : vector<32x32xf32>
    %50 = tpu.matmul %49, %0, %cst_37 {dimension_numbers = #tpu.dot_dimension_numbers<[1], [0], [0], [1], [0, 0, 1, 1], [], []>} : vector<32x32xf32>, vector<32x32xf32>, vector<32x32xf32> -> vector<32x32xf32>
    %51 = vector.extract_strided_slice %47 {offsets = [16, 0], sizes = [16, 32], strides = [1, 1]} : vector<32x32xf32> to vector<16x32xf32>
    %52 = vector.extract_strided_slice %47 {offsets = [0, 0], sizes = [16, 32], strides = [1, 1]} : vector<32x32xf32> to vector<16x32xf32>
    %53 = tpu.concatenate %51, %52 in 0 : vector<16x32xf32>, vector<16x32xf32> -> vector<32x32xf32>
    %54 = arith.mulf %46, %53 : vector<32x32xf32>
    %cst_38 = arith.constant dense<0.000000e+00> : vector<32x32xf32>
    %55 = tpu.matmul %54, %0, %cst_38 {dimension_numbers = #tpu.dot_dimension_numbers<[1], [0], [0], [1], [0, 0, 1, 1], [], []>} : vector<32x32xf32>, vector<32x32xf32>, vector<32x32xf32> -> vector<32x32xf32>
    %56 = vector.extract_strided_slice %48 {offsets = [16, 0], sizes = [16, 32], strides = [1, 1]} : vector<32x32xf32> to vector<16x32xf32>
    %57 = vector.extract_strided_slice %48 {offsets = [0, 0], sizes = [16, 32], strides = [1, 1]} : vector<32x32xf32> to vector<16x32xf32>
    %58 = tpu.concatenate %56, %57 in 0 : vector<16x32xf32>, vector<16x32xf32> -> vector<32x32xf32>
    %59 = arith.maximumf %50, %55 : vector<32x32xf32>
    %60 = arith.subf %50, %59 : vector<32x32xf32>
    %61 = math.exp %60 : vector<32x32xf32>
    %62 = arith.subf %55, %59 : vector<32x32xf32>
    %63 = math.exp %62 : vector<32x32xf32>
    %64 = arith.mulf %61, %48 : vector<32x32xf32>
    %65 = arith.addf %61, %63 : vector<32x32xf32>
    %66 = arith.mulf %63, %58 : vector<32x32xf32>
    %67 = arith.addf %64, %66 : vector<32x32xf32>
    %68 = tpu.reciprocal %65 {approx = true} : vector<32x32xf32> -> vector<32x32xf32>
    %69 = arith.mulf %67, %68 : vector<32x32xf32>
    %70 = arith.truncf %69 : vector<32x32xf32> to vector<32x32xbf16>
    %cst_39 = arith.constant dense<0.000000e+00> : vector<32x32xf32>
    %71 = tpu.matmul %70, %39, %cst_39 {dimension_numbers = #tpu.dot_dimension_numbers<[1], [0], [0], [1], [0, 0, 1, 1], [], []>} : vector<32x32xbf16>, vector<32x32xbf16>, vector<32x32xf32> -> vector<32x32xf32>
    %72 = vector.broadcast %41 : vector<1x32xf32> to vector<32x32xf32>
    %73 = arith.addf %71, %72 : vector<32x32xf32>
    %74 = arith.addf %7, %73 : vector<32x32xf32>
    %c0_40 = arith.constant 0 : index
    %c0_41 = arith.constant 0 : index
    %c0_42 = arith.constant 0 : index
    %c0_43 = arith.constant 0 : index
    %75 = vector.load %arg11[%c0_40, %c0_41, %c0_42, %c0_43] : memref<1x2x1x32xf32, #tpu.memory_space<vmem>>, vector<1x1x1x32xf32>
    %76 = vector.shape_cast %75 : vector<1x1x1x32xf32> to vector<1x32xf32>
    %c0_44 = arith.constant 0 : index
    %c0_45 = arith.constant 0 : index
    %c0_46 = arith.constant 0 : index
    %c0_47 = arith.constant 0 : index
    %77 = vector.load %arg12[%c0_44, %c0_45, %c0_46, %c0_47] : memref<1x2x1x32xf32, #tpu.memory_space<vmem>>, vector<1x1x1x32xf32>
    %78 = vector.shape_cast %77 : vector<1x1x1x32xf32> to vector<1x32xf32>
    %cst_48 = arith.constant dense<0.000000e+00> : vector<32xf32>
    %79 = vector.multi_reduction <add>, %74, %cst_48 [1] : vector<32x32xf32> to vector<32xf32>
    %80 = vector.shape_cast %79 : vector<32xf32> to vector<32x1xf32>
    %cst_49 = arith.constant 3.200000e+01 : f32
    %81 = vector.broadcast %cst_49 : f32 to vector<32x1xf32>
    %82 = arith.divf %80, %81 : vector<32x1xf32>
    %83 = arith.mulf %74, %74 : vector<32x32xf32>
    %cst_50 = arith.constant dense<0.000000e+00> : vector<32xf32>
    %84 = vector.multi_reduction <add>, %83, %cst_50 [1] : vector<32x32xf32> to vector<32xf32>
    %85 = vector.shape_cast %84 : vector<32xf32> to vector<32x1xf32>
    %cst_51 = arith.constant 3.200000e+01 : f32
    %86 = vector.broadcast %cst_51 : f32 to vector<32x1xf32>
    %87 = arith.divf %85, %86 : vector<32x1xf32>
    %88 = arith.mulf %82, %82 : vector<32x1xf32>
    %89 = arith.subf %87, %88 : vector<32x1xf32>
    %90 = vector.broadcast %82 : vector<32x1xf32> to vector<32x32xf32>
    %91 = arith.subf %74, %90 : vector<32x32xf32>
    %cst_52 = arith.constant 9.99999974E-6 : f32
    %92 = vector.broadcast %cst_52 : f32 to vector<32x1xf32>
    %93 = arith.addf %89, %92 : vector<32x1xf32>
    %94 = math.rsqrt %93 : vector<32x1xf32>
    %95 = vector.broadcast %94 : vector<32x1xf32> to vector<32x32xf32>
    %96 = arith.mulf %91, %95 : vector<32x32xf32>
    %97 = vector.broadcast %76 : vector<1x32xf32> to vector<32x32xf32>
    %98 = arith.mulf %96, %97 : vector<32x32xf32>
    %99 = vector.broadcast %78 : vector<1x32xf32> to vector<32x32xf32>
    %100 = arith.addf %98, %99 : vector<32x32xf32>
    %c0_53 = arith.constant 0 : index
    %c0_54 = arith.constant 0 : index
    %c0_55 = arith.constant 0 : index
    %c0_56 = arith.constant 0 : index
    %101 = vector.load %arg13[%c0_53, %c0_54, %c0_55, %c0_56] : memref<1x2x32x128xbf16, #tpu.memory_space<vmem>>, vector<1x1x32x128xbf16>
    %102 = vector.shape_cast %101 : vector<1x1x32x128xbf16> to vector<32x128xbf16>
    %c0_57 = arith.constant 0 : index
    %c0_58 = arith.constant 0 : index
    %c0_59 = arith.constant 0 : index
    %c0_60 = arith.constant 0 : index
    %103 = vector.load %arg14[%c0_57, %c0_58, %c0_59, %c0_60] : memref<1x2x1x128xf32, #tpu.memory_space<vmem>>, vector<1x1x1x128xf32>
    %104 = vector.shape_cast %103 : vector<1x1x1x128xf32> to vector<1x128xf32>
    %c0_61 = arith.constant 0 : index
    %c0_62 = arith.constant 0 : index
    %c0_63 = arith.constant 0 : index
    %c0_64 = arith.constant 0 : index
    %105 = vector.load %arg15[%c0_61, %c0_62, %c0_63, %c0_64] : memref<1x2x128x32xbf16, #tpu.memory_space<vmem>>, vector<1x1x128x32xbf16>
    %106 = vector.shape_cast %105 : vector<1x1x128x32xbf16> to vector<128x32xbf16>
    %c0_65 = arith.constant 0 : index
    %c0_66 = arith.constant 0 : index
    %c0_67 = arith.constant 0 : index
    %c0_68 = arith.constant 0 : index
    %107 = vector.load %arg16[%c0_65, %c0_66, %c0_67, %c0_68] : memref<1x2x1x32xf32, #tpu.memory_space<vmem>>, vector<1x1x1x32xf32>
    %108 = vector.shape_cast %107 : vector<1x1x1x32xf32> to vector<1x32xf32>
    %109 = arith.truncf %100 : vector<32x32xf32> to vector<32x32xbf16>
    %cst_69 = arith.constant dense<0.000000e+00> : vector<32x128xf32>
    %110 = tpu.matmul %109, %102, %cst_69 {dimension_numbers = #tpu.dot_dimension_numbers<[1], [0], [0], [1], [0, 0, 1, 1], [], []>} : vector<32x32xbf16>, vector<32x128xbf16>, vector<32x128xf32> -> vector<32x128xf32>
    %111 = vector.broadcast %104 : vector<1x128xf32> to vector<32x128xf32>
    %112 = arith.addf %110, %111 : vector<32x128xf32>
    %cst_70 = arith.constant 5.000000e-01 : f32
    %113 = vector.broadcast %cst_70 : f32 to vector<32x128xf32>
    %114 = arith.mulf %113, %112 : vector<32x128xf32>
    %cst_71 = arith.constant 4.471500e-02 : f32
    %115 = vector.broadcast %cst_71 : f32 to vector<32x128xf32>
    %116 = arith.mulf %115, %112 : vector<32x128xf32>
    %117 = arith.mulf %116, %112 : vector<32x128xf32>
    %118 = arith.mulf %117, %112 : vector<32x128xf32>
    %119 = arith.addf %112, %118 : vector<32x128xf32>
    %cst_72 = arith.constant 0.797884583 : f32
    %120 = vector.broadcast %cst_72 : f32 to vector<32x128xf32>
    %121 = arith.mulf %120, %119 : vector<32x128xf32>
    %122 = math.tanh %121 : vector<32x128xf32>
    %cst_73 = arith.constant 1.000000e+00 : f32
    %123 = vector.broadcast %cst_73 : f32 to vector<32x128xf32>
    %124 = arith.addf %123, %122 : vector<32x128xf32>
    %125 = arith.mulf %114, %124 : vector<32x128xf32>
    %126 = arith.truncf %125 : vector<32x128xf32> to vector<32x128xbf16>
    %cst_74 = arith.constant dense<0.000000e+00> : vector<32x32xf32>
    %127 = tpu.matmul %126, %106, %cst_74 {dimension_numbers = #tpu.dot_dimension_numbers<[1], [0], [0], [1], [0, 0, 1, 1], [], []>} : vector<32x128xbf16>, vector<128x32xbf16>, vector<32x32xf32> -> vector<32x32xf32>
    %128 = vector.broadcast %108 : vector<1x32xf32> to vector<32x32xf32>
    %129 = arith.addf %127, %128 : vector<32x32xf32>
    %130 = arith.addf %74, %129 : vector<32x32xf32>
    %c0_75 = arith.constant 0 : index
    %c1 = arith.constant 1 : index
    %c0_76 = arith.constant 0 : index
    %c0_77 = arith.constant 0 : index
    %131 = vector.load %arg5[%c0_75, %c1, %c0_76, %c0_77] : memref<1x2x1x32xf32, #tpu.memory_space<vmem>>, vector<1x1x1x32xf32>
    %132 = vector.shape_cast %131 : vector<1x1x1x32xf32> to vector<1x32xf32>
    %c0_78 = arith.constant 0 : index
    %c1_79 = arith.constant 1 : index
    %c0_80 = arith.constant 0 : index
    %c0_81 = arith.constant 0 : index
    %133 = vector.load %arg6[%c0_78, %c1_79, %c0_80, %c0_81] : memref<1x2x1x32xf32, #tpu.memory_space<vmem>>, vector<1x1x1x32xf32>
    %134 = vector.shape_cast %133 : vector<1x1x1x32xf32> to vector<1x32xf32>
    %cst_82 = arith.constant dense<0.000000e+00> : vector<32xf32>
    %135 = vector.multi_reduction <add>, %130, %cst_82 [1] : vector<32x32xf32> to vector<32xf32>
    %136 = vector.shape_cast %135 : vector<32xf32> to vector<32x1xf32>
    %cst_83 = arith.constant 3.200000e+01 : f32
    %137 = vector.broadcast %cst_83 : f32 to vector<32x1xf32>
    %138 = arith.divf %136, %137 : vector<32x1xf32>
    %139 = arith.mulf %130, %130 : vector<32x32xf32>
    %cst_84 = arith.constant dense<0.000000e+00> : vector<32xf32>
    %140 = vector.multi_reduction <add>, %139, %cst_84 [1] : vector<32x32xf32> to vector<32xf32>
    %141 = vector.shape_cast %140 : vector<32xf32> to vector<32x1xf32>
    %cst_85 = arith.constant 3.200000e+01 : f32
    %142 = vector.broadcast %cst_85 : f32 to vector<32x1xf32>
    %143 = arith.divf %141, %142 : vector<32x1xf32>
    %144 = arith.mulf %138, %138 : vector<32x1xf32>
    %145 = arith.subf %143, %144 : vector<32x1xf32>
    %146 = vector.broadcast %138 : vector<32x1xf32> to vector<32x32xf32>
    %147 = arith.subf %130, %146 : vector<32x32xf32>
    %cst_86 = arith.constant 9.99999974E-6 : f32
    %148 = vector.broadcast %cst_86 : f32 to vector<32x1xf32>
    %149 = arith.addf %145, %148 : vector<32x1xf32>
    %150 = math.rsqrt %149 : vector<32x1xf32>
    %151 = vector.broadcast %150 : vector<32x1xf32> to vector<32x32xf32>
    %152 = arith.mulf %147, %151 : vector<32x32xf32>
    %153 = vector.broadcast %132 : vector<1x32xf32> to vector<32x32xf32>
    %154 = arith.mulf %152, %153 : vector<32x32xf32>
    %155 = vector.broadcast %134 : vector<1x32xf32> to vector<32x32xf32>
    %156 = arith.addf %154, %155 : vector<32x32xf32>
    %c0_87 = arith.constant 0 : index
    %c1_88 = arith.constant 1 : index
    %c0_89 = arith.constant 0 : index
    %c0_90 = arith.constant 0 : index
    %157 = vector.load %arg7[%c0_87, %c1_88, %c0_89, %c0_90] : memref<1x2x32x96xbf16, #tpu.memory_space<vmem>>, vector<1x1x32x96xbf16>
    %158 = vector.shape_cast %157 : vector<1x1x32x96xbf16> to vector<32x96xbf16>
    %c0_91 = arith.constant 0 : index
    %c1_92 = arith.constant 1 : index
    %c0_93 = arith.constant 0 : index
    %c0_94 = arith.constant 0 : index
    %159 = vector.load %arg8[%c0_91, %c1_92, %c0_93, %c0_94] : memref<1x2x1x96xf32, #tpu.memory_space<vmem>>, vector<1x1x1x96xf32>
    %160 = vector.shape_cast %159 : vector<1x1x1x96xf32> to vector<1x96xf32>
    %c0_95 = arith.constant 0 : index
    %c1_96 = arith.constant 1 : index
    %c0_97 = arith.constant 0 : index
    %c0_98 = arith.constant 0 : index
    %161 = vector.load %arg9[%c0_95, %c1_96, %c0_97, %c0_98] : memref<1x2x32x32xbf16, #tpu.memory_space<vmem>>, vector<1x1x32x32xbf16>
    %162 = vector.shape_cast %161 : vector<1x1x32x32xbf16> to vector<32x32xbf16>
    %c0_99 = arith.constant 0 : index
    %c1_100 = arith.constant 1 : index
    %c0_101 = arith.constant 0 : index
    %c0_102 = arith.constant 0 : index
    %163 = vector.load %arg10[%c0_99, %c1_100, %c0_101, %c0_102] : memref<1x2x1x32xf32, #tpu.memory_space<vmem>>, vector<1x1x1x32xf32>
    %164 = vector.shape_cast %163 : vector<1x1x1x32xf32> to vector<1x32xf32>
    %165 = arith.truncf %156 : vector<32x32xf32> to vector<32x32xbf16>
    %cst_103 = arith.constant dense<0.000000e+00> : vector<32x96xf32>
    %166 = tpu.matmul %165, %158, %cst_103 {dimension_numbers = #tpu.dot_dimension_numbers<[1], [0], [0], [1], [0, 0, 1, 1], [], []>} : vector<32x32xbf16>, vector<32x96xbf16>, vector<32x96xf32> -> vector<32x96xf32>
    %167 = vector.broadcast %160 : vector<1x96xf32> to vector<32x96xf32>
    %168 = arith.addf %166, %167 : vector<32x96xf32>
    %169 = vector.extract_strided_slice %168 {offsets = [0, 0], sizes = [32, 32], strides = [1, 1]} : vector<32x96xf32> to vector<32x32xf32>
    %170 = vector.extract_strided_slice %168 {offsets = [0, 32], sizes = [32, 32], strides = [1, 1]} : vector<32x96xf32> to vector<32x32xf32>
    %171 = vector.extract_strided_slice %168 {offsets = [0, 64], sizes = [32, 32], strides = [1, 1]} : vector<32x96xf32> to vector<32x32xf32>
    %172 = arith.mulf %169, %170 : vector<32x32xf32>
    %cst_104 = arith.constant dense<0.000000e+00> : vector<32x32xf32>
    %173 = tpu.matmul %172, %0, %cst_104 {dimension_numbers = #tpu.dot_dimension_numbers<[1], [0], [0], [1], [0, 0, 1, 1], [], []>} : vector<32x32xf32>, vector<32x32xf32>, vector<32x32xf32> -> vector<32x32xf32>
    %174 = vector.extract_strided_slice %170 {offsets = [16, 0], sizes = [16, 32], strides = [1, 1]} : vector<32x32xf32> to vector<16x32xf32>
    %175 = vector.extract_strided_slice %170 {offsets = [0, 0], sizes = [16, 32], strides = [1, 1]} : vector<32x32xf32> to vector<16x32xf32>
    %176 = tpu.concatenate %174, %175 in 0 : vector<16x32xf32>, vector<16x32xf32> -> vector<32x32xf32>
    %177 = arith.mulf %169, %176 : vector<32x32xf32>
    %cst_105 = arith.constant dense<0.000000e+00> : vector<32x32xf32>
    %178 = tpu.matmul %177, %0, %cst_105 {dimension_numbers = #tpu.dot_dimension_numbers<[1], [0], [0], [1], [0, 0, 1, 1], [], []>} : vector<32x32xf32>, vector<32x32xf32>, vector<32x32xf32> -> vector<32x32xf32>
    %179 = vector.extract_strided_slice %171 {offsets = [16, 0], sizes = [16, 32], strides = [1, 1]} : vector<32x32xf32> to vector<16x32xf32>
    %180 = vector.extract_strided_slice %171 {offsets = [0, 0], sizes = [16, 32], strides = [1, 1]} : vector<32x32xf32> to vector<16x32xf32>
    %181 = tpu.concatenate %179, %180 in 0 : vector<16x32xf32>, vector<16x32xf32> -> vector<32x32xf32>
    %182 = arith.maximumf %173, %178 : vector<32x32xf32>
    %183 = arith.subf %173, %182 : vector<32x32xf32>
    %184 = math.exp %183 : vector<32x32xf32>
    %185 = arith.subf %178, %182 : vector<32x32xf32>
    %186 = math.exp %185 : vector<32x32xf32>
    %187 = arith.mulf %184, %171 : vector<32x32xf32>
    %188 = arith.addf %184, %186 : vector<32x32xf32>
    %189 = arith.mulf %186, %181 : vector<32x32xf32>
    %190 = arith.addf %187, %189 : vector<32x32xf32>
    %191 = tpu.reciprocal %188 {approx = true} : vector<32x32xf32> -> vector<32x32xf32>
    %192 = arith.mulf %190, %191 : vector<32x32xf32>
    %193 = arith.truncf %192 : vector<32x32xf32> to vector<32x32xbf16>
    %cst_106 = arith.constant dense<0.000000e+00> : vector<32x32xf32>
    %194 = tpu.matmul %193, %162, %cst_106 {dimension_numbers = #tpu.dot_dimension_numbers<[1], [0], [0], [1], [0, 0, 1, 1], [], []>} : vector<32x32xbf16>, vector<32x32xbf16>, vector<32x32xf32> -> vector<32x32xf32>
    %195 = vector.broadcast %164 : vector<1x32xf32> to vector<32x32xf32>
    %196 = arith.addf %194, %195 : vector<32x32xf32>
    %197 = arith.addf %130, %196 : vector<32x32xf32>
    %c0_107 = arith.constant 0 : index
    %c1_108 = arith.constant 1 : index
    %c0_109 = arith.constant 0 : index
    %c0_110 = arith.constant 0 : index
    %198 = vector.load %arg11[%c0_107, %c1_108, %c0_109, %c0_110] : memref<1x2x1x32xf32, #tpu.memory_space<vmem>>, vector<1x1x1x32xf32>
    %199 = vector.shape_cast %198 : vector<1x1x1x32xf32> to vector<1x32xf32>
    %c0_111 = arith.constant 0 : index
    %c1_112 = arith.constant 1 : index
    %c0_113 = arith.constant 0 : index
    %c0_114 = arith.constant 0 : index
    %200 = vector.load %arg12[%c0_111, %c1_112, %c0_113, %c0_114] : memref<1x2x1x32xf32, #tpu.memory_space<vmem>>, vector<1x1x1x32xf32>
    %201 = vector.shape_cast %200 : vector<1x1x1x32xf32> to vector<1x32xf32>
    %cst_115 = arith.constant dense<0.000000e+00> : vector<32xf32>
    %202 = vector.multi_reduction <add>, %197, %cst_115 [1] : vector<32x32xf32> to vector<32xf32>
    %203 = vector.shape_cast %202 : vector<32xf32> to vector<32x1xf32>
    %cst_116 = arith.constant 3.200000e+01 : f32
    %204 = vector.broadcast %cst_116 : f32 to vector<32x1xf32>
    %205 = arith.divf %203, %204 : vector<32x1xf32>
    %206 = arith.mulf %197, %197 : vector<32x32xf32>
    %cst_117 = arith.constant dense<0.000000e+00> : vector<32xf32>
    %207 = vector.multi_reduction <add>, %206, %cst_117 [1] : vector<32x32xf32> to vector<32xf32>
    %208 = vector.shape_cast %207 : vector<32xf32> to vector<32x1xf32>
    %cst_118 = arith.constant 3.200000e+01 : f32
    %209 = vector.broadcast %cst_118 : f32 to vector<32x1xf32>
    %210 = arith.divf %208, %209 : vector<32x1xf32>
    %211 = arith.mulf %205, %205 : vector<32x1xf32>
    %212 = arith.subf %210, %211 : vector<32x1xf32>
    %213 = vector.broadcast %205 : vector<32x1xf32> to vector<32x32xf32>
    %214 = arith.subf %197, %213 : vector<32x32xf32>
    %cst_119 = arith.constant 9.99999974E-6 : f32
    %215 = vector.broadcast %cst_119 : f32 to vector<32x1xf32>
    %216 = arith.addf %212, %215 : vector<32x1xf32>
    %217 = math.rsqrt %216 : vector<32x1xf32>
    %218 = vector.broadcast %217 : vector<32x1xf32> to vector<32x32xf32>
    %219 = arith.mulf %214, %218 : vector<32x32xf32>
    %220 = vector.broadcast %199 : vector<1x32xf32> to vector<32x32xf32>
    %221 = arith.mulf %219, %220 : vector<32x32xf32>
    %222 = vector.broadcast %201 : vector<1x32xf32> to vector<32x32xf32>
    %223 = arith.addf %221, %222 : vector<32x32xf32>
    %c0_120 = arith.constant 0 : index
    %c1_121 = arith.constant 1 : index
    %c0_122 = arith.constant 0 : index
    %c0_123 = arith.constant 0 : index
    %224 = vector.load %arg13[%c0_120, %c1_121, %c0_122, %c0_123] : memref<1x2x32x128xbf16, #tpu.memory_space<vmem>>, vector<1x1x32x128xbf16>
    %225 = vector.shape_cast %224 : vector<1x1x32x128xbf16> to vector<32x128xbf16>
    %c0_124 = arith.constant 0 : index
    %c1_125 = arith.constant 1 : index
    %c0_126 = arith.constant 0 : index
    %c0_127 = arith.constant 0 : index
    %226 = vector.load %arg14[%c0_124, %c1_125, %c0_126, %c0_127] : memref<1x2x1x128xf32, #tpu.memory_space<vmem>>, vector<1x1x1x128xf32>
    %227 = vector.shape_cast %226 : vector<1x1x1x128xf32> to vector<1x128xf32>
    %c0_128 = arith.constant 0 : index
    %c1_129 = arith.constant 1 : index
    %c0_130 = arith.constant 0 : index
    %c0_131 = arith.constant 0 : index
    %228 = vector.load %arg15[%c0_128, %c1_129, %c0_130, %c0_131] : memref<1x2x128x32xbf16, #tpu.memory_space<vmem>>, vector<1x1x128x32xbf16>
    %229 = vector.shape_cast %228 : vector<1x1x128x32xbf16> to vector<128x32xbf16>
    %c0_132 = arith.constant 0 : index
    %c1_133 = arith.constant 1 : index
    %c0_134 = arith.constant 0 : index
    %c0_135 = arith.constant 0 : index
    %230 = vector.load %arg16[%c0_132, %c1_133, %c0_134, %c0_135] : memref<1x2x1x32xf32, #tpu.memory_space<vmem>>, vector<1x1x1x32xf32>
    %231 = vector.shape_cast %230 : vector<1x1x1x32xf32> to vector<1x32xf32>
    %232 = arith.truncf %223 : vector<32x32xf32> to vector<32x32xbf16>
    %cst_136 = arith.constant dense<0.000000e+00> : vector<32x128xf32>
    %233 = tpu.matmul %232, %225, %cst_136 {dimension_numbers = #tpu.dot_dimension_numbers<[1], [0], [0], [1], [0, 0, 1, 1], [], []>} : vector<32x32xbf16>, vector<32x128xbf16>, vector<32x128xf32> -> vector<32x128xf32>
    %234 = vector.broadcast %227 : vector<1x128xf32> to vector<32x128xf32>
    %235 = arith.addf %233, %234 : vector<32x128xf32>
    %cst_137 = arith.constant 5.000000e-01 : f32
    %236 = vector.broadcast %cst_137 : f32 to vector<32x128xf32>
    %237 = arith.mulf %236, %235 : vector<32x128xf32>
    %cst_138 = arith.constant 4.471500e-02 : f32
    %238 = vector.broadcast %cst_138 : f32 to vector<32x128xf32>
    %239 = arith.mulf %238, %235 : vector<32x128xf32>
    %240 = arith.mulf %239, %235 : vector<32x128xf32>
    %241 = arith.mulf %240, %235 : vector<32x128xf32>
    %242 = arith.addf %235, %241 : vector<32x128xf32>
    %cst_139 = arith.constant 0.797884583 : f32
    %243 = vector.broadcast %cst_139 : f32 to vector<32x128xf32>
    %244 = arith.mulf %243, %242 : vector<32x128xf32>
    %245 = math.tanh %244 : vector<32x128xf32>
    %cst_140 = arith.constant 1.000000e+00 : f32
    %246 = vector.broadcast %cst_140 : f32 to vector<32x128xf32>
    %247 = arith.addf %246, %245 : vector<32x128xf32>
    %248 = arith.mulf %237, %247 : vector<32x128xf32>
    %249 = arith.truncf %248 : vector<32x128xf32> to vector<32x128xbf16>
    %cst_141 = arith.constant dense<0.000000e+00> : vector<32x32xf32>
    %250 = tpu.matmul %249, %229, %cst_141 {dimension_numbers = #tpu.dot_dimension_numbers<[1], [0], [0], [1], [0, 0, 1, 1], [], []>} : vector<32x128xbf16>, vector<128x32xbf16>, vector<32x32xf32> -> vector<32x32xf32>
    %251 = vector.broadcast %231 : vector<1x32xf32> to vector<32x32xf32>
    %252 = arith.addf %250, %251 : vector<32x32xf32>
    %253 = arith.addf %197, %252 : vector<32x32xf32>
    %c0_142 = arith.constant 0 : index
    %c0_143 = arith.constant 0 : index
    %c0_144 = arith.constant 0 : index
    %254 = vector.load %arg29[%c0_142, %c0_143, %c0_144] : memref<1x32x32xf32, #tpu.memory_space<vmem>>, vector<1x32x32xf32>
    %255 = vector.shape_cast %254 : vector<1x32x32xf32> to vector<32x32xf32>
    %256 = vector.shape_cast %253 : vector<32x32xf32> to vector<1x32x32xf32>
    tpu.vector_store %arg29[%c0_142, %c0_143, %c0_144], %256 {strides = array<i32>} : memref<1x32x32xf32, #tpu.memory_space<vmem>>, vector<1x32x32xf32>,
    %c0_i32 = arith.constant 0 : i32
    %257 = arith.cmpi eq, %arg0, %c0_i32 : i32
    %258 = arith.extui %257 : i1 to i32
    %c0_i32_145 = arith.constant 0 : i32
    %259 = arith.cmpi ne, %258, %c0_i32_145 : i32
    scf.if %259 {
      %c0_146 = arith.constant 0 : index
      %c0_147 = arith.constant 0 : index
      %c0_148 = arith.constant 0 : index
      %260 = vector.load %arg29[%c0_146, %c0_147, %c0_148] : memref<1x32x32xf32, #tpu.memory_space<vmem>>, vector<1x32x32xf32>
      %261 = vector.shape_cast %260 : vector<1x32x32xf32> to vector<32x32xf32>
      %c0_149 = arith.constant 0 : index
      %c0_150 = arith.constant 0 : index
      %c0_151 = arith.constant 0 : index
      %262 = vector.load %arg17[%c0_149, %c0_150, %c0_151] : memref<1x1x32xf32, #tpu.memory_space<vmem>>, vector<1x1x32xf32>
      %263 = vector.shape_cast %262 : vector<1x1x32xf32> to vector<1x32xf32>
      %c0_152 = arith.constant 0 : index
      %c0_153 = arith.constant 0 : index
      %c0_154 = arith.constant 0 : index
      %264 = vector.load %arg18[%c0_152, %c0_153, %c0_154] : memref<1x1x32xf32, #tpu.memory_space<vmem>>, vector<1x1x32xf32>
      %265 = vector.shape_cast %264 : vector<1x1x32xf32> to vector<1x32xf32>
      %cst_155 = arith.constant dense<0.000000e+00> : vector<32xf32>
      %266 = vector.multi_reduction <add>, %261, %cst_155 [1] : vector<32x32xf32> to vector<32xf32>
      %267 = vector.shape_cast %266 : vector<32xf32> to vector<32x1xf32>
      %cst_156 = arith.constant 3.200000e+01 : f32
      %268 = vector.broadcast %cst_156 : f32 to vector<32x1xf32>
      %269 = arith.divf %267, %268 : vector<32x1xf32>
      %270 = arith.mulf %261, %261 : vector<32x32xf32>
      %cst_157 = arith.constant dense<0.000000e+00> : vector<32xf32>
      %271 = vector.multi_reduction <add>, %270, %cst_157 [1] : vector<32x32xf32> to vector<32xf32>
      %272 = vector.shape_cast %271 : vector<32xf32> to vector<32x1xf32>
      %cst_158 = arith.constant 3.200000e+01 : f32
      %273 = vector.broadcast %cst_158 : f32 to vector<32x1xf32>
      %274 = arith.divf %272, %273 : vector<32x1xf32>
      %275 = arith.mulf %269, %269 : vector<32x1xf32>
      %276 = arith.subf %274, %275 : vector<32x1xf32>
      %277 = vector.broadcast %269 : vector<32x1xf32> to vector<32x32xf32>
      %278 = arith.subf %261, %277 : vector<32x32xf32>
      %cst_159 = arith.constant 9.99999974E-6 : f32
      %279 = vector.broadcast %cst_159 : f32 to vector<32x1xf32>
      %280 = arith.addf %276, %279 : vector<32x1xf32>
      %281 = math.rsqrt %280 : vector<32x1xf32>
      %282 = vector.broadcast %281 : vector<32x1xf32> to vector<32x32xf32>
      %283 = arith.mulf %278, %282 : vector<32x32xf32>
      %284 = vector.broadcast %263 : vector<1x32xf32> to vector<32x32xf32>
      %285 = arith.mulf %283, %284 : vector<32x32xf32>
      %286 = vector.broadcast %265 : vector<1x32xf32> to vector<32x32xf32>
      %287 = arith.addf %285, %286 : vector<32x32xf32>
      %c0_160 = arith.constant 0 : index
      %c0_161 = arith.constant 0 : index
      %c0_162 = arith.constant 0 : index
      %288 = vector.load %arg19[%c0_160, %c0_161, %c0_162] : memref<1x32x96xbf16, #tpu.memory_space<vmem>>, vector<1x32x96xbf16>
      %289 = vector.shape_cast %288 : vector<1x32x96xbf16> to vector<32x96xbf16>
      %c0_163 = arith.constant 0 : index
      %c0_164 = arith.constant 0 : index
      %c0_165 = arith.constant 0 : index
      %290 = vector.load %arg20[%c0_163, %c0_164, %c0_165] : memref<1x1x96xf32, #tpu.memory_space<vmem>>, vector<1x1x96xf32>
      %291 = vector.shape_cast %290 : vector<1x1x96xf32> to vector<1x96xf32>
      %c0_166 = arith.constant 0 : index
      %c0_167 = arith.constant 0 : index
      %c0_168 = arith.constant 0 : index
      %292 = vector.load %arg21[%c0_166, %c0_167, %c0_168] : memref<1x32x32xbf16, #tpu.memory_space<vmem>>, vector<1x32x32xbf16>
      %293 = vector.shape_cast %292 : vector<1x32x32xbf16> to vector<32x32xbf16>
      %c0_169 = arith.constant 0 : index
      %c0_170 = arith.constant 0 : index
      %c0_171 = arith.constant 0 : index
      %294 = vector.load %arg22[%c0_169, %c0_170, %c0_171] : memref<1x1x32xf32, #tpu.memory_space<vmem>>, vector<1x1x32xf32>
      %295 = vector.shape_cast %294 : vector<1x1x32xf32> to vector<1x32xf32>
      %296 = arith.truncf %287 : vector<32x32xf32> to vector<32x32xbf16>
      %cst_172 = arith.constant dense<0.000000e+00> : vector<32x96xf32>
      %297 = tpu.matmul %296, %289, %cst_172 {dimension_numbers = #tpu.dot_dimension_numbers<[1], [0], [0], [1], [0, 0, 1, 1], [], []>} : vector<32x32xbf16>, vector<32x96xbf16>, vector<32x96xf32> -> vector<32x96xf32>
      %298 = vector.broadcast %291 : vector<1x96xf32> to vector<32x96xf32>
      %299 = arith.addf %297, %298 : vector<32x96xf32>
      %300 = vector.extract_strided_slice %299 {offsets = [0, 0], sizes = [32, 32], strides = [1, 1]} : vector<32x96xf32> to vector<32x32xf32>
      %301 = vector.extract_strided_slice %299 {offsets = [0, 32], sizes = [32, 32], strides = [1, 1]} : vector<32x96xf32> to vector<32x32xf32>
      %302 = vector.extract_strided_slice %299 {offsets = [0, 64], sizes = [32, 32], strides = [1, 1]} : vector<32x96xf32> to vector<32x32xf32>
      %303 = arith.mulf %300, %301 : vector<32x32xf32>
      %cst_173 = arith.constant dense<0.000000e+00> : vector<32x32xf32>
      %304 = tpu.matmul %303, %0, %cst_173 {dimension_numbers = #tpu.dot_dimension_numbers<[1], [0], [0], [1], [0, 0, 1, 1], [], []>} : vector<32x32xf32>, vector<32x32xf32>, vector<32x32xf32> -> vector<32x32xf32>
      %305 = vector.extract_strided_slice %301 {offsets = [16, 0], sizes = [16, 32], strides = [1, 1]} : vector<32x32xf32> to vector<16x32xf32>
      %306 = vector.extract_strided_slice %301 {offsets = [0, 0], sizes = [16, 32], strides = [1, 1]} : vector<32x32xf32> to vector<16x32xf32>
      %307 = tpu.concatenate %305, %306 in 0 : vector<16x32xf32>, vector<16x32xf32> -> vector<32x32xf32>
      %308 = arith.mulf %300, %307 : vector<32x32xf32>
      %cst_174 = arith.constant dense<0.000000e+00> : vector<32x32xf32>
      %309 = tpu.matmul %308, %0, %cst_174 {dimension_numbers = #tpu.dot_dimension_numbers<[1], [0], [0], [1], [0, 0, 1, 1], [], []>} : vector<32x32xf32>, vector<32x32xf32>, vector<32x32xf32> -> vector<32x32xf32>
      %310 = vector.extract_strided_slice %302 {offsets = [16, 0], sizes = [16, 32], strides = [1, 1]} : vector<32x32xf32> to vector<16x32xf32>
      %311 = vector.extract_strided_slice %302 {offsets = [0, 0], sizes = [16, 32], strides = [1, 1]} : vector<32x32xf32> to vector<16x32xf32>
      %312 = tpu.concatenate %310, %311 in 0 : vector<16x32xf32>, vector<16x32xf32> -> vector<32x32xf32>
      %313 = arith.maximumf %304, %309 : vector<32x32xf32>
      %314 = arith.subf %304, %313 : vector<32x32xf32>
      %315 = math.exp %314 : vector<32x32xf32>
      %316 = arith.subf %309, %313 : vector<32x32xf32>
      %317 = math.exp %316 : vector<32x32xf32>
      %318 = arith.mulf %315, %302 : vector<32x32xf32>
      %319 = arith.addf %315, %317 : vector<32x32xf32>
      %320 = arith.mulf %317, %312 : vector<32x32xf32>
      %321 = arith.addf %318, %320 : vector<32x32xf32>
      %322 = tpu.reciprocal %319 {approx = true} : vector<32x32xf32> -> vector<32x32xf32>
      %323 = arith.mulf %321, %322 : vector<32x32xf32>
      %324 = arith.truncf %323 : vector<32x32xf32> to vector<32x32xbf16>
      %cst_175 = arith.constant dense<0.000000e+00> : vector<32x32xf32>
      %325 = tpu.matmul %324, %293, %cst_175 {dimension_numbers = #tpu.dot_dimension_numbers<[1], [0], [0], [1], [0, 0, 1, 1], [], []>} : vector<32x32xbf16>, vector<32x32xbf16>, vector<32x32xf32> -> vector<32x32xf32>
      %326 = vector.broadcast %295 : vector<1x32xf32> to vector<32x32xf32>
      %327 = arith.addf %325, %326 : vector<32x32xf32>
      %328 = arith.addf %261, %327 : vector<32x32xf32>
      %c0_176 = arith.constant 0 : index
      %c0_177 = arith.constant 0 : index
      %c0_178 = arith.constant 0 : index
      %329 = vector.load %arg23[%c0_176, %c0_177, %c0_178] : memref<1x1x32xf32, #tpu.memory_space<vmem>>, vector<1x1x32xf32>
      %330 = vector.shape_cast %329 : vector<1x1x32xf32> to vector<1x32xf32>
      %c0_179 = arith.constant 0 : index
      %c0_180 = arith.constant 0 : index
      %c0_181 = arith.constant 0 : index
      %331 = vector.load %arg24[%c0_179, %c0_180, %c0_181] : memref<1x1x32xf32, #tpu.memory_space<vmem>>, vector<1x1x32xf32>
      %332 = vector.shape_cast %331 : vector<1x1x32xf32> to vector<1x32xf32>
      %cst_182 = arith.constant dense<0.000000e+00> : vector<32xf32>
      %333 = vector.multi_reduction <add>, %328, %cst_182 [1] : vector<32x32xf32> to vector<32xf32>
      %334 = vector.shape_cast %333 : vector<32xf32> to vector<32x1xf32>
      %cst_183 = arith.constant 3.200000e+01 : f32
      %335 = vector.broadcast %cst_183 : f32 to vector<32x1xf32>
      %336 = arith.divf %334, %335 : vector<32x1xf32>
      %337 = arith.mulf %328, %328 : vector<32x32xf32>
      %cst_184 = arith.constant dense<0.000000e+00> : vector<32xf32>
      %338 = vector.multi_reduction <add>, %337, %cst_184 [1] : vector<32x32xf32> to vector<32xf32>
      %339 = vector.shape_cast %338 : vector<32xf32> to vector<32x1xf32>
      %cst_185 = arith.constant 3.200000e+01 : f32
      %340 = vector.broadcast %cst_185 : f32 to vector<32x1xf32>
      %341 = arith.divf %339, %340 : vector<32x1xf32>
      %342 = arith.mulf %336, %336 : vector<32x1xf32>
      %343 = arith.subf %341, %342 : vector<32x1xf32>
      %344 = vector.broadcast %336 : vector<32x1xf32> to vector<32x32xf32>
      %345 = arith.subf %328, %344 : vector<32x32xf32>
      %cst_186 = arith.constant 9.99999974E-6 : f32
      %346 = vector.broadcast %cst_186 : f32 to vector<32x1xf32>
      %347 = arith.addf %343, %346 : vector<32x1xf32>
      %348 = math.rsqrt %347 : vector<32x1xf32>
      %349 = vector.broadcast %348 : vector<32x1xf32> to vector<32x32xf32>
      %350 = arith.mulf %345, %349 : vector<32x32xf32>
      %351 = vector.broadcast %330 : vector<1x32xf32> to vector<32x32xf32>
      %352 = arith.mulf %350, %351 : vector<32x32xf32>
      %353 = vector.broadcast %332 : vector<1x32xf32> to vector<32x32xf32>
      %354 = arith.addf %352, %353 : vector<32x32xf32>
      %c0_187 = arith.constant 0 : index
      %c0_188 = arith.constant 0 : index
      %c0_189 = arith.constant 0 : index
      %355 = vector.load %arg25[%c0_187, %c0_188, %c0_189] : memref<1x32x128xbf16, #tpu.memory_space<vmem>>, vector<1x32x128xbf16>
      %356 = vector.shape_cast %355 : vector<1x32x128xbf16> to vector<32x128xbf16>
      %c0_190 = arith.constant 0 : index
      %c0_191 = arith.constant 0 : index
      %c0_192 = arith.constant 0 : index
      %357 = vector.load %arg26[%c0_190, %c0_191, %c0_192] : memref<1x1x128xf32, #tpu.memory_space<vmem>>, vector<1x1x128xf32>
      %358 = vector.shape_cast %357 : vector<1x1x128xf32> to vector<1x128xf32>
      %c0_193 = arith.constant 0 : index
      %c0_194 = arith.constant 0 : index
      %c0_195 = arith.constant 0 : index
      %359 = vector.load %arg27[%c0_193, %c0_194, %c0_195] : memref<1x128x32xbf16, #tpu.memory_space<vmem>>, vector<1x128x32xbf16>
      %360 = vector.shape_cast %359 : vector<1x128x32xbf16> to vector<128x32xbf16>
      %c0_196 = arith.constant 0 : index
      %c0_197 = arith.constant 0 : index
      %c0_198 = arith.constant 0 : index
      %361 = vector.load %arg28[%c0_196, %c0_197, %c0_198] : memref<1x1x32xf32, #tpu.memory_space<vmem>>, vector<1x1x32xf32>
      %362 = vector.shape_cast %361 : vector<1x1x32xf32> to vector<1x32xf32>
      %363 = arith.truncf %354 : vector<32x32xf32> to vector<32x32xbf16>
      %cst_199 = arith.constant dense<0.000000e+00> : vector<32x128xf32>
      %364 = tpu.matmul %363, %356, %cst_199 {dimension_numbers = #tpu.dot_dimension_numbers<[1], [0], [0], [1], [0, 0, 1, 1], [], []>} : vector<32x32xbf16>, vector<32x128xbf16>, vector<32x128xf32> -> vector<32x128xf32>
      %365 = vector.broadcast %358 : vector<1x128xf32> to vector<32x128xf32>
      %366 = arith.addf %364, %365 : vector<32x128xf32>
      %cst_200 = arith.constant 5.000000e-01 : f32
      %367 = vector.broadcast %cst_200 : f32 to vector<32x128xf32>
      %368 = arith.mulf %367, %366 : vector<32x128xf32>
      %cst_201 = arith.constant 4.471500e-02 : f32
      %369 = vector.broadcast %cst_201 : f32 to vector<32x128xf32>
      %370 = arith.mulf %369, %366 : vector<32x128xf32>
      %371 = arith.mulf %370, %366 : vector<32x128xf32>
      %372 = arith.mulf %371, %366 : vector<32x128xf32>
      %373 = arith.addf %366, %372 : vector<32x128xf32>
      %cst_202 = arith.constant 0.797884583 : f32
      %374 = vector.broadcast %cst_202 : f32 to vector<32x128xf32>
      %375 = arith.mulf %374, %373 : vector<32x128xf32>
      %376 = math.tanh %375 : vector<32x128xf32>
      %cst_203 = arith.constant 1.000000e+00 : f32
      %377 = vector.broadcast %cst_203 : f32 to vector<32x128xf32>
      %378 = arith.addf %377, %376 : vector<32x128xf32>
      %379 = arith.mulf %368, %378 : vector<32x128xf32>
      %380 = arith.truncf %379 : vector<32x128xf32> to vector<32x128xbf16>
      %cst_204 = arith.constant dense<0.000000e+00> : vector<32x32xf32>
      %381 = tpu.matmul %380, %360, %cst_204 {dimension_numbers = #tpu.dot_dimension_numbers<[1], [0], [0], [1], [0, 0, 1, 1], [], []>} : vector<32x128xbf16>, vector<128x32xbf16>, vector<32x32xf32> -> vector<32x32xf32>
      %382 = vector.broadcast %362 : vector<1x32xf32> to vector<32x32xf32>
      %383 = arith.addf %381, %382 : vector<32x32xf32>
      %384 = arith.addf %328, %383 : vector<32x32xf32>
      %c0_205 = arith.constant 0 : index
      %c0_206 = arith.constant 0 : index
      %c0_207 = arith.constant 0 : index
      %385 = vector.load %arg29[%c0_205, %c0_206, %c0_207] : memref<1x32x32xf32, #tpu.memory_space<vmem>>, vector<1x32x32xf32>
      %386 = vector.shape_cast %385 : vector<1x32x32xf32> to vector<32x32xf32>
      %387 = vector.shape_cast %384 : vector<32x32xf32> to vector<1x32x32xf32>
      tpu.vector_store %arg29[%c0_205, %c0_206, %c0_207], %387 {strides = array<i32>} : memref<1x32x32xf32, #tpu.memory_space<vmem>>, vector<1x32x32xf32>,
    } else {
    }
    return
  }
  func.func @transform_0(%arg0: i32) -> (i32, i32) {
    %c0_i32 = arith.constant 0 : i32
    %c0_i32_0 = arith.constant 0 : i32
    %c0_i32_1 = arith.constant 0 : i32
    return %c0_i32, %c0_i32_0 : i32, i32
  }
  func.func @transform_1(%arg0: i32) -> (i32, i32) {
    %c0_i32 = arith.constant 0 : i32
    %c0_i32_0 = arith.constant 0 : i32
    %c0_i32_1 = arith.constant 0 : i32
    return %c0_i32, %c0_i32_0 : i32, i32
  }
  func.func @transform_2(%arg0: i32) -> (i32, i32) {
    %c0_i32 = arith.constant 0 : i32
    %c0_i32_0 = arith.constant 0 : i32
    %c0_i32_1 = arith.constant 0 : i32
    return %c0_i32, %c0_i32_0 : i32, i32
  }
  func.func @transform_3(%arg0: i32) -> (i32, i32) {
    %c0_i32 = arith.constant 0 : i32
    %c0_i32_0 = arith.constant 0 : i32
    %c0_i32_1 = arith.constant 0 : i32
    return %c0_i32, %c0_i32_0 : i32, i32
  }
  func.func @transform_4(%arg0: i32) -> (i32, i32, i32, i32) {
    %c0_i32 = arith.constant 0 : i32
    %c0_i32_0 = arith.constant 0 : i32
    %c0_i32_1 = arith.constant 0 : i32
    %c0_i32_2 = arith.constant 0 : i32
    return %arg0, %c0_i32, %c0_i32_0, %c0_i32_1 : i32, i32, i32, i32
  }
  func.func @transform_5(%arg0: i32) -> (i32, i32, i32, i32) {
    %c0_i32 = arith.constant 0 : i32
    %c0_i32_0 = arith.constant 0 : i32
    %c0_i32_1 = arith.constant 0 : i32
    %c0_i32_2 = arith.constant 0 : i32
    return %arg0, %c0_i32, %c0_i32_0, %c0_i32_1 : i32, i32, i32, i32
  }
  func.func @transform_6(%arg0: i32) -> (i32, i32, i32, i32) {
    %c0_i32 = arith.constant 0 : i32
    %c0_i32_0 = arith.constant 0 : i32
    %c0_i32_1 = arith.constant 0 : i32
    %c0_i32_2 = arith.constant 0 : i32
    return %arg0, %c0_i32, %c0_i32_0, %c0_i32_1 : i32, i32, i32, i32
  }
  func.func @transform_7(%arg0: i32) -> (i32, i32, i32, i32) {
    %c0_i32 = arith.constant 0 : i32
    %c0_i32_0 = arith.constant 0 : i32
    %c0_i32_1 = arith.constant 0 : i32
    %c0_i32_2 = arith.constant 0 : i32
    return %arg0, %c0_i32, %c0_i32_0, %c0_i32_1 : i32, i32, i32, i32
  }
  func.func @transform_8(%arg0: i32) -> (i32, i32, i32, i32) {
    %c0_i32 = arith.constant 0 : i32
    %c0_i32_0 = arith.constant 0 : i32
    %c0_i32_1 = arith.constant 0 : i32
    %c0_i32_2 = arith.constant 0 : i32
    return %arg0, %c0_i32, %c0_i32_0, %c0_i32_1 : i32, i32, i32, i32
  }
  func.func @transform_9(%arg0: i32) -> (i32, i32, i32, i32) {
    %c0_i32 = arith.constant 0 : i32
    %c0_i32_0 = arith.constant 0 : i32
    %c0_i32_1 = arith.constant 0 : i32
    %c0_i32_2 = arith.constant 0 : i32
    return %arg0, %c0_i32, %c0_i32_0, %c0_i32_1 : i32, i32, i32, i32
  }
  func.func @transform_10(%arg0: i32) -> (i32, i32, i32, i32) {
    %c0_i32 = arith.constant 0 : i32
    %c0_i32_0 = arith.constant 0 : i32
    %c0_i32_1 = arith.constant 0 : i32
    %c0_i32_2 = arith.constant 0 : i32
    return %arg0, %c0_i32, %c0_i32_0, %c0_i32_1 : i32, i32, i32, i32
  }
  func.func @transform_11(%arg0: i32) -> (i32, i32, i32, i32) {
    %c0_i32 = arith.constant 0 : i32
    %c0_i32_0 = arith.constant 0 : i32
    %c0_i32_1 = arith.constant 0 : i32
    %c0_i32_2 = arith.constant 0 : i32
    return %arg0, %c0_i32, %c0_i32_0, %c0_i32_1 : i32, i32, i32, i32
  }
  func.func @transform_12(%arg0: i32) -> (i32, i32, i32, i32) {
    %c0_i32 = arith.constant 0 : i32
    %c0_i32_0 = arith.constant 0 : i32
    %c0_i32_1 = arith.constant 0 : i32
    %c0_i32_2 = arith.constant 0 : i32
    return %arg0, %c0_i32, %c0_i32_0, %c0_i32_1 : i32, i32, i32, i32
  }
  func.func @transform_13(%arg0: i32) -> (i32, i32, i32, i32) {
    %c0_i32 = arith.constant 0 : i32
    %c0_i32_0 = arith.constant 0 : i32
    %c0_i32_1 = arith.constant 0 : i32
    %c0_i32_2 = arith.constant 0 : i32
    return %arg0, %c0_i32, %c0_i32_0, %c0_i32_1 : i32, i32, i32, i32
  }
  func.func @transform_14(%arg0: i32) -> (i32, i32, i32, i32) {
    %c0_i32 = arith.constant 0 : i32
    %c0_i32_0 = arith.constant 0 : i32
    %c0_i32_1 = arith.constant 0 : i32
    %c0_i32_2 = arith.constant 0 : i32
    return %arg0, %c0_i32, %c0_i32_0, %c0_i32_1 : i32, i32, i32, i32
  }
  func.func @transform_15(%arg0: i32) -> (i32, i32, i32, i32) {
    %c0_i32 = arith.constant 0 : i32
    %c0_i32_0 = arith.constant 0 : i32
    %c0_i32_1 = arith.constant 0 : i32
    %c0_i32_2 = arith.constant 0 : i32
    return %arg0, %c0_i32, %c0_i32_0, %c0_i32_1 : i32, i32, i32, i32
  }
  func.func @transform_16(%arg0: i32) -> (i32, i32, i32) {
    %c0_i32 = arith.constant 0 : i32
    %c0_i32_0 = arith.constant 0 : i32
    %c0_i32_1 = arith.constant 0 : i32
    %c0_i32_2 = arith.constant 0 : i32
    return %c0_i32, %c0_i32_0, %c0_i32_1 : i32, i32, i32
  }
  func.func @transform_17(%arg0: i32) -> (i32, i32, i32) {
    %c0_i32 = arith.constant 0 : i32
    %c0_i32_0 = arith.constant 0 : i32
    %c0_i32_1 = arith.constant 0 : i32
    %c0_i32_2 = arith.constant 0 : i32
    return %c0_i32, %c0_i32_0, %c0_i32_1 : i32, i32, i32
  }
  func.func @transform_18(%arg0: i32) -> (i32, i32, i32) {
    %c0_i32 = arith.constant 0 : i32
    %c0_i32_0 = arith.constant 0 : i32
    %c0_i32_1 = arith.constant 0 : i32
    %c0_i32_2 = arith.constant 0 : i32
    return %c0_i32, %c0_i32_0, %c0_i32_1 : i32, i32, i32
  }
  func.func @transform_19(%arg0: i32) -> (i32, i32, i32) {
    %c0_i32 = arith.constant 0 : i32
    %c0_i32_0 = arith.constant 0 : i32
    %c0_i32_1 = arith.constant 0 : i32
    %c0_i32_2 = arith.constant 0 : i32
    return %c0_i32, %c0_i32_0, %c0_i32_1 : i32, i32, i32
  }
  func.func @transform_20(%arg0: i32) -> (i32, i32, i32) {
    %c0_i32 = arith.constant 0 : i32
    %c0_i32_0 = arith.constant 0 : i32
    %c0_i32_1 = arith.constant 0 : i32
    %c0_i32_2 = arith.constant 0 : i32
    return %c0_i32, %c0_i32_0, %c0_i32_1 : i32, i32, i32
  }
  func.func @transform_21(%arg0: i32) -> (i32, i32, i32) {
    %c0_i32 = arith.constant 0 : i32
    %c0_i32_0 = arith.constant 0 : i32
    %c0_i32_1 = arith.constant 0 : i32
    %c0_i32_2 = arith.constant 0 : i32
    return %c0_i32, %c0_i32_0, %c0_i32_1 : i32, i32, i32
  }
  func.func @transform_22(%arg0: i32) -> (i32, i32, i32) {
    %c0_i32 = arith.constant 0 : i32
    %c0_i32_0 = arith.constant 0 : i32
    %c0_i32_1 = arith.constant 0 : i32
    %c0_i32_2 = arith.constant 0 : i32
    return %c0_i32, %c0_i32_0, %c0_i32_1 : i32, i32, i32
  }
  func.func @transform_23(%arg0: i32) -> (i32, i32, i32) {
    %c0_i32 = arith.constant 0 : i32
    %c0_i32_0 = arith.constant 0 : i32
    %c0_i32_1 = arith.constant 0 : i32
    %c0_i32_2 = arith.constant 0 : i32
    return %c0_i32, %c0_i32_0, %c0_i32_1 : i32, i32, i32
  }
  func.func @transform_24(%arg0: i32) -> (i32, i32, i32) {
    %c0_i32 = arith.constant 0 : i32
    %c0_i32_0 = arith.constant 0 : i32
    %c0_i32_1 = arith.constant 0 : i32
    %c0_i32_2 = arith.constant 0 : i32
    return %c0_i32, %c0_i32_0, %c0_i32_1 : i32, i32, i32
  }
  func.func @transform_25(%arg0: i32) -> (i32, i32, i32) {
    %c0_i32 = arith.constant 0 : i32
    %c0_i32_0 = arith.constant 0 : i32
    %c0_i32_1 = arith.constant 0 : i32
    %c0_i32_2 = arith.constant 0 : i32
    return %c0_i32, %c0_i32_0, %c0_i32_1 : i32, i32, i32
  }
  func.func @transform_26(%arg0: i32) -> (i32, i32, i32) {
    %c0_i32 = arith.constant 0 : i32
    %c0_i32_0 = arith.constant 0 : i32
    %c0_i32_1 = arith.constant 0 : i32
    %c0_i32_2 = arith.constant 0 : i32
    return %c0_i32, %c0_i32_0, %c0_i32_1 : i32, i32, i32
  }
  func.func @transform_27(%arg0: i32) -> (i32, i32, i32) {
    %c0_i32 = arith.constant 0 : i32
    %c0_i32_0 = arith.constant 0 : i32
    %c0_i32_1 = arith.constant 0 : i32
    %c0_i32_2 = arith.constant 0 : i32
    return %c0_i32, %c0_i32_0, %c0_i32_1 : i32, i32, i32
  }
  func.func @transform_28(%arg0: i32) -> (i32, i32, i32) {
    %c0_i32 = arith.constant 0 : i32
    %c0_i32_0 = arith.constant 0 : i32
    %c0_i32_1 = arith.constant 0 : i32
    return %arg0, %c0_i32, %c0_i32_0 : i32, i32, i32
  }
}

</mosaic_0001>

<bundles_post_ra>
// kernel: _lambda_.1
= control target key start
LH: loop header
LB: loop body
LE: loop exit
PB: predicated region body
PF: predicated region fallthrough
CT: control target
= control target key end

     0   :  { %s4704_s0 = inlined_call_operand.vmem [shape: f32[32,64], index: 0, kind: input, shape index: {}]   ;;  %s4705_s1 = inlined_call_operand.vmem [shape: bf16[64,32], index: 1, kind: input, shape index: {}]   ;;  %s4706_s2 = inlined_call_operand.vmem [shape: f32[1,32], index: 2, kind: input, shape index: {}]   ;;  %s4707_s3 = inlined_call_operand.vmem [shape: f32[32,32], index: 3, kind: input, shape index: {}]   ;;  %s4708_s4 = inlined_call_operand.vmem [shape: f32[2,2,1,32], index: 4, kind: input, shape index: {}, may-alias: {4,10}]   ;;  %s4709_s5 = inlined_call_operand.vmem [shape: f32[2,2,1,32], index: 5, kind: input, shape index: {}, may-alias: {5,9,11,15}]   ;;  %s4710_s6 = inlined_call_operand.vmem [shape: bf16[2,2,32,96], index: 6, kind: input, shape index: {}]   ;;  %s4711_s7 = inlined_call_operand.vmem [shape: f32[2,2,1,96], index: 7, kind: input, shape index: {}]   ;;  %s4712_s8 = inlined_call_operand.vmem [shape: bf16[2,2,32,32], index: 8, kind: input, shape index: {}]   ;;  %s4713_s9 = inlined_call_operand.vmem [shape: f32[2,2,1,32], index: 9, kind: input, shape index: {}, may-alias: {5,9,11,15}]   ;;  %s4714_s10 = inlined_call_operand.vmem [shape: f32[2,2,1,32], index: 10, kind: input, shape index: {}, may-alias: {4,10}]   ;;  %s4715_s11 = inlined_call_operand.vmem [shape: f32[2,2,1,32], index: 11, kind: input, shape index: {}, may-alias: {5,9,11,15}]   ;;  %s4716_s12 = inlined_call_operand.vmem [shape: bf16[2,2,32,128], index: 12, kind: input, shape index: {}]   ;;  %s4717_s13 = inlined_call_operand.vmem [shape: f32[2,2,1,128], index: 13, kind: input, shape index: {}]   ;;  %s4718_s14 = inlined_call_operand.vmem [shape: bf16[2,2,128,32], index: 14, kind: input, shape index: {}]   ;;  %s4719_s15 = inlined_call_operand.vmem [shape: f32[2,2,1,32], index: 15, kind: input, shape index: {}, may-alias: {5,9,11,15}]   ;;  %s4720_s16 = inlined_call_operand.vmem [shape: f32[1,1,32], index: 16, kind: input, shape index: {}, may-alias: {16,22}]   ;;  %s4721_s17 = inlined_call_operand.vmem [shape: f32[1,1,32], index: 17, kind: input, shape index: {}, may-alias: {17,21,23,27}]   ;;  %s4722_s18 = inlined_call_operand.vmem [shape: bf16[1,32,96], index: 18, kind: input, shape index: {}]   ;;  %s4723_s19 = inlined_call_operand.vmem [shape: f32[1,1,96], index: 19, kind: input, shape index: {}]   ;;  %s4724_s20 = inlined_call_operand.vmem [shape: bf16[1,32,32], index: 20, kind: input, shape index: {}]   ;;  %s4725_s21 = inlined_call_operand.vmem [shape: f32[1,1,32], index: 21, kind: input, shape index: {}, may-alias: {17,21,23,27}]   ;;  %s4726_s22 = inlined_call_operand.vmem [shape: f32[1,1,32], index: 22, kind: input, shape index: {}, may-alias: {16,22}]   ;;  %s4727_s23 = inlined_call_operand.vmem [shape: f32[1,1,32], index: 23, kind: input, shape index: {}, may-alias: {17,21,23,27}]   ;;  %s4728_s24 = inlined_call_operand.vmem [shape: bf16[1,32,128], index: 24, kind: input, shape index: {}]   ;;  %s4729_s25 = inlined_call_operand.vmem [shape: f32[1,1,128], index: 25, kind: input, shape index: {}]   ;;  %s4730_s26 = inlined_call_operand.vmem [shape: bf16[1,128,32], index: 26, kind: input, shape index: {}]   ;;  %s4731_s27 = inlined_call_operand.vmem [shape: f32[1,1,32], index: 27, kind: input, shape index: {}, may-alias: {17,21,23,27}]   ;;  %s4732_s28 = inlined_call_operand.vmem [shape: f32[2,32,32], index: 28, kind: output, shape index: {}]  }
   0x1   :  { %4745 = sst [smem:[#allocation3_spill]] %s4704_s0 }
   0x2   :  { %4746 = sst [smem:[#allocation4_spill]] %s4705_s1 }
   0x3   :  { %4747 = sst [smem:[#allocation5_spill]] %s4706_s2 }
   0x4   :  { %4748 = sst [smem:[#allocation6_spill]] %s4707_s3 }
   0x5   :  { %4749 = sst [smem:[#allocation7_spill]] %s4708_s4 }
   0x6   :  { %4750 = sst [smem:[#allocation8_spill]] %s4709_s5 }
   0x7   :  { %4751 = sst [smem:[#allocation9_spill]] %s4710_s6 }
   0x8   :  { %4752 = sst [smem:[#allocation10_spill]] %s4711_s7 }
   0x9   :  { %4753 = sst [smem:[#allocation11_spill]] %s4712_s8  ;;  %s4037_s8 = smov 0  }
   0xa   :  { %4754 = sst [smem:[#allocation12_spill]] %s4713_s9 }
   0xb   :  { %4755 = sst [smem:[#allocation13_spill]] %s4714_s10 }
   0xc   :  { %4756 = sst [smem:[#allocation14_spill]] %s4715_s11 }
   0xd   :  { %4757 = sst [smem:[#allocation15_spill]] %s4716_s12 }
   0xe   :  { %4758 = sst [smem:[#allocation16_spill]] %s4717_s13 }
   0xf   :  { %4759 = sst [smem:[#allocation17_spill]] %s4726_s22 }
  0x10   :  { %4760 = sst [smem:[#allocation18_spill]] %s4727_s23 }
  0x11   :  { %4761 = sst [smem:[#allocation19_spill]] %s4729_s25 }
  0x12   :  { %4762 = sst [smem:[#allocation20_spill]] %s4730_s26 }
  0x13   :  { %4763 = sst [smem:[#allocation21_spill]] %s4731_s27 }
  0x14 LB: > { %4764 = sst [smem:[#allocation2_spill]] %s3885_s8  ;;  %s4043_s5 = sadd.s32 4294967295, %s3885_s8   ;;  %s3885_s8 = sphi %s4037_s8, %s38_s8  }
  0x15   : > { %p3346_p0 = scmp.ge.s32.totalorder %s3885_s8, 1  ;;  %p864_p1 = scmp.lt.s32.totalorder %s3885_s8, 3 }
  0x17   : > { %p865_p2 = pnand %p3346_p0, %p864_p1 }
  0x18   : > { %s4765_s3 = sld [smem:[#allocation4_spill]] (!%p865_p2)  ;;  %p985_p3 = scmp.lt.s32.totalorder (!%p865_p2), %s4043_s5, 1 }
  0x19   : > { %868 = sbr.rel (%p865_p2) target bundleno = 3748 (0xea4), region = 132  ;;  %s4766_s1 = sld [smem:[#allocation3_spill]] (!%p865_p2) }
  0x1a   : > { %s4767_s2 = sld [smem:[#allocation5_spill]] (!%p865_p2)  ;;  %p3559_p4 = scmp.ne.s32.totalorder (!%p865_p2), %s4043_s5, 0 }
  0x1b   : > { %s4768_s30 = sld [smem:[#allocation7_spill]] (!%p865_p2) }
  0x1c   : > { %s4769_s11 = sld [smem:[#allocation8_spill]] (!%p865_p2) }
  0x1d   : > { %s4771_s10 = sld [smem:[#allocation9_spill]] (!%p865_p2) }
  0x1e   : > { %v3640_v0 = vld [vmem:[%s4765_s3 + $0x18] sm:$0xff]  ;;  %v3639_v1 = vld [vmem:[%s4765_s3 + $0x10] sm:$0xff]  ;;  %v3638_v2 = vld [vmem:[%s4765_s3 + $0x8] sm:$0xff]  ;;  %vm1089_vm0 = vcmask 523264   ;;  %vm1117_vm1 = vcmask 261120   ;;  %s4098_s7 = scalar_select %p985_p3, %s4043_s5, 1 }
  0x1f   : > { %1100 = vmatpush.bf16.msra.mxu0 %v3640_v0  ;;  %v3637_v3 = vld [vmem:[%s4765_s3] sm:$0xff]  ;;  %v1048_v5 = vld [vmem:[%s4766_s1 + $0x8] sm:$0xff]  ;;  %v1049_v7 = vld [vmem:[%s4766_s1 + $0x10] sm:$0xff]  ;;  %s4770_s3 = sld [smem:[#allocation10_spill]]  ;;  %v3887_v31 = vmov 32.0   ;;  %s3891_s25 = smov (!%p3559_p4), 64  }
  0x20   : > { %v1047_v4 = vld [vmem:[%s4766_s1] sm:$0xff]  ;;  %v1050_v8 = vld [vmem:[%s4766_s1 + $0x18] sm:$0xff]  ;;  %s4103_s12 = sshll.u32 %s4098_s7, 1  ;;  %3725 = vrcp.f32 %v3887_v31  ;;  %s4128_s4 = sshll.u32 %s4098_s7, 5 }
  0x21   : > { %v1051_v6 = vpack.c.bf16 %v1048_v5, %v1047_v4  ;;  %v1052_v9 = vpack.c.bf16 %v1050_v8, %v1049_v7  ;;  %v3708_v10 = vld [vmem:[%s4767_s2] ss:$0 sm:$0xff]  ;;  %s4111_s6 = scalar_lea.vmem %s4768_s30, %s4103_s12  ;;  %s4739_s1 = smov 64  }
  0x22   : > { %s4118_s29 = scalar_lea.vmem %s4769_s11, %s4103_s12  ;;  %s4772_s11 = sld [smem:[#allocation6_spill]] }
  0x23   : > { %1101 = vmatpush.bf16.msra.mxu0 %v3639_v1  ;;  %s4134_s0 = scalar_lea.vmem %s4771_s10, %s4128_s4  ;;  %s4773_s2 = sld [smem:[#allocation12_spill]] }
  0x24   : > { %v3642_v42 = vld [vmem:[%s4134_s0 + $0x8] sm:$0xff]  ;;  %v3641_v46 = vld [vmem:[%s4134_s0] sm:$0xff]  ;;  %s4777_s13 = sld [smem:[#allocation16_spill]]  ;;  %s3635_s10 = sshll.u32 %s4098_s7, 7 }
  0x25   : > { %s4125_s8 = scalar_lea.vmem %s4770_s3, %s4103_s12  ;;  %3683 = vmatpush.bf16.msra.mxu2 %v3642_v42  ;;  %1274 = vmatpush.bf16.msra.mxu1 %v3642_v42  ;;  %s4741_s3 = smov 96  }
  0x26   : > { %v3726_v32 = vpop.eup %3725  ;;  %s4778_s26 = sld [smem:[#allocation15_spill]]  ;;  %s4325_s22 = scalar_lea.vmem %s4718_s14, %s3635_s10 }
  0x27   : > { %1102 = vmatpush.bf16.msra.mxu0 %v3638_v2  ;;  %v1131_v33 = vmul.f32 32.0, %v3726_v32  ;;  %vm1135_vm2 = vweird.f32 %v3726_v32  ;;  %s4780_s7 = smov 64  }
  0x29   : > { %v1132_v34 = vsub.f32 1.0, %v1131_v33  ;;  %3684 = vmatpush.bf16.msra.mxu2 %v3641_v46  ;;  %1275 = vmatpush.bf16.msra.mxu1 %v3641_v46  ;;  %s4215_s9 = scalar_lea.vmem %s4773_s2, %s4103_s12 }
  0x2a   : > { %s4280_s2 = scalar_lea.vmem %s4777_s13, %s4103_s12  ;;  %s4779_s13 = smov 96  }
  0x2b   : > { %1103 = vmatpush.bf16.msra.mxu0 %v3637_v3  ;;  %v1133_v35 = vmul.f32 %v3726_v32, %v1132_v34 }
  0x2c   : > { %s4286_s23 = scalar_lea.vmem %s4778_s26, %s4128_s4 }
  0x2d   : > { %v1134_v36 = vadd.f32 %v3726_v32, %v1133_v35  ;;  %v3710_v35 = vld [vmem:[%s4118_s29] ss:$0 sm:$0xff] }
  0x2e   : > { %3381 = vmatmul.msk.bf16.vlgmr.msra.gmra.mxu0 %vm1089_vm0, %v1051_v6 }
  0x2f   : > { %v4136_v37 = vsel %vm1135_vm2, %v3726_v32, %v1134_v36 }
  0x3e   : > { %3382 = vmatmul.msk.bf16.gmra.mxu0 %vm1089_vm0, %v1052_v9 }
  0xab   : > { %v1105_v11 = vpop.f32.mrf.mxu0 }
  0xac   : > { %v4074_v12 = vadd.f32 %v3708_v10, %v1105_v11 }
  0xae   : > { %v1118_v13 = vsel %vm1117_vm1, %v4074_v12, 0.0  ;;  %v1141_v27 = vmul.f32 %v4074_v12, %v4074_v12 }
  0xaf   : > { %1119 = vadd.xlane.f32.xlu2 %v1118_v13 }
  0xb0   : > { %v1145_v29 = vsel %vm1117_vm1, %v1141_v27, 0.0 }
  0xb3   : > { %v1107_v14 = vpop.f32.mrf.mxu0 }
  0xb4   : > { %v4078_v15 = vadd.f32 %v3708_v10, %v1107_v14 }
  0xb6   : > { %v1121_v16 = vsel %vm1117_vm1, %v4078_v15, 0.0  ;;  %v1142_v28 = vmul.f32 %v4078_v15, %v4078_v15 }
  0xb7   : > { %1122 = vadd.xlane.f32.xlu2 %v1121_v16 }
  0xb8   : > { %v1148_v30 = vsel %vm1117_vm1, %v1142_v28, 0.0 }
  0xbb   : > { %v1110_v17 = vpop.f32.mrf.mxu0 }
  0xbc   : > { %v4082_v18 = vadd.f32 %v3708_v10, %v1110_v17 }
  0xbe   : > { %v1124_v19 = vsel %vm1117_vm1, %v4082_v18, 0.0  ;;  %v1143_v20 = vmul.f32 %v4082_v18, %v4082_v18 }
  0xbf   : > { %1125 = vadd.xlane.f32.xlu0 %v1124_v19 }
  0xc0   : > { %v1151_v21 = vsel %vm1117_vm1, %v1143_v20, 0.0 }
  0xc1   : > { %1152 = vadd.xlane.f32.xlu1 %v1151_v21 }
  0xc3   : > { %v1112_v22 = vpop.f32.mrf.mxu0 }
  0xc4   : > { %v4089_v23 = vadd.f32 %v3708_v10, %v1112_v22 }
  0xc6   : > { %v1127_v24 = vsel %vm1117_vm1, %v4089_v23, 0.0  ;;  %v1144_v25 = vmul.f32 %v4089_v23, %v4089_v23 }
  0xc7   : > { %1128 = vadd.xlane.f32.xlu0 %v1127_v24 }
  0xc8   : > { %v1154_v26 = vsel %vm1117_vm1, %v1144_v25, 0.0  ;;  %v3709_v25 = vld [vmem:[%s4111_s6] ss:$0 sm:$0xff] }
  0xc9   : > { %1155 = vadd.xlane.f32.xlu1 %v1154_v26 }
  0xcf   : > { %1146 = vadd.xlane.f32.xlu0 %v1145_v29 }
  0xd1   : > { %1149 = vadd.xlane.f32.xlu1 %v1148_v30 }
 0x122   : > { %v1120_v40 = vpop.xlane.xlu2 %1119 }
 0x123   : > { %v4145_v54 = vmul.f32 %v4136_v37, %v1120_v40 }
 0x125   : > { %v1161_v61 = vmul.f32 %v4145_v54, %v4145_v54  ;;  %v1169_v42 = vsub.f32 %v4074_v12, %v4145_v54 }
 0x12a   : > { %v1123_v53 = vpop.xlane.xlu2 %1122 }
 0x12b   : > { %v4148_v57 = vmul.f32 %v4136_v37, %v1123_v53 }
 0x12d   : > { %v1162_v1 = vmul.f32 %v4148_v57, %v4148_v57 }
 0x132   : > { %v1126_v38 = vpop.xlane.xlu0 %1125 }
 0x133   : > { %v1139_v39 = vmul.f32 %v4136_v37, %v1126_v38 }
 0x134   : > { %v1153_v41 = vpop.xlane.xlu1 %1152 }
 0x135   : > { %v1163_v43 = vmul.f32 %v1139_v39, %v1139_v39  ;;  %v1159_v44 = vmul.f32 %v1153_v41, %v4136_v37  ;;  %v1171_v19 = vsub.f32 %v4082_v18, %v1139_v39 }
 0x137   : > { %v1167_v45 = vsub.f32 %v1159_v44, %v1163_v43 }
 0x139   : > { %v1175_v47 = vadd.f32 1e-05, %v1167_v45 }
 0x13a   : > { %v1129_v48 = vpop.xlane.xlu0 %1128 }
 0x13b   : > { %3727 = vrsqrt.f32 %v1175_v47  ;;  %v1140_v49 = vmul.f32 %v4136_v37, %v1129_v48  ;;  %vm1203_vm4 = vweird.f32 %v1175_v47 }
 0x13c   : > { %v1156_v50 = vpop.xlane.xlu1 %1155 }
 0x13d   : > { %v1164_v51 = vmul.f32 %v1140_v49, %v1140_v49  ;;  %v1160_v52 = vmul.f32 %v1156_v50, %v4136_v37  ;;  %v1172_v29 = vsub.f32 %v4089_v23, %v1140_v49 }
 0x13f   : > { %v1168_v55 = vsub.f32 %v1160_v52, %v1164_v51 }
 0x141   : > { %v3728_v56 = vpop.eup %3727  ;;  %v1176_v58 = vadd.f32 1e-05, %v1168_v55 }
 0x142   : > { %v1198_v59 = vmul.f32 %v3728_v56, %v1175_v47  ;;  %v1147_v60 = vpop.xlane.xlu0 %1146  ;;  %vm1204_vm3 = vweird.f32 %v3728_v56  ;;  %v1170_v47 = vsub.f32 %v4078_v15, %v4148_v57  ;;  %v4174_v57 = vld [vmem:[%s4772_s11 + $0x10] sm:$0xff] }
 0x143   : > { %3729 = vrsqrt.f32 %v1176_v58  ;;  %v1157_v62 = vmul.f32 %v1147_v60, %v4136_v37  ;;  %vm1205_vm5 = vmor %vm1203_vm4, %vm1204_vm3  ;;  %vm1213_vm7 = vweird.f32 %v1176_v58  ;;  %v3713_v60 = vld [vmem:[%s4125_s8] ss:$0 sm:$0xff] }
 0x144   : > { %v1199_v63 = vmul.f32 %v3728_v56, %v1198_v59  ;;  %v1150_v0 = vpop.xlane.xlu1 %1149  ;;  %v4181_v59 = vld [vmem:[%s4772_s11 + $0x8] sm:$0xff] }
 0x145   : > { %v1165_v2 = vsub.f32 %v1157_v62, %v1161_v61  ;;  %v1158_v3 = vmul.f32 %v1150_v0, %v4136_v37 }
 0x146   : > { %v1200_v4 = vmul.f32 0.5, %v1199_v63 }
 0x147   : > { %v1173_v5 = vadd.f32 1e-05, %v1165_v2  ;;  %v1166_v6 = vsub.f32 %v1158_v3, %v1162_v1 }
 0x148   : > { %v1201_v7 = vsub.f32 1.5, %v1200_v4 }
 0x149   : > { %v3730_v8 = vpop.eup %3729  ;;  %3731 = vrsqrt.f32 %v1173_v5  ;;  %v1174_v9 = vadd.f32 1e-05, %v1166_v6  ;;  %vm1183_vm10 = vweird.f32 %v1173_v5 }
 0x14a   : > { %v1202_v10 = vmul.f32 %v3728_v56, %v1201_v7  ;;  %v1208_v11 = vmul.f32 %v3730_v8, %v1176_v58  ;;  %vm1214_vm6 = vweird.f32 %v3730_v8  ;;  %v4169_v58 = vld [vmem:[%s4772_s11 + $0x18] sm:$0xff] }
 0x14b   : > { %3733 = vrsqrt.f32 %v1174_v9  ;;  %vm1215_vm8 = vmor %vm1213_vm7, %vm1214_vm6  ;;  %vm1193_vm13 = vweird.f32 %v1174_v9  ;;  %1331 = vmatpush.msrb.mxu2 %v4169_v58  ;;  %1376 = vmatpush.msra.mxu3 %v4169_v58 }
 0x14c   : > { %v1209_v13 = vmul.f32 %v3730_v8, %v1208_v11  ;;  %v1206_v14 = vsel %vm1205_vm5, %v3728_v56, %v1202_v10 }
 0x14d   : > { %v1219_v24 = vmul.f32 %v1206_v14, %v1171_v19  ;;  %1332 = vmatpush.msrb.mxu2 %v4174_v57  ;;  %1377 = vmatpush.msra.mxu3 %v4174_v57 }
 0x14e   : > { %v1210_v16 = vmul.f32 0.5, %v1209_v13 }
 0x14f   : > { %v3732_v17 = vpop.eup %3731  ;;  %v1226_v34 = vmul.f32 %v3709_v25, %v1219_v24  ;;  %1333 = vmatpush.msrb.mxu2 %v4181_v59  ;;  %1378 = vmatpush.msra.mxu3 %v4181_v59 }
 0x150   : > { %v1211_v20 = vsub.f32 1.5, %v1210_v16  ;;  %v1178_v21 = vmul.f32 %v3732_v17, %v1173_v5  ;;  %vm1184_vm9 = vweird.f32 %v3732_v17  ;;  %v4199_v5 = vld [vmem:[%s4772_s11] sm:$0xff]  ;;  %s4774_s11 = sld [smem:[#allocation11_spill]] }
 0x151   : > { %v3734_v22 = vpop.eup %3733  ;;  %vm1185_vm12 = vmor %vm1183_vm10, %vm1184_vm9  ;;  %v1233_v43 = vadd.f32 %v3710_v35, %v1226_v34  ;;  %1334 = vmatpush.msrb.mxu2 %v4199_v5  ;;  %1379 = vmatpush.msra.mxu3 %v4199_v5 }
 0x152   : > { %v1212_v26 = vmul.f32 %v3730_v8, %v1211_v20  ;;  %v1179_v27 = vmul.f32 %v3732_v17, %v1178_v21  ;;  %v1188_v28 = vmul.f32 %v3734_v22, %v1174_v9  ;;  %vm1194_vm11 = vweird.f32 %v3734_v22 }
 0x153   : > { %vm1195_vm14 = vmor %vm1193_vm13, %vm1194_vm11 }
 0x154   : > { %v1216_v30 = vsel %vm1215_vm8, %v3730_v8, %v1212_v26  ;;  %v1180_v31 = vmul.f32 0.5, %v1179_v27  ;;  %v1189_v32 = vmul.f32 %v3734_v22, %v1188_v28 }
 0x155   : > { %v1220_v33 = vmul.f32 %v1216_v30, %v1172_v29 }
 0x156   : > { %v1181_v36 = vsub.f32 1.5, %v1180_v31  ;;  %v1190_v38 = vmul.f32 0.5, %v1189_v32  ;;  %s4221_s27 = scalar_lea.vmem %s4774_s11, %s4128_s4  ;;  %s4776_s11 = sld [smem:[#allocation14_spill]] }
 0x157   : > { %v1227_v39 = vmul.f32 %v3709_v25, %v1220_v33  ;;  %v3644_v21 = vld [vmem:[%s4221_s27 + $0x8] sm:$0xff]  ;;  %v3643_v26 = vld [vmem:[%s4221_s27] sm:$0xff] }
 0x158   : > { %v1182_v40 = vmul.f32 %v3732_v17, %v1181_v36  ;;  %v1191_v41 = vsub.f32 1.5, %v1190_v38  ;;  %1486 = vmatpush.bf16.msrb.mxu1 %v3644_v21 }
 0x159   : > { %v1234_v44 = vadd.f32 %v3710_v35, %v1227_v39 }
 0x15a   : > { %v1186_v45 = vsel %vm1185_vm12, %v3732_v17, %v1182_v40  ;;  %v1192_v46 = vmul.f32 %v3734_v22, %v1191_v41 }
 0x15b   : > { %v1246_v48 = vpack.c.bf16 %v1234_v44, %v1233_v43  ;;  %v1217_v49 = vmul.f32 %v1186_v45, %v1169_v42 }
 0x15c   : > { %v1196_v50 = vsel %vm1195_vm14, %v3734_v22, %v1192_v46  ;;  %1487 = vmatpush.bf16.msrb.mxu1 %v3643_v26 }
 0x15d   : > { %3392 = vmatmul.msk.bf16.vlgmr.msra.gmra.mxu2 %vm1117_vm1, %v1246_v48  ;;  %v1218_v51 = vmul.f32 %v1196_v50, %v1170_v47  ;;  %v1224_v52 = vmul.f32 %v3709_v25, %v1217_v49 }
 0x15f   : > { %v1225_v53 = vmul.f32 %v3709_v25, %v1218_v51  ;;  %v1231_v54 = vadd.f32 %v3710_v35, %v1224_v52 }
 0x161   : > { %v1232_v55 = vadd.f32 %v3710_v35, %v1225_v53 }
 0x163   : > { %v1245_v56 = vpack.c.bf16 %v1232_v55, %v1231_v54 }
 0x165   : > { %3391 = vmatmul.msk.bf16.vlgmr.msra.gmra.mxu1 %vm1117_vm1, %v1245_v56 }
 0x166   : > { %2005 = vmatpush.msra.mxu1 %v4169_v58 }
 0x168   : > { %2006 = vmatpush.msra.mxu1 %v4174_v57 }
 0x16a   : > { %2007 = vmatpush.msra.mxu1 %v4181_v59 }
 0x16c   : > { %2008 = vmatpush.msra.mxu1 %v4199_v5 }
 0x1e0   : > { %v1282_v61 = vpop.f32.mrf.mxu2 }
 0x1e1   : > { %v1283_v62 = vadd.f32 %v3713_v60, %v1282_v61 }
 0x1e2   : > { %v1277_v63 = vpop.f32.mrf.mxu1 }
 0x1e3   : > { %v1278_v0 = vadd.f32 %v3713_v60, %v1277_v63  ;;  %1295 = vrot.lane.b32.xlu0 %v1283_v62, %s4741_s3 }
 0x1e5   : > { %1291 = vrot.lane.b32.xlu2 %v1278_v0, %s4741_s3 }
 0x1e8   : > { %v1284_v1 = vpop.f32.mrf.mxu2 }
 0x1e9   : > { %v1285_v3 = vadd.f32 %v3713_v60, %v1284_v1 }
 0x1ea   : > { %v1279_v2 = vpop.f32.mrf.mxu1 }
 0x1eb   : > { %v1280_v4 = vadd.f32 %v3713_v60, %v1279_v2  ;;  %1421 = vrot.lane.b32.xlu0 %v1278_v0, %s4739_s1 }
 0x1ed   : > { %1293 = vrot.lane.b32.xlu1 %v1280_v4, %s4741_s3  ;;  %1297 = vrot.lane.b32.xlu2 %v1285_v3, %s4741_s3  ;;  %s4265_s3 = scalar_lea.vmem %s4776_s11, %s4103_s12 }
 0x1f3   : > { %1427 = vrot.lane.b32.xlu0 %v1285_v3, %s4739_s1 }
 0x1f5   : > { %1425 = vrot.lane.b32.xlu1 %v1283_v62, %s4739_s1  ;;  %1423 = vrot.lane.b32.xlu2 %v1280_v4, %s4739_s1  ;;  %s4775_s1 = sld [smem:[#allocation13_spill]] }
 0x1fb   : > { %s4235_s30 = scalar_lea.vmem %s4775_s1, %s4103_s12  ;;  %s4319_s1 = scalar_lea.vmem %s4719_s15, %s4103_s12 }
 0x23f   : > { %v1292_v6 = vpop.permute.xlu2 %1291 }
 0x240   : > { %v1303_v7 = vmul.f32 %v1292_v6, %v1278_v0  ;;  %v1350_v16 = vmul.f32 %v1292_v6, %v1283_v62 }
 0x242   : > { %3393 = vmatmul.msk.f32.vlgmr.msrb.gmra.mxu2 %vm1117_vm1, %v1303_v7 }
 0x247   : > { %v1298_v10 = vpop.permute.xlu2 %1297 }
 0x248   : > { %v1349_v11 = vmul.f32 %v1298_v10, %v1280_v4  ;;  %v1306_v20 = vmul.f32 %v1298_v10, %v1285_v3 }
 0x24f   : > { %v1424_v60 = vpop.permute.xlu2 %1423 }
 0x255   : > { %v1296_v8 = vpop.permute.xlu0 %1295 }
 0x256   : > { %v1348_v9 = vmul.f32 %v1296_v8, %v1278_v0  ;;  %v1305_v17 = vmul.f32 %v1296_v8, %v1283_v62 }
 0x258   : > { %3397 = vmatmul.msk.f32.vlgmr.msra.gmra.mxu3 %vm1117_vm1, %v1348_v9 }
 0x25d   : > { %v1422_v42 = vpop.permute.xlu0 %1421 }
 0x25f   : > { %v1294_v13 = vpop.permute.xlu1 %1293 }
 0x260   : > { %v1304_v14 = vmul.f32 %v1294_v13, %v1280_v4  ;;  %3398 = vmatmul.msk.f32.gmra.mxu3 %vm1117_vm1, %v1349_v11  ;;  %v1351_v19 = vmul.f32 %v1294_v13, %v1285_v3 }
 0x262   : > { %3394 = vmatmul.msk.f32.gmra.mxu2 %vm1117_vm1, %v1304_v14 }
 0x265   : > { %v1428_v61 = vpop.permute.xlu0 %1427 }
 0x267   : > { %v1426_v55 = vpop.permute.xlu1 %1425 }
 0x268   : > { %3399 = vmatmul.msk.f32.gmra.mxu3 %vm1117_vm1, %v1350_v16 }
 0x26a   : > { %3395 = vmatmul.msk.f32.gmra.mxu2 %vm1117_vm1, %v1305_v17 }
 0x270   : > { %3400 = vmatmul.msk.f32.gmra.mxu3 %vm1117_vm1, %v1351_v19 }
 0x272   : > { %3396 = vmatmul.msk.f32.gmra.mxu2 %vm1117_vm1, %v1306_v20 }
 0x2c5   : > { %v1336_v22 = vpop.f32.mrf.mxu2 }
 0x2db   : > { %v1381_v24 = vpop.f32.mrf.mxu3 }
 0x2dc   : > { %v1393_v25 = vmax.f32 %v1336_v22, %v1381_v24 }
 0x2de   : > { %v1397_v27 = vsub.f32 %v1336_v22, %v1393_v25  ;;  %v1409_v28 = vsub.f32 %v1381_v24, %v1393_v25 }
 0x2e0   : > { %v1401_v29 = vmul.f32 1.442695, %v1397_v27  ;;  %v1413_v30 = vmul.f32 1.442695, %v1409_v28 }
 0x2e2   : > { %3735 = vpow2.f32 %v1401_v29 }
 0x2e3   : > { %v1384_v31 = vpop.f32.mrf.mxu3  ;;  %3737 = vpow2.f32 %v1413_v30 }
 0x2e5   : > { %v1339_v32 = vpop.f32.mrf.mxu2 }
 0x2e6   : > { %v1394_v33 = vmax.f32 %v1339_v32, %v1384_v31 }
 0x2e8   : > { %v1398_v34 = vsub.f32 %v1339_v32, %v1394_v33  ;;  %v1410_v35 = vsub.f32 %v1384_v31, %v1394_v33  ;;  %v3736_v40 = vpop.eup %3735 }
 0x2e9   : > { %v3738_v41 = vpop.eup %3737  ;;  %v1433_v62 = vmul.f32 %v3736_v40, %v1422_v42 }
 0x2ea   : > { %v1403_v36 = vmul.f32 1.442695, %v1398_v34  ;;  %v1415_v38 = vmul.f32 1.442695, %v1410_v35  ;;  %v1437_v45 = vadd.f32 %v3738_v41, %v3736_v40  ;;  %v1441_v63 = vmul.f32 %v3738_v41, %v1426_v55  ;;  %v3714_v35 = vld [vmem:[%s4215_s9] ss:$0 sm:$0xff] }
 0x2eb   : > { %v1387_v39 = vpop.f32.mrf.mxu3 }
 0x2ec   : > { %3739 = vpow2.f32 %v1403_v36  ;;  %v1445_v10 = vadd.f32 %v1441_v63, %v1433_v62  ;;  %v3646_v63 = vld [vmem:[%s4286_s23 + $0x8] sm:$0xff] }
 0x2ed   : > { %v1342_v43 = vpop.f32.mrf.mxu2  ;;  %3741 = vpow2.f32 %v1415_v38  ;;  %1666 = vmatpush.bf16.msra.mxu2 %v3646_v63 }
 0x2ee   : > { %v1395_v44 = vmax.f32 %v1342_v43, %v1387_v39  ;;  %3743 = vrcp.f32 %v1437_v45 }
 0x2f0   : > { %v1399_v46 = vsub.f32 %v1342_v43, %v1395_v44  ;;  %v1411_v47 = vsub.f32 %v1387_v39, %v1395_v44 }
 0x2f2   : > { %v1405_v48 = vmul.f32 1.442695, %v1399_v46  ;;  %v1417_v49 = vmul.f32 1.442695, %v1411_v47  ;;  %v3740_v50 = vpop.eup %3739 }
 0x2f3   : > { %v3742_v51 = vpop.eup %3741  ;;  %v1390_v53 = vpop.f32.mrf.mxu3  ;;  %v1434_v0 = vmul.f32 %v3740_v50, %v1424_v60 }
 0x2f4   : > { %v1438_v52 = vadd.f32 %v3742_v51, %v3740_v50  ;;  %3745 = vpow2.f32 %v1405_v48  ;;  %v1442_v1 = vmul.f32 %v3742_v51, %v1428_v61  ;;  %v3744_v4 = vpop.eup %3743 }
 0x2f5   : > { %v1345_v54 = vpop.f32.mrf.mxu2  ;;  %3747 = vpow2.f32 %v1417_v49  ;;  %v1453_v14 = vmul.f32 %v3744_v4, %v1445_v10 }
 0x2f6   : > { %v1396_v56 = vmax.f32 %v1345_v54, %v1390_v53  ;;  %3749 = vrcp.f32 %v1438_v52  ;;  %v1446_v11 = vadd.f32 %v1442_v1, %v1434_v0 }
 0x2f8   : > { %v1400_v2 = vsub.f32 %v1345_v54, %v1396_v56  ;;  %v1412_v3 = vsub.f32 %v1390_v53, %v1396_v56 }
 0x2fa   : > { %v1407_v6 = vmul.f32 1.442695, %v1400_v2  ;;  %v1419_v7 = vmul.f32 1.442695, %v1412_v3  ;;  %v3746_v8 = vpop.eup %3745  ;;  %v3645_v3 = vld [vmem:[%s4286_s23] sm:$0xff] }
 0x2fb   : > { %v3748_v9 = vpop.eup %3747  ;;  %v1435_v24 = vmul.f32 %v3746_v8, %v1426_v55  ;;  %1667 = vmatpush.bf16.msra.mxu2 %v3645_v3 }
 0x2fc   : > { %3751 = vpow2.f32 %v1407_v6  ;;  %v3750_v13 = vpop.eup %3749  ;;  %v1439_v17 = vadd.f32 %v3748_v9, %v3746_v8  ;;  %v1443_v26 = vmul.f32 %v3748_v9, %v1422_v42 }
 0x2fd   : > { %3753 = vpow2.f32 %v1419_v7  ;;  %v1454_v16 = vmul.f32 %v3750_v13, %v1446_v11 }
 0x2fe   : > { %3755 = vrcp.f32 %v1439_v17  ;;  %v1447_v29 = vadd.f32 %v1443_v26, %v1435_v24 }
 0x2ff   : > { %v1457_v19 = vpack.c.bf16 %v1454_v16, %v1453_v14  ;;  %2050 = vmatpush.msrb.mxu2 %v4169_v58 }
 0x301   : > { %3409 = vmatmul.msk.bf16.vlgmr.msrb.gmra.mxu1 %vm1117_vm1, %v1457_v19  ;;  %2051 = vmatpush.msrb.mxu2 %v4174_v57 }
 0x302   : > { %v3752_v20 = vpop.eup %3751 }
 0x303   : > { %v3754_v21 = vpop.eup %3753  ;;  %v1436_v25 = vmul.f32 %v3752_v20, %v1428_v61  ;;  %2052 = vmatpush.msrb.mxu2 %v4181_v59 }
 0x304   : > { %v1440_v22 = vadd.f32 %v3754_v21, %v3752_v20  ;;  %v1444_v27 = vmul.f32 %v3754_v21, %v1424_v60  ;;  %v3756_v28 = vpop.eup %3755 }
 0x305   : > { %v1455_v32 = vmul.f32 %v3756_v28, %v1447_v29  ;;  %2053 = vmatpush.msrb.mxu2 %v4199_v5 }
 0x306   : > { %3757 = vrcp.f32 %v1440_v22  ;;  %v1448_v30 = vadd.f32 %v1444_v27, %v1436_v25 }
 0x30c   : > { %v3758_v31 = vpop.eup %3757 }
 0x30d   : > { %v1456_v33 = vmul.f32 %v3758_v31, %v1448_v30 }
 0x30f   : > { %v1458_v34 = vpack.c.bf16 %v1456_v33, %v1455_v32 }
 0x311   : > { %3410 = vmatmul.msk.bf16.gmra.mxu1 %vm1117_vm1, %v1458_v34 }
 0x37e   : > { %v1489_v36 = vpop.f32.mrf.mxu1 }
 0x37f   : > { %v1490_v38 = vadd.f32 %v3714_v35, %v1489_v36 }
 0x381   : > { %v4239_v39 = vadd.f32 %v1490_v38, %v4074_v12 }
 0x383   : > { %v1505_v40 = vsel %vm1117_vm1, %v4239_v39, 0.0  ;;  %v1521_v41 = vmul.f32 %v4239_v39, %v4239_v39 }
 0x384   : > { %1506 = vadd.xlane.f32.xlu2 %v1505_v40 }
 0x385   : > { %v1525_v42 = vsel %vm1117_vm1, %v1521_v41, 0.0 }
 0x386   : > { %v1491_v43 = vpop.f32.mrf.mxu1  ;;  %1526 = vadd.xlane.f32.xlu0 %v1525_v42 }
 0x387   : > { %v1492_v44 = vadd.f32 %v3714_v35, %v1491_v43 }
 0x389   : > { %v4247_v45 = vadd.f32 %v1492_v44, %v4078_v15 }
 0x38b   : > { %v1508_v12 = vsel %vm1117_vm1, %v4247_v45, 0.0  ;;  %v1522_v46 = vmul.f32 %v4247_v45, %v4247_v45 }
 0x38c   : > { %1509 = vadd.xlane.f32.xlu1 %v1508_v12 }
 0x38d   : > { %v1528_v47 = vsel %vm1117_vm1, %v1522_v46, 0.0  ;;  %v3715_v46 = vld [vmem:[%s4235_s30] ss:$0 sm:$0xff] }
 0x38e   : > { %1529 = vadd.xlane.f32.xlu2 %v1528_v47  ;;  %v1494_v48 = vpop.f32.mrf.mxu1 }
 0x38f   : > { %v1495_v49 = vadd.f32 %v3714_v35, %v1494_v48 }
 0x391   : > { %v4255_v50 = vadd.f32 %v1495_v49, %v4082_v18 }
 0x393   : > { %v1511_v15 = vsel %vm1117_vm1, %v4255_v50, 0.0  ;;  %v1523_v51 = vmul.f32 %v4255_v50, %v4255_v50 }
 0x394   : > { %1512 = vadd.xlane.f32.xlu1 %v1511_v15 }
 0x395   : > { %v1531_v52 = vsel %vm1117_vm1, %v1523_v51, 0.0 }
 0x396   : > { %v1496_v53 = vpop.f32.mrf.mxu1  ;;  %1532 = vadd.xlane.f32.xlu2 %v1531_v52 }
 0x397   : > { %v1497_v54 = vadd.f32 %v3714_v35, %v1496_v53 }
 0x399   : > { %v4269_v18 = vadd.f32 %v1497_v54, %v4089_v23 }
 0x39b   : > { %v1514_v55 = vsel %vm1117_vm1, %v4269_v18, 0.0  ;;  %v1524_v56 = vmul.f32 %v4269_v18, %v4269_v18 }
 0x39c   : > { %1515 = vadd.xlane.f32.xlu0 %v1514_v55 }
 0x39d   : > { %v1534_v60 = vsel %vm1117_vm1, %v1524_v56, 0.0  ;;  %v3716_v56 = vld [vmem:[%s4265_s3] ss:$0 sm:$0xff] }
 0x39e   : > { %1535 = vadd.xlane.f32.xlu1 %v1534_v60 }
 0x3f7   : > { %v1507_v23 = vpop.xlane.xlu2 %1506 }
 0x3f8   : > { %v1517_v61 = vmul.f32 %v1507_v23, %v4136_v37 }
 0x3f9   : > { %v1527_v62 = vpop.xlane.xlu0 %1526 }
 0x3fa   : > { %v1541_v0 = vmul.f32 %v1517_v61, %v1517_v61  ;;  %v1537_v1 = vmul.f32 %v1527_v62, %v4136_v37  ;;  %v1549_v42 = vsub.f32 %v4239_v39, %v1517_v61 }
 0x3fc   : > { %v1545_v2 = vsub.f32 %v1537_v1, %v1541_v0 }
 0x3fe   : > { %v1553_v4 = vadd.f32 1e-05, %v1545_v2 }
 0x3ff   : > { %v1510_v6 = vpop.xlane.xlu1 %1509 }
 0x400   : > { %3759 = vrsqrt.f32 %v1553_v4  ;;  %v1518_v7 = vmul.f32 %v1510_v6, %v4136_v37  ;;  %vm1563_vm0 = vweird.f32 %v1553_v4 }
 0x401   : > { %v1530_v8 = vpop.xlane.xlu2 %1529 }
 0x402   : > { %v1542_v9 = vmul.f32 %v1518_v7, %v1518_v7  ;;  %v1538_v10 = vmul.f32 %v1530_v8, %v4136_v37  ;;  %v1550_v51 = vsub.f32 %v4247_v45, %v1518_v7 }
 0x404   : > { %v1546_v11 = vsub.f32 %v1538_v10, %v1542_v9 }
 0x406   : > { %v3760_v13 = vpop.eup %3759  ;;  %v1554_v14 = vadd.f32 1e-05, %v1546_v11 }
 0x407   : > { %v1558_v16 = vmul.f32 %v3760_v13, %v1553_v4  ;;  %v1513_v17 = vpop.xlane.xlu1 %1512  ;;  %vm1564_vm15 = vweird.f32 %v3760_v13 }
 0x408   : > { %3761 = vrsqrt.f32 %v1554_v14  ;;  %v4299_v19 = vmul.f32 %v1513_v17, %v4136_v37  ;;  %vm1565_vm2 = vmor %vm1563_vm0, %vm1564_vm15  ;;  %vm1573_vm4 = vweird.f32 %v1554_v14 }
 0x409   : > { %v1559_v20 = vmul.f32 %v3760_v13, %v1558_v16  ;;  %v1533_v21 = vpop.xlane.xlu2 %1532 }
 0x40a   : > { %v1543_v22 = vmul.f32 %v4299_v19, %v4299_v19  ;;  %v1539_v24 = vmul.f32 %v1533_v21, %v4136_v37  ;;  %v1551_v8 = vsub.f32 %v4255_v50, %v4299_v19  ;;  %v3654_v19 = vld [vmem:[%s4325_s22 + $0x38] sm:$0xff] }
 0x40b   : > { %v1560_v25 = vmul.f32 0.5, %v1559_v20  ;;  %1768 = vmatpush.bf16.msrb.mxu3 %v3654_v19  ;;  %v3718_v19 = vld [vmem:[%s4319_s1] ss:$0 sm:$0xff] }
 0x40c   : > { %v1547_v26 = vsub.f32 %v1539_v24, %v1543_v22 }
 0x40d   : > { %v1561_v27 = vsub.f32 1.5, %v1560_v25  ;;  %v3653_v25 = vld [vmem:[%s4325_s22 + $0x30] sm:$0xff] }
 0x40e   : > { %v3762_v28 = vpop.eup %3761  ;;  %v1555_v29 = vadd.f32 1e-05, %v1547_v26  ;;  %v3652_v26 = vld [vmem:[%s4325_s22 + $0x28] sm:$0xff] }
 0x40f   : > { %v1562_v30 = vmul.f32 %v3760_v13, %v1561_v27  ;;  %v1568_v31 = vmul.f32 %v3762_v28, %v1554_v14  ;;  %v1516_v32 = vpop.xlane.xlu0 %1515  ;;  %vm1574_vm3 = vweird.f32 %v3762_v28  ;;  %1769 = vmatpush.bf16.msrb.mxu3 %v3653_v25  ;;  %v3651_v27 = vld [vmem:[%s4325_s22 + $0x20] sm:$0xff] }
 0x410   : > { %3763 = vrsqrt.f32 %v1555_v29  ;;  %v1520_v33 = vmul.f32 %v1516_v32, %v4136_v37  ;;  %vm1575_vm5 = vmor %vm1573_vm4, %vm1574_vm3  ;;  %vm1583_vm7 = vweird.f32 %v1555_v29  ;;  %v3717_v32 = vld [vmem:[%s4280_s2] ss:$0 sm:$0xff] }
 0x411   : > { %v1569_v34 = vmul.f32 %v3762_v28, %v1568_v31  ;;  %v1536_v35 = vpop.xlane.xlu1 %1535  ;;  %v1566_v40 = vsel %vm1565_vm2, %v3760_v13, %v1562_v30  ;;  %v3648_v30 = vld [vmem:[%s4325_s22 + $0x8] sm:$0xff]  ;;  %v3647_v31 = vld [vmem:[%s4325_s22] sm:$0xff] }
 0x412   : > { %v1544_v36 = vmul.f32 %v1520_v33, %v1520_v33  ;;  %v1540_v38 = vmul.f32 %v1536_v35, %v4136_v37  ;;  %v1597_v47 = vmul.f32 %v1566_v40, %v1549_v42  ;;  %v1552_v13 = vsub.f32 %v4269_v18, %v1520_v33 }
 0x413   : > { %v1570_v41 = vmul.f32 0.5, %v1569_v34  ;;  %1770 = vmatpush.bf16.msrb.mxu3 %v3652_v26 }
 0x414   : > { %v1548_v43 = vsub.f32 %v1540_v38, %v1544_v36  ;;  %v1604_v54 = vmul.f32 %v3715_v46, %v1597_v47 }
 0x415   : > { %v1571_v44 = vsub.f32 1.5, %v1570_v41 }
 0x416   : > { %v3764_v12 = vpop.eup %3763  ;;  %v1556_v48 = vadd.f32 1e-05, %v1548_v43  ;;  %v1611_v63 = vadd.f32 %v3716_v56, %v1604_v54 }
 0x417   : > { %v1572_v49 = vmul.f32 %v3762_v28, %v1571_v44  ;;  %v1578_v15 = vmul.f32 %v3764_v12, %v1555_v29  ;;  %vm1584_vm6 = vweird.f32 %v3764_v12  ;;  %1771 = vmatpush.bf16.msrb.mxu3 %v3651_v27  ;;  %v3649_v29 = vld [vmem:[%s4325_s22 + $0x10] sm:$0xff] }
 0x418   : > { %3765 = vrsqrt.f32 %v1556_v48  ;;  %vm1585_vm8 = vmor %vm1583_vm7, %vm1584_vm6  ;;  %vm1593_vm10 = vweird.f32 %v1556_v48 }
 0x419   : > { %v1576_v52 = vsel %vm1575_vm5, %v3762_v28, %v1572_v49  ;;  %v1579_v53 = vmul.f32 %v3764_v12, %v1578_v15  ;;  %v3650_v28 = vld [vmem:[%s4325_s22 + $0x18] sm:$0xff] }
 0x41a   : > { %v1598_v55 = vmul.f32 %v1576_v52, %v1550_v51 }
 0x41b   : > { %v1580_v60 = vmul.f32 0.5, %v1579_v53  ;;  %1772 = vmatpush.bf16.msrb.mxu3 %v3650_v28 }
 0x41c   : > { %v1605_v23 = vmul.f32 %v3715_v46, %v1598_v55 }
 0x41d   : > { %v1581_v61 = vsub.f32 1.5, %v1580_v60 }
 0x41e   : > { %v3766_v62 = vpop.eup %3765  ;;  %v1612_v0 = vadd.f32 %v3716_v56, %v1605_v23 }
 0x41f   : > { %v1582_v1 = vmul.f32 %v3764_v12, %v1581_v61  ;;  %v1588_v2 = vmul.f32 %v3766_v62, %v1556_v48  ;;  %vm1594_vm9 = vweird.f32 %v3766_v62  ;;  %1773 = vmatpush.bf16.msrb.mxu3 %v3649_v29 }
 0x420   : > { %v1637_v3 = vpack.c.bf16 %v1612_v0, %v1611_v63  ;;  %vm1595_vm11 = vmor %vm1593_vm10, %vm1594_vm9 }
 0x421   : > { %v1589_v4 = vmul.f32 %v3766_v62, %v1588_v2  ;;  %v1586_v6 = vsel %vm1585_vm8, %v3764_v12, %v1582_v1 }
 0x422   : > { %3419 = vmatmul.msk.bf16.vlgmr.msra.gmra.mxu2 %vm1117_vm1, %v1637_v3  ;;  %v1599_v10 = vmul.f32 %v1586_v6, %v1551_v8 }
 0x423   : > { %v1590_v7 = vmul.f32 0.5, %v1589_v4  ;;  %1774 = vmatpush.bf16.msrb.mxu3 %v3648_v30 }
 0x424   : > { %v1606_v17 = vmul.f32 %v3715_v46, %v1599_v10 }
 0x425   : > { %v1591_v9 = vsub.f32 1.5, %v1590_v7 }
 0x426   : > { %v1613_v21 = vadd.f32 %v3716_v56, %v1606_v17 }
 0x427   : > { %v1592_v11 = vmul.f32 %v3766_v62, %v1591_v9  ;;  %1775 = vmatpush.bf16.msrb.mxu3 %v3647_v31 }
 0x429   : > { %v1596_v14 = vsel %vm1595_vm11, %v3766_v62, %v1592_v11 }
 0x42a   : > { %v1600_v16 = vmul.f32 %v1596_v14, %v1552_v13 }
 0x42c   : > { %v1607_v20 = vmul.f32 %v3715_v46, %v1600_v16 }
 0x42e   : > { %v1614_v22 = vadd.f32 %v3716_v56, %v1607_v20 }
 0x430   : > { %v1638_v24 = vpack.c.bf16 %v1614_v22, %v1613_v21 }
 0x432   : > { %3420 = vmatmul.msk.bf16.gmra.mxu2 %vm1117_vm1, %v1638_v24 }
 0x4a5   : > { %v1669_v33 = vpop.f32.mrf.mxu2 }
 0x4a6   : > { %v1670_v34 = vadd.f32 %v3717_v32, %v1669_v33 }
 0x4a8   : > { %v1683_v35 = vmul.f32 0.044715, %v1670_v34  ;;  %v1679_v63 = vmul.f32 0.5, %v1670_v34 }
 0x4aa   : > { %v1687_v36 = vmul.f32 %v1683_v35, %v1670_v34 }
 0x4ac   : > { %v1691_v38 = vmul.f32 %v1687_v36, %v1670_v34 }
 0x4ad   : > { %v1671_v40 = vpop.f32.mrf.mxu2 }
 0x4ae   : > { %v1672_v41 = vadd.f32 %v3717_v32, %v1671_v40  ;;  %v1695_v42 = vadd.f32 %v1691_v38, %v1670_v34 }
 0x4b0   : > { %v1684_v43 = vmul.f32 0.044715, %v1672_v41  ;;  %v1699_v12 = vmul.f32 0.7978846, %v1695_v42  ;;  %v1680_v0 = vmul.f32 0.5, %v1672_v41 }
 0x4b2   : > { %v1688_v44 = vmul.f32 %v1684_v43, %v1672_v41  ;;  %3767 = vtanh.f32 %v1699_v12 }
 0x4b4   : > { %v1692_v46 = vmul.f32 %v1688_v44, %v1672_v41 }
 0x4b5   : > { %v1674_v47 = vpop.f32.mrf.mxu2 }
 0x4b6   : > { %v1675_v48 = vadd.f32 %v3717_v32, %v1674_v47  ;;  %v1696_v49 = vadd.f32 %v1692_v46, %v1672_v41 }
 0x4b8   : > { %v1685_v15 = vmul.f32 0.044715, %v1675_v48  ;;  %v1700_v51 = vmul.f32 0.7978846, %v1696_v49  ;;  %v3768_v53 = vpop.eup %3767  ;;  %v1681_v16 = vmul.f32 0.5, %v1675_v48 }
 0x4b9   : > { %v1707_v23 = vadd.f32 1.0, %v3768_v53 }
 0x4ba   : > { %3769 = vtanh.f32 %v1700_v51  ;;  %v1689_v52 = vmul.f32 %v1685_v15, %v1675_v48  ;;  %v3656_v51 = vld [vmem:[%s4134_s0 + $0x18] sm:$0xff] }
 0x4bb   : > { %v1711_v4 = vmul.f32 %v1707_v23, %v1679_v63  ;;  %1948 = vmatpush.bf16.msrb.mxu0 %v3656_v51 }
 0x4bc   : > { %v1693_v54 = vmul.f32 %v1689_v52, %v1675_v48 }
 0x4bd   : > { %v1676_v55 = vpop.f32.mrf.mxu2 }
 0x4be   : > { %v1677_v56 = vadd.f32 %v3717_v32, %v1676_v55  ;;  %v1697_v60 = vadd.f32 %v1693_v54, %v1675_v48  ;;  %v3655_v54 = vld [vmem:[%s4134_s0 + $0x10] sm:$0xff] }
 0x4bf   : > { %1949 = vmatpush.bf16.msrb.mxu0 %v3655_v54 }
 0x4c0   : > { %v3770_v61 = vpop.eup %3769  ;;  %v1686_v62 = vmul.f32 0.044715, %v1677_v56  ;;  %v1701_v3 = vmul.f32 0.7978846, %v1697_v60  ;;  %v1682_v17 = vmul.f32 0.5, %v1677_v56 }
 0x4c1   : > { %v1708_v1 = vadd.f32 1.0, %v3770_v61 }
 0x4c2   : > { %v1690_v2 = vmul.f32 %v1686_v62, %v1677_v56  ;;  %3771 = vtanh.f32 %v1701_v3 }
 0x4c3   : > { %v1712_v6 = vmul.f32 %v1708_v1, %v1680_v0 }
 0x4c4   : > { %v1694_v7 = vmul.f32 %v1690_v2, %v1677_v56 }
 0x4c5   : > { %v1715_v8 = vpack.c.bf16 %v1712_v6, %v1711_v4 }
 0x4c6   : > { %v1698_v9 = vadd.f32 %v1694_v7, %v1677_v56 }
 0x4c7   : > { %1776 = vmatmul.bf16.vlgmr.msrb.gmra.mxu3 %v1715_v8 }
 0x4c8   : > { %v1702_v10 = vmul.f32 0.7978846, %v1698_v9  ;;  %v3772_v11 = vpop.eup %3771 }
 0x4c9   : > { %v1709_v13 = vadd.f32 1.0, %v3772_v11 }
 0x4ca   : > { %3773 = vtanh.f32 %v1702_v10 }
 0x4cb   : > { %v1713_v21 = vmul.f32 %v1709_v13, %v1681_v16 }
 0x4d0   : > { %v3774_v14 = vpop.eup %3773 }
 0x4d1   : > { %v1710_v20 = vadd.f32 1.0, %v3774_v14 }
 0x4d3   : > { %v1714_v22 = vmul.f32 %v1710_v20, %v1682_v17 }
 0x4d5   : > { %v1716_v24 = vpack.c.bf16 %v1714_v22, %v1713_v21 }
 0x4d7   : > { %1781 = vmatmul.bf16.gmra.mxu3 %v1716_v24 }
 0x54a   : > { %v1777_v25 = vpop.f32.mrf.mxu3 }
 0x54b   : > { %v1778_v26 = vadd.f32 %v3718_v19, %v1777_v25 }
 0x54d   : > { %v4338_v27 = vadd.f32 %v1778_v26, %v4239_v39 }
 0x54f   : > { %v1795_v28 = vsel %vm1117_vm1, %v4338_v27, 0.0  ;;  %v1811_v29 = vmul.f32 %v4338_v27, %v4338_v27 }
 0x550   : > { %1796 = vadd.xlane.f32.xlu0 %v1795_v28 }
 0x551   : > { %v1815_v30 = vsel %vm1117_vm1, %v1811_v29, 0.0 }
 0x552   : > { %v1779_v31 = vpop.f32.mrf.mxu3  ;;  %1816 = vadd.xlane.f32.xlu1 %v1815_v30 }
 0x553   : > { %v1780_v32 = vadd.f32 %v3718_v19, %v1779_v31 }
 0x555   : > { %v4346_v33 = vadd.f32 %v1780_v32, %v4247_v45 }
 0x557   : > { %v1798_v34 = vsel %vm1117_vm1, %v4346_v33, 0.0  ;;  %v1812_v39 = vmul.f32 %v4346_v33, %v4346_v33 }
 0x558   : > { %1799 = vadd.xlane.f32.xlu2 %v1798_v34 }
 0x559   : > { %v1818_v35 = vsel %vm1117_vm1, %v1812_v39, 0.0  ;;  %v3711_v39 = vld [vmem:[%s4111_s6 + $0x1] ss:$0 sm:$0xff] }
 0x55a   : > { %1819 = vadd.xlane.f32.xlu0 %v1818_v35  ;;  %v1782_v36 = vpop.f32.mrf.mxu3 }
 0x55b   : > { %v1783_v38 = vadd.f32 %v3718_v19, %v1782_v36 }
 0x55d   : > { %v4354_v40 = vadd.f32 %v1783_v38, %v4255_v50 }
 0x55f   : > { %v1801_v41 = vsel %vm1117_vm1, %v4354_v40, 0.0  ;;  %v1813_v45 = vmul.f32 %v4354_v40, %v4354_v40 }
 0x560   : > { %1802 = vadd.xlane.f32.xlu2 %v1801_v41 }
 0x561   : > { %v1821_v42 = vsel %vm1117_vm1, %v1813_v45, 0.0 }
 0x562   : > { %v1784_v43 = vpop.f32.mrf.mxu3  ;;  %1822 = vadd.xlane.f32.xlu0 %v1821_v42 }
 0x563   : > { %v1785_v44 = vadd.f32 %v3718_v19, %v1784_v43 }
 0x565   : > { %v4362_v12 = vadd.f32 %v1785_v44, %v4269_v18  ;;  %v3712_v44 = vld [vmem:[%s4118_s29 + $0x1] ss:$0 sm:$0xff]  ;;  %s4781_s29 = sld [smem:[#allocation17_spill]] (!%p3559_p4) }
 0x567   : > { %v1804_v50 = vsel %vm1117_vm1, %v4362_v12, 0.0  ;;  %v1814_v46 = vmul.f32 %v4362_v12, %v4362_v12 }
 0x568   : > { %1805 = vadd.xlane.f32.xlu1 %v1804_v50 }
 0x569   : > { %v1824_v47 = vsel %vm1117_vm1, %v1814_v46, 0.0 }
 0x56a   : > { %1825 = vadd.xlane.f32.xlu2 %v1824_v47 }
 0x5c3   : > { %v1797_v48 = vpop.xlane.xlu0 %1796 }
 0x5c4   : > { %v1807_v49 = vmul.f32 %v1797_v48, %v4136_v37 }
 0x5c5   : > { %v1817_v15 = vpop.xlane.xlu1 %1816 }
 0x5c6   : > { %v1831_v52 = vmul.f32 %v1807_v49, %v1807_v49  ;;  %v1827_v53 = vmul.f32 %v1817_v15, %v4136_v37  ;;  %v1839_v30 = vsub.f32 %v4338_v27, %v1807_v49 }
 0x5c8   : > { %v1835_v18 = vsub.f32 %v1827_v53, %v1831_v52 }
 0x5ca   : > { %v1843_v55 = vadd.f32 1e-05, %v1835_v18 }
 0x5cb   : > { %v1800_v56 = vpop.xlane.xlu2 %1799 }
 0x5cc   : > { %3775 = vrsqrt.f32 %v1843_v55  ;;  %v1808_v60 = vmul.f32 %v1800_v56, %v4136_v37  ;;  %vm1853_vm13 = vweird.f32 %v1843_v55 }
 0x5cd   : > { %v1820_v23 = vpop.xlane.xlu0 %1819 }
 0x5ce   : > { %v1832_v61 = vmul.f32 %v1808_v60, %v1808_v60  ;;  %v1828_v62 = vmul.f32 %v1820_v23, %v4136_v37  ;;  %v1840_v45 = vsub.f32 %v4346_v33, %v1808_v60 }
 0x5d0   : > { %v1836_v63 = vsub.f32 %v1828_v62, %v1832_v61 }
 0x5d2   : > { %v3776_v0 = vpop.eup %3775  ;;  %v1844_v1 = vadd.f32 1e-05, %v1836_v63 }
 0x5d3   : > { %v1848_v2 = vmul.f32 %v3776_v0, %v1843_v55  ;;  %v1803_v3 = vpop.xlane.xlu2 %1802  ;;  %vm1854_vm12 = vweird.f32 %v3776_v0 }
 0x5d4   : > { %3777 = vrsqrt.f32 %v1844_v1  ;;  %v4376_v4 = vmul.f32 %v1803_v3, %v4136_v37  ;;  %vm1855_vm14 = vmor %vm1853_vm13, %vm1854_vm12  ;;  %vm1863_vm0 = vweird.f32 %v1844_v1 }
 0x5d5   : > { %v1849_v6 = vmul.f32 %v3776_v0, %v1848_v2  ;;  %v1823_v7 = vpop.xlane.xlu0 %1822 }
 0x5d6   : > { %v1833_v8 = vmul.f32 %v4376_v4, %v4376_v4  ;;  %v1829_v9 = vmul.f32 %v1823_v7, %v4136_v37  ;;  %v1841_v23 = vsub.f32 %v4354_v40, %v4376_v4 }
 0x5d7   : > { %v1850_v10 = vmul.f32 0.5, %v1849_v6 }
 0x5d8   : > { %v1837_v11 = vsub.f32 %v1829_v9, %v1833_v8 }
 0x5d9   : > { %v1851_v13 = vsub.f32 1.5, %v1850_v10  ;;  %v3719_v10 = vld [vmem:[%s4125_s8 + $0x1] ss:$0 sm:$0xff] }
 0x5da   : > { %v3778_v14 = vpop.eup %3777  ;;  %v1845_v16 = vadd.f32 1e-05, %v1837_v11 }
 0x5db   : > { %v1852_v17 = vmul.f32 %v3776_v0, %v1851_v13  ;;  %v1858_v20 = vmul.f32 %v3778_v14, %v1844_v1  ;;  %v1806_v21 = vpop.xlane.xlu1 %1805  ;;  %vm1864_vm15 = vweird.f32 %v3778_v14 }
 0x5dc   : > { %3779 = vrsqrt.f32 %v1845_v16  ;;  %v1810_v22 = vmul.f32 %v1806_v21, %v4136_v37  ;;  %vm1865_vm2 = vmor %vm1863_vm0, %vm1864_vm15  ;;  %vm1873_vm4 = vweird.f32 %v1845_v16 }
 0x5dd   : > { %v1859_v24 = vmul.f32 %v3778_v14, %v1858_v20  ;;  %v1826_v19 = vpop.xlane.xlu2 %1825  ;;  %v1856_v28 = vsel %vm1855_vm14, %v3776_v0, %v1852_v17 }
 0x5de   : > { %v1834_v25 = vmul.f32 %v1810_v22, %v1810_v22  ;;  %v1830_v26 = vmul.f32 %v1826_v19, %v4136_v37  ;;  %v1887_v35 = vmul.f32 %v1856_v28, %v1839_v30  ;;  %v1842_v0 = vsub.f32 %v4362_v12, %v1810_v22 }
 0x5df   : > { %v1860_v29 = vmul.f32 0.5, %v1859_v24 }
 0x5e0   : > { %v1838_v31 = vsub.f32 %v1830_v26, %v1834_v25  ;;  %v1894_v46 = vmul.f32 %v3711_v39, %v1887_v35  ;;  %v3658_v35 = vld [vmem:[%s4221_s27 + $0x18] sm:$0xff] }
 0x5e1   : > { %v1861_v32 = vsub.f32 1.5, %v1860_v29  ;;  %2160 = vmatpush.bf16.msra.mxu3 %v3658_v35 }
 0x5e2   : > { %v3780_v34 = vpop.eup %3779  ;;  %v1846_v36 = vadd.f32 1e-05, %v1838_v31  ;;  %v1901_v51 = vadd.f32 %v3712_v44, %v1894_v46 }
 0x5e3   : > { %v1862_v38 = vmul.f32 %v3778_v14, %v1861_v32  ;;  %v1868_v41 = vmul.f32 %v3780_v34, %v1845_v16  ;;  %vm1874_vm3 = vweird.f32 %v3780_v34 }
 0x5e4   : > { %3781 = vrsqrt.f32 %v1846_v36  ;;  %vm1875_vm5 = vmor %vm1873_vm4, %vm1874_vm3  ;;  %vm1883_vm7 = vweird.f32 %v1846_v36 }
 0x5e5   : > { %v1866_v42 = vsel %vm1865_vm2, %v3778_v14, %v1862_v38  ;;  %v1869_v43 = vmul.f32 %v3780_v34, %v1868_v41  ;;  %v3657_v38 = vld [vmem:[%s4221_s27 + $0x10] sm:$0xff]  ;;  %s4483_s27 = scalar_lea.vmem %s4732_s28, %s4128_s4  ;;  %s4784_s4 = sld [smem:[#allocation19_spill]] (!%p3559_p4) }
 0x5e6   : > { %v1888_v50 = vmul.f32 %v1866_v42, %v1840_v45  ;;  %2161 = vmatpush.bf16.msra.mxu3 %v3657_v38 }
 0x5e7   : > { %v1870_v47 = vmul.f32 0.5, %v1869_v43 }
 0x5e8   : > { %v1895_v48 = vmul.f32 %v3711_v39, %v1888_v50 }
 0x5e9   : > { %v1871_v49 = vsub.f32 1.5, %v1870_v47 }
 0x5ea   : > { %v3782_v15 = vpop.eup %3781  ;;  %v1902_v52 = vadd.f32 %v3712_v44, %v1895_v48 }
 0x5eb   : > { %v1872_v53 = vmul.f32 %v3780_v34, %v1871_v49  ;;  %v1878_v18 = vmul.f32 %v3782_v15, %v1846_v36  ;;  %vm1884_vm6 = vweird.f32 %v3782_v15 }
 0x5ec   : > { %v1919_v54 = vpack.c.bf16 %v1902_v52, %v1901_v51  ;;  %vm1885_vm8 = vmor %vm1883_vm7, %vm1884_vm6 }
 0x5ed   : > { %v1879_v55 = vmul.f32 %v3782_v15, %v1878_v18  ;;  %v1876_v56 = vsel %vm1875_vm5, %v3780_v34, %v1872_v53 }
 0x5ee   : > { %3473 = vmatmul.msk.bf16.vlgmr.msrb.gmra.mxu0 %vm1117_vm1, %v1919_v54  ;;  %v1889_v62 = vmul.f32 %v1876_v56, %v1841_v23 }
 0x5ef   : > { %v1880_v60 = vmul.f32 0.5, %v1879_v55 }
 0x5f0   : > { %v1896_v3 = vmul.f32 %v3711_v39, %v1889_v62 }
 0x5f1   : > { %v1881_v61 = vsub.f32 1.5, %v1880_v60 }
 0x5f2   : > { %v1903_v7 = vadd.f32 %v3712_v44, %v1896_v3 }
 0x5f3   : > { %v1882_v63 = vmul.f32 %v3782_v15, %v1881_v61 }
 0x5f5   : > { %v1886_v1 = vsel %vm1885_vm8, %v3782_v15, %v1882_v63 }
 0x5f6   : > { %v1890_v2 = vmul.f32 %v1886_v1, %v1842_v0 }
 0x5f8   : > { %v1897_v6 = vmul.f32 %v3711_v39, %v1890_v2 }
 0x5fa   : > { %v1904_v8 = vadd.f32 %v3712_v44, %v1897_v6 }
 0x5fc   : > { %v1920_v9 = vpack.c.bf16 %v1904_v8, %v1903_v7 }
 0x5fe   : > { %3474 = vmatmul.msk.bf16.gmra.mxu0 %vm1117_vm1, %v1920_v9 }
 0x66b   : > { %v1951_v4 = vpop.f32.mrf.mxu0 }
 0x66c   : > { %v1952_v11 = vadd.f32 %v3719_v10, %v1951_v4 }
 0x66e   : > { %1965 = vrot.lane.b32.xlu0 %v1952_v11, %s4779_s13 }
 0x673   : > { %v1953_v13 = vpop.f32.mrf.mxu0 }
 0x674   : > { %v1954_v14 = vadd.f32 %v3719_v10, %v1953_v13 }
 0x676   : > { %1967 = vrot.lane.b32.xlu0 %v1954_v14, %s4779_s13 }
 0x67b   : > { %v1956_v16 = vpop.f32.mrf.mxu0 }
 0x67c   : > { %v1957_v17 = vadd.f32 %v3719_v10, %v1956_v16 }
 0x67e   : > { %2099 = vrot.lane.b32.xlu0 %v1957_v17, %s4780_s7  ;;  %1969 = vrot.lane.b32.xlu1 %v1957_v17, %s4779_s13 }
 0x683   : > { %v1958_v20 = vpop.f32.mrf.mxu0 }
 0x684   : > { %v1959_v21 = vadd.f32 %v3719_v10, %v1958_v20 }
 0x686   : > { %1971 = vrot.lane.b32.xlu2 %v1959_v21, %s4779_s13  ;;  %2095 = vrot.lane.b32.xlu1 %v1952_v11, %s4780_s7 }
 0x68e   : > { %2097 = vrot.lane.b32.xlu2 %v1954_v14, %s4780_s7  ;;  %2101 = vrot.lane.b32.xlu1 %v1959_v21, %s4780_s7 }
 0x6e0   : > { %v1966_v22 = vpop.permute.xlu0 %1965  ;;  %v1972_v30 = vpop.permute.xlu2 %1971 }
 0x6e1   : > { %v1977_v24 = vmul.f32 %v1966_v22, %v1952_v11  ;;  %v1980_v31 = vmul.f32 %v1972_v30, %v1959_v21  ;;  %v2023_v32 = vmul.f32 %v1972_v30, %v1954_v14  ;;  %v2024_v34 = vmul.f32 %v1966_v22, %v1957_v17 }
 0x6e3   : > { %3475 = vmatmul.msk.f32.vlgmr.msra.gmra.mxu1 %vm1117_vm1, %v1977_v24 }
 0x6e8   : > { %v1968_v19 = vpop.permute.xlu0 %1967  ;;  %v2098_v3 = vpop.permute.xlu2 %2097 }
 0x6e9   : > { %v1978_v25 = vmul.f32 %v1968_v19, %v1954_v14  ;;  %v2025_v39 = vmul.f32 %v1968_v19, %v1959_v21 }
 0x6eb   : > { %3476 = vmatmul.msk.f32.gmra.mxu1 %vm1117_vm1, %v1978_v25 }
 0x6f0   : > { %v1970_v26 = vpop.permute.xlu1 %1969  ;;  %v2100_v9 = vpop.permute.xlu0 %2099 }
 0x6f1   : > { %v1979_v28 = vmul.f32 %v1970_v26, %v1957_v17  ;;  %v2022_v29 = vmul.f32 %v1970_v26, %v1952_v11 }
 0x6f3   : > { %3477 = vmatmul.msk.f32.gmra.mxu1 %vm1117_vm1, %v1979_v28  ;;  %3479 = vmatmul.msk.f32.vlgmr.msrb.gmra.mxu2 %vm1117_vm1, %v2022_v29 }
 0x6f8   : > { %v2096_v54 = vpop.permute.xlu1 %2095 }
 0x6fb   : > { %3478 = vmatmul.msk.f32.gmra.mxu1 %vm1117_vm1, %v1980_v31  ;;  %3480 = vmatmul.msk.f32.gmra.mxu2 %vm1117_vm1, %v2023_v32 }
 0x700   : > { %v2102_v10 = vpop.permute.xlu1 %2101 }
 0x703   : > { %3481 = vmatmul.msk.f32.gmra.mxu2 %vm1117_vm1, %v2024_v34 }
 0x70b   : > { %3482 = vmatmul.msk.f32.gmra.mxu2 %vm1117_vm1, %v2025_v39 }
 0x760   : > { %v2010_v36 = vpop.f32.mrf.mxu1 }
 0x768   : > { %v2013_v44 = vpop.f32.mrf.mxu1 }
 0x770   : > { %v2016_v53 = vpop.f32.mrf.mxu1 }
 0x776   : > { %v2055_v41 = vpop.f32.mrf.mxu2 }
 0x777   : > { %v2067_v45 = vmax.f32 %v2010_v36, %v2055_v41 }
 0x778   : > { %v2019_v7 = vpop.f32.mrf.mxu1 }
 0x779   : > { %v2071_v42 = vsub.f32 %v2010_v36, %v2067_v45  ;;  %v2083_v43 = vsub.f32 %v2055_v41, %v2067_v45 }
 0x77b   : > { %v2075_v50 = vmul.f32 1.442695, %v2071_v42  ;;  %v2087_v46 = vmul.f32 1.442695, %v2083_v43 }
 0x77d   : > { %3783 = vpow2.f32 %v2075_v50 }
 0x77e   : > { %v2058_v47 = vpop.f32.mrf.mxu2  ;;  %3785 = vpow2.f32 %v2087_v46 }
 0x77f   : > { %v2068_v48 = vmax.f32 %v2013_v44, %v2058_v47 }
 0x781   : > { %v2072_v49 = vsub.f32 %v2013_v44, %v2068_v48  ;;  %v2084_v15 = vsub.f32 %v2058_v47, %v2068_v48 }
 0x783   : > { %v2077_v51 = vmul.f32 1.442695, %v2072_v49  ;;  %v2089_v52 = vmul.f32 1.442695, %v2084_v15  ;;  %v3784_v18 = vpop.eup %3783  ;;  %v3720_v15 = vld [vmem:[%s4215_s9 + $0x1] ss:$0 sm:$0xff] }
 0x784   : > { %v3786_v55 = vpop.eup %3785  ;;  %v2107_v4 = vmul.f32 %v3784_v18, %v2096_v54  ;;  %s4782_s9 = sld [smem:[#allocation18_spill]] (!%p3559_p4) }
 0x785   : > { %3787 = vpow2.f32 %v2077_v51  ;;  %v2111_v23 = vadd.f32 %v3786_v55, %v3784_v18  ;;  %v2115_v13 = vmul.f32 %v3786_v55, %v2100_v9 }
 0x786   : > { %3789 = vpow2.f32 %v2089_v52  ;;  %v2061_v56 = vpop.f32.mrf.mxu2 }
 0x787   : > { %v2069_v60 = vmax.f32 %v2016_v53, %v2061_v56  ;;  %3791 = vrcp.f32 %v2111_v23  ;;  %v2119_v25 = vadd.f32 %v2115_v13, %v2107_v4 }
 0x789   : > { %v2073_v61 = vsub.f32 %v2016_v53, %v2069_v60  ;;  %v2085_v62 = vsub.f32 %v2061_v56, %v2069_v60 }
 0x78b   : > { %v3788_v63 = vpop.eup %3787  ;;  %v2079_v0 = vmul.f32 1.442695, %v2073_v61  ;;  %v2091_v2 = vmul.f32 1.442695, %v2085_v62 }
 0x78c   : > { %v3790_v1 = vpop.eup %3789  ;;  %v2108_v14 = vmul.f32 %v3788_v63, %v2098_v3 }
 0x78d   : > { %v2112_v6 = vadd.f32 %v3790_v1, %v3788_v63  ;;  %3793 = vpow2.f32 %v2079_v0  ;;  %v2116_v16 = vmul.f32 %v3790_v1, %v2102_v10  ;;  %v3792_v21 = vpop.eup %3791 }
 0x78e   : > { %v2064_v8 = vpop.f32.mrf.mxu2  ;;  %v2127_v30 = vmul.f32 %v3792_v21, %v2119_v25 }
 0x78f   : > { %3795 = vrcp.f32 %v2112_v6  ;;  %v2070_v11 = vmax.f32 %v2019_v7, %v2064_v8  ;;  %v2120_v26 = vadd.f32 %v2116_v16, %v2108_v14  ;;  %v3660_v14 = vld [vmem:[%s4286_s23 + $0x18] sm:$0xff] }
 0x790   : > { %3797 = vpow2.f32 %v2091_v2  ;;  %2346 = vmatpush.bf16.msra.mxu0 %v3660_v14 }
 0x791   : > { %v2074_v17 = vsub.f32 %v2019_v7, %v2070_v11  ;;  %v2086_v20 = vsub.f32 %v2064_v8, %v2070_v11 }
 0x793   : > { %v2081_v22 = vmul.f32 1.442695, %v2074_v17  ;;  %v2093_v24 = vmul.f32 1.442695, %v2086_v20  ;;  %v3794_v19 = vpop.eup %3793  ;;  %v3659_v20 = vld [vmem:[%s4286_s23 + $0x10] sm:$0xff] }
 0x794   : > { %v2109_v45 = vmul.f32 %v3794_v19, %v2100_v9  ;;  %2347 = vmatpush.bf16.msra.mxu0 %v3659_v20 }
 0x795   : > { %v3796_v28 = vpop.eup %3795  ;;  %3799 = vpow2.f32 %v2081_v22 }
 0x796   : > { %v3798_v29 = vpop.eup %3797  ;;  %v2128_v31 = vmul.f32 %v3796_v28, %v2120_v26  ;;  %3801 = vpow2.f32 %v2093_v24 }
 0x797   : > { %v2113_v34 = vadd.f32 %v3798_v29, %v3794_v19  ;;  %v2117_v38 = vmul.f32 %v3798_v29, %v2096_v54 }
 0x798   : > { %v2131_v32 = vpack.c.bf16 %v2128_v31, %v2127_v30 }
 0x799   : > { %3803 = vrcp.f32 %v2113_v34  ;;  %v2121_v44 = vadd.f32 %v2117_v38, %v2109_v45 }
 0x79a   : > { %3491 = vmatmul.msk.bf16.vlgmr.msra.gmra.mxu3 %vm1117_vm1, %v2131_v32 }
 0x79b   : > { %v3800_v39 = vpop.eup %3799 }
 0x79c   : > { %v3802_v35 = vpop.eup %3801  ;;  %v2110_v42 = vmul.f32 %v3800_v39, %v2102_v10 }
 0x79d   : > { %v2114_v36 = vadd.f32 %v3802_v35, %v3800_v39  ;;  %v2118_v41 = vmul.f32 %v3802_v35, %v2098_v3 }
 0x79f   : > { %3805 = vrcp.f32 %v2114_v36  ;;  %v3804_v43 = vpop.eup %3803  ;;  %v2122_v50 = vadd.f32 %v2118_v41, %v2110_v42 }
 0x7a0   : > { %v2129_v47 = vmul.f32 %v3804_v43, %v2121_v44 }
 0x7a5   : > { %v3806_v46 = vpop.eup %3805 }
 0x7a6   : > { %v2130_v48 = vmul.f32 %v3806_v46, %v2122_v50 }
 0x7a8   : > { %v2132_v49 = vpack.c.bf16 %v2130_v48, %v2129_v47 }
 0x7aa   : > { %3492 = vmatmul.msk.bf16.gmra.mxu3 %vm1117_vm1, %v2132_v49 }
 0x81d   : > { %v2163_v51 = vpop.f32.mrf.mxu3 }
 0x81e   : > { %v2164_v52 = vadd.f32 %v3720_v15, %v2163_v51 }
 0x820   : > { %v4415_v53 = vadd.f32 %v2164_v52, %v4338_v27 }
 0x822   : > { %v2181_v18 = vsel %vm1117_vm1, %v4415_v53, 0.0  ;;  %v2197_v54 = vmul.f32 %v4415_v53, %v4415_v53 }
 0x823   : > { %2182 = vadd.xlane.f32.xlu2 %v2181_v18 }
 0x824   : > { %v2201_v55 = vsel %vm1117_vm1, %v2197_v54, 0.0 }
 0x825   : > { %v2165_v56 = vpop.f32.mrf.mxu3  ;;  %2202 = vadd.xlane.f32.xlu1 %v2201_v55 }
 0x826   : > { %v2166_v60 = vadd.f32 %v3720_v15, %v2165_v56 }
 0x828   : > { %v4423_v23 = vadd.f32 %v2166_v60, %v4346_v33 }
 0x82a   : > { %v2184_v61 = vsel %vm1117_vm1, %v4423_v23, 0.0  ;;  %v2198_v27 = vmul.f32 %v4423_v23, %v4423_v23 }
 0x82b   : > { %2185 = vadd.xlane.f32.xlu0 %v2184_v61 }
 0x82c   : > { %v2204_v62 = vsel %vm1117_vm1, %v2198_v27, 0.0  ;;  %v3721_v27 = vld [vmem:[%s4235_s30 + $0x1] ss:$0 sm:$0xff] }
 0x82d   : > { %2205 = vadd.xlane.f32.xlu2 %v2204_v62  ;;  %v2168_v63 = vpop.f32.mrf.mxu3 }
 0x82e   : > { %v2169_v0 = vadd.f32 %v3720_v15, %v2168_v63 }
 0x830   : > { %v4431_v1 = vadd.f32 %v2169_v0, %v4354_v40 }
 0x832   : > { %v2187_v2 = vsel %vm1117_vm1, %v4431_v1, 0.0  ;;  %v2199_v33 = vmul.f32 %v4431_v1, %v4431_v1 }
 0x833   : > { %2188 = vadd.xlane.f32.xlu0 %v2187_v2 }
 0x834   : > { %v2207_v3 = vsel %vm1117_vm1, %v2199_v33, 0.0 }
 0x835   : > { %v2170_v6 = vpop.f32.mrf.mxu3  ;;  %2208 = vadd.xlane.f32.xlu2 %v2207_v3 }
 0x836   : > { %v2171_v7 = vadd.f32 %v3720_v15, %v2170_v6 }
 0x838   : > { %v4439_v8 = vadd.f32 %v2171_v7, %v4362_v12 }
 0x83a   : > { %v2190_v40 = vsel %vm1117_vm1, %v4439_v8, 0.0  ;;  %v2200_v9 = vmul.f32 %v4439_v8, %v4439_v8 }
 0x83b   : > { %2191 = vadd.xlane.f32.xlu1 %v2190_v40 }
 0x83c   : > { %v2210_v10 = vsel %vm1117_vm1, %v2200_v9, 0.0  ;;  %v3722_v9 = vld [vmem:[%s4265_s3 + $0x1] ss:$0 sm:$0xff] }
 0x83d   : > { %2211 = vadd.xlane.f32.xlu0 %v2210_v10 }
 0x896   : > { %v2183_v4 = vpop.xlane.xlu2 %2182 }
 0x897   : > { %v2193_v11 = vmul.f32 %v2183_v4, %v4136_v37 }
 0x898   : > { %v2203_v13 = vpop.xlane.xlu1 %2202 }
 0x899   : > { %v2217_v16 = vmul.f32 %v2193_v11, %v2193_v11  ;;  %v2213_v17 = vmul.f32 %v2203_v13, %v4136_v37  ;;  %v2225_v55 = vsub.f32 %v4415_v53, %v2193_v11 }
 0x89b   : > { %v2221_v12 = vsub.f32 %v2213_v17, %v2217_v16 }
 0x89d   : > { %v2229_v21 = vadd.f32 1e-05, %v2221_v12 }
 0x89e   : > { %v2186_v22 = vpop.xlane.xlu0 %2185 }
 0x89f   : > { %3807 = vrsqrt.f32 %v2229_v21  ;;  %v2194_v24 = vmul.f32 %v2186_v22, %v4136_v37  ;;  %vm2239_vm10 = vweird.f32 %v2229_v21 }
 0x8a0   : > { %v2206_v19 = vpop.xlane.xlu2 %2205 }
 0x8a1   : > { %v2218_v25 = vmul.f32 %v2194_v24, %v2194_v24  ;;  %v2214_v26 = vmul.f32 %v2206_v19, %v4136_v37  ;;  %v2226_v33 = vsub.f32 %v4423_v23, %v2194_v24 }
 0x8a3   : > { %v2222_v28 = vsub.f32 %v2214_v26, %v2218_v25 }
 0x8a5   : > { %v3808_v29 = vpop.eup %3807  ;;  %v2230_v30 = vadd.f32 1e-05, %v2222_v28 }
 0x8a6   : > { %v2234_v31 = vmul.f32 %v3808_v29, %v2229_v21  ;;  %v2189_v32 = vpop.xlane.xlu0 %2188  ;;  %vm2240_vm9 = vweird.f32 %v3808_v29 }
 0x8a7   : > { %3809 = vrsqrt.f32 %v2230_v30  ;;  %v4453_v34 = vmul.f32 %v2189_v32, %v4136_v37  ;;  %vm2241_vm11 = vmor %vm2239_vm10, %vm2240_vm9  ;;  %vm2249_vm13 = vweird.f32 %v2230_v30 }
 0x8a8   : > { %v2235_v39 = vmul.f32 %v3808_v29, %v2234_v31  ;;  %v2209_v35 = vpop.xlane.xlu2 %2208 }
 0x8a9   : > { %v2219_v36 = vmul.f32 %v4453_v34, %v4453_v34  ;;  %v2215_v38 = vmul.f32 %v2209_v35, %v4136_v37  ;;  %v2227_v19 = vsub.f32 %v4431_v1, %v4453_v34 }
 0x8aa   : > { %v2236_v41 = vmul.f32 0.5, %v2235_v39 }
 0x8ab   : > { %v2223_v45 = vsub.f32 %v2215_v38, %v2219_v36  ;;  %v3668_v38 = vld [vmem:[%s4325_s22 + $0x78] sm:$0xff] }
 0x8ac   : > { %v2237_v42 = vsub.f32 1.5, %v2236_v41  ;;  %2448 = vmatpush.bf16.msrb.mxu1 %v3668_v38  ;;  %v3667_v41 = vld [vmem:[%s4325_s22 + $0x70] sm:$0xff]  ;;  %v3724_v38 = vld [vmem:[%s4319_s1 + $0x1] ss:$0 sm:$0xff] }
 0x8ad   : > { %v3810_v43 = vpop.eup %3809  ;;  %v2231_v44 = vadd.f32 1e-05, %v2223_v45  ;;  %v3666_v45 = vld [vmem:[%s4325_s22 + $0x68] sm:$0xff] }
 0x8ae   : > { %v2238_v50 = vmul.f32 %v3808_v29, %v2237_v42  ;;  %v2244_v46 = vmul.f32 %v3810_v43, %v2230_v30  ;;  %v2192_v47 = vpop.xlane.xlu1 %2191  ;;  %vm2250_vm12 = vweird.f32 %v3810_v43  ;;  %v3665_v42 = vld [vmem:[%s4325_s22 + $0x60] sm:$0xff] }
 0x8af   : > { %3811 = vrsqrt.f32 %v2231_v44  ;;  %v2196_v48 = vmul.f32 %v2192_v47, %v4136_v37  ;;  %vm2251_vm14 = vmor %vm2249_vm13, %vm2250_vm12  ;;  %vm2259_vm0 = vweird.f32 %v2231_v44  ;;  %v3723_v47 = vld [vmem:[%s4280_s2 + $0x1] ss:$0 sm:$0xff]  ;;  %s3890_s2 = smov (!%p3559_p4), 96  }
 0x8b0   : > { %v2245_v49 = vmul.f32 %v3810_v43, %v2244_v46  ;;  %v2212_v15 = vpop.xlane.xlu0 %2211  ;;  %v2242_v18 = vsel %vm2241_vm11, %v3808_v29, %v2238_v50  ;;  %2449 = vmatpush.bf16.msrb.mxu1 %v3667_v41  ;;  %v3662_v50 = vld [vmem:[%s4325_s22 + $0x48] sm:$0xff]  ;;  %v3661_v46 = vld [vmem:[%s4325_s22 + $0x40] sm:$0xff] }
 0x8b1   : > { %v2220_v51 = vmul.f32 %v2196_v48, %v2196_v48  ;;  %v2216_v52 = vmul.f32 %v2212_v15, %v4136_v37  ;;  %v2273_v62 = vmul.f32 %v2242_v18, %v2225_v55  ;;  %v2228_v29 = vsub.f32 %v4439_v8, %v2196_v48 }
 0x8b2   : > { %v2246_v54 = vmul.f32 0.5, %v2245_v49 }
 0x8b3   : > { %v2224_v56 = vsub.f32 %v2216_v52, %v2220_v51  ;;  %v2280_v7 = vmul.f32 %v3721_v27, %v2273_v62 }
 0x8b4   : > { %v2247_v60 = vsub.f32 1.5, %v2246_v54  ;;  %2450 = vmatpush.bf16.msrb.mxu1 %v3666_v45 }
 0x8b5   : > { %v3812_v61 = vpop.eup %3811  ;;  %v2232_v63 = vadd.f32 1e-05, %v2224_v56  ;;  %v2287_v14 = vadd.f32 %v3722_v9, %v2280_v7 }
 0x8b6   : > { %v2248_v0 = vmul.f32 %v3810_v43, %v2247_v60  ;;  %v2254_v2 = vmul.f32 %v3812_v61, %v2231_v44  ;;  %vm2260_vm15 = vweird.f32 %v3812_v61  ;;  %v3663_v44 = vld [vmem:[%s4325_s22 + $0x50] sm:$0xff] }
 0x8b7   : > { %3813 = vrsqrt.f32 %v2232_v63  ;;  %vm2261_vm2 = vmor %vm2259_vm0, %vm2260_vm15  ;;  %vm2269_vm4 = vweird.f32 %v2232_v63 }
 0x8b8   : > { %v2252_v3 = vsel %vm2251_vm14, %v3810_v43, %v2248_v0  ;;  %v2255_v6 = vmul.f32 %v3812_v61, %v2254_v2  ;;  %2451 = vmatpush.bf16.msrb.mxu1 %v3665_v42  ;;  %v3664_v43 = vld [vmem:[%s4325_s22 + $0x58] sm:$0xff] }
 0x8b9   : > { %v2274_v40 = vmul.f32 %v2252_v3, %v2226_v33 }
 0x8ba   : > { %v2256_v10 = vmul.f32 0.5, %v2255_v6 }
 0x8bb   : > { %v2281_v4 = vmul.f32 %v3721_v27, %v2274_v40 }
 0x8bc   : > { %v2257_v11 = vsub.f32 1.5, %v2256_v10  ;;  %2452 = vmatpush.bf16.msrb.mxu1 %v3664_v43 }
 0x8bd   : > { %v3814_v13 = vpop.eup %3813  ;;  %v2288_v16 = vadd.f32 %v3722_v9, %v2281_v4 }
 0x8be   : > { %v2258_v17 = vmul.f32 %v3812_v61, %v2257_v11  ;;  %v2264_v12 = vmul.f32 %v3814_v13, %v2232_v63  ;;  %vm2270_vm3 = vweird.f32 %v3814_v13 }
 0x8bf   : > { %v2317_v20 = vpack.c.bf16 %v2288_v16, %v2287_v14  ;;  %vm2271_vm5 = vmor %vm2269_vm4, %vm2270_vm3 }
 0x8c0   : > { %v2265_v21 = vmul.f32 %v3814_v13, %v2264_v12  ;;  %v2262_v22 = vsel %vm2261_vm2, %v3812_v61, %v2258_v17  ;;  %2453 = vmatpush.bf16.msrb.mxu1 %v3663_v44 }
 0x8c1   : > { %3525 = vmatmul.msk.bf16.vlgmr.msra.gmra.mxu0 %vm1117_vm1, %v2317_v20  ;;  %v2275_v26 = vmul.f32 %v2262_v22, %v2227_v19 }
 0x8c2   : > { %v2266_v24 = vmul.f32 0.5, %v2265_v21 }
 0x8c3   : > { %v2282_v32 = vmul.f32 %v3721_v27, %v2275_v26 }
 0x8c4   : > { %v2267_v25 = vsub.f32 1.5, %v2266_v24  ;;  %2454 = vmatpush.bf16.msrb.mxu1 %v3662_v50 }
 0x8c5   : > { %v2289_v35 = vadd.f32 %v3722_v9, %v2282_v32 }
 0x8c6   : > { %v2268_v28 = vmul.f32 %v3814_v13, %v2267_v25 }
 0x8c8   : > { %v2272_v30 = vsel %vm2271_vm5, %v3814_v13, %v2268_v28  ;;  %2455 = vmatpush.bf16.msrb.mxu1 %v3661_v46 }
 0x8c9   : > { %v2276_v31 = vmul.f32 %v2272_v30, %v2228_v29 }
 0x8cb   : > { %v2283_v39 = vmul.f32 %v3721_v27, %v2276_v31 }
 0x8cd   : > { %v2290_v34 = vadd.f32 %v3722_v9, %v2283_v39 }
 0x8cf   : > { %v2318_v36 = vpack.c.bf16 %v2290_v34, %v2289_v35 }
 0x8d1   : > { %3526 = vmatmul.msk.bf16.gmra.mxu0 %vm1117_vm1, %v2318_v36 }
 0x93e   : > { %v2349_v48 = vpop.f32.mrf.mxu0 }
 0x93f   : > { %v2350_v49 = vadd.f32 %v3723_v47, %v2349_v48 }
 0x941   : > { %v2363_v15 = vmul.f32 0.044715, %v2350_v49  ;;  %v2359_v14 = vmul.f32 0.5, %v2350_v49 }
 0x943   : > { %v2367_v51 = vmul.f32 %v2363_v15, %v2350_v49 }
 0x945   : > { %v2371_v52 = vmul.f32 %v2367_v51, %v2350_v49 }
 0x946   : > { %v2351_v18 = vpop.f32.mrf.mxu0 }
 0x947   : > { %v2375_v54 = vadd.f32 %v2371_v52, %v2350_v49  ;;  %v2352_v55 = vadd.f32 %v3723_v47, %v2351_v18 }
 0x949   : > { %v2364_v56 = vmul.f32 0.044715, %v2352_v55  ;;  %v2379_v60 = vmul.f32 0.7978846, %v2375_v54  ;;  %v2360_v16 = vmul.f32 0.5, %v2352_v55 }
 0x94b   : > { %v2368_v61 = vmul.f32 %v2364_v56, %v2352_v55  ;;  %3815 = vtanh.f32 %v2379_v60 }
 0x94d   : > { %v2372_v27 = vmul.f32 %v2368_v61, %v2352_v55 }
 0x94e   : > { %v2354_v62 = vpop.f32.mrf.mxu0 }
 0x94f   : > { %v2376_v63 = vadd.f32 %v2372_v27, %v2352_v55  ;;  %v2355_v0 = vadd.f32 %v3723_v47, %v2354_v62 }
 0x951   : > { %v2380_v2 = vmul.f32 0.7978846, %v2376_v63  ;;  %v2365_v33 = vmul.f32 0.044715, %v2355_v0  ;;  %v3816_v6 = vpop.eup %3815  ;;  %v2361_v31 = vmul.f32 0.5, %v2355_v0 }
 0x952   : > { %v2387_v4 = vadd.f32 1.0, %v3816_v6 }
 0x953   : > { %3817 = vtanh.f32 %v2380_v2  ;;  %v2369_v3 = vmul.f32 %v2365_v33, %v2355_v0 }
 0x954   : > { %v2391_v21 = vmul.f32 %v2387_v4, %v2359_v14 }
 0x955   : > { %v2373_v7 = vmul.f32 %v2369_v3, %v2355_v0 }
 0x956   : > { %v2356_v40 = vpop.f32.mrf.mxu0 }
 0x957   : > { %v2357_v9 = vadd.f32 %v3723_v47, %v2356_v40  ;;  %v2377_v10 = vadd.f32 %v2373_v7, %v2355_v0 }
 0x959   : > { %v3818_v11 = vpop.eup %3817  ;;  %v2366_v13 = vmul.f32 0.044715, %v2357_v9  ;;  %v2381_v20 = vmul.f32 0.7978846, %v2377_v10  ;;  %v2362_v32 = vmul.f32 0.5, %v2357_v9 }
 0x95a   : > { %v2388_v17 = vadd.f32 1.0, %v3818_v11 }
 0x95b   : > { %v2370_v12 = vmul.f32 %v2366_v13, %v2357_v9  ;;  %3819 = vtanh.f32 %v2381_v20 }
 0x95c   : > { %v2392_v22 = vmul.f32 %v2388_v17, %v2360_v16 }
 0x95d   : > { %v2374_v24 = vmul.f32 %v2370_v12, %v2357_v9 }
 0x95e   : > { %v2395_v19 = vpack.c.bf16 %v2392_v22, %v2391_v21 }
 0x95f   : > { %v2378_v25 = vadd.f32 %v2374_v24, %v2357_v9 }
 0x960   : > { %2456 = vmatmul.bf16.vlgmr.msrb.gmra.mxu1 %v2395_v19 }
 0x961   : > { %v2382_v26 = vmul.f32 0.7978846, %v2378_v25  ;;  %v3820_v28 = vpop.eup %3819 }
 0x962   : > { %v2389_v29 = vadd.f32 1.0, %v3820_v28 }
 0x963   : > { %3821 = vtanh.f32 %v2382_v26 }
 0x964   : > { %v2393_v35 = vmul.f32 %v2389_v29, %v2361_v31 }
 0x969   : > { %v3822_v30 = vpop.eup %3821 }
 0x96a   : > { %v2390_v39 = vadd.f32 1.0, %v3822_v30 }
 0x96c   : > { %v2394_v34 = vmul.f32 %v2390_v39, %v2362_v32 }
 0x96e   : > { %v2396_v36 = vpack.c.bf16 %v2394_v34, %v2393_v35 }
 0x970   : > { %2461 = vmatmul.bf16.gmra.mxu1 %v2396_v36 }
 0x9dd   : > { %v2457_v41 = vpop.f32.mrf.mxu1 }
 0x9de   : > { %v2458_v45 = vadd.f32 %v3724_v38, %v2457_v41 }
 0x9e0   : > { %v2467_v42 = vadd.f32 %v2458_v45, %v4415_v53 }
 0x9e2   : > { %2471 = vst.msk [vmem:[%s4483_s27] sm:$0xff] %vm1117_vm1, %v2467_v42 }
 0x9e5   : > { %v2459_v43 = vpop.f32.mrf.mxu1 }
 0x9e6   : > { %v2460_v44 = vadd.f32 %v3724_v38, %v2459_v43 }
 0x9e8   : > { %v2468_v50 = vadd.f32 %v2460_v44, %v4423_v23 }
 0x9ea   : > { %2472 = vst.msk [vmem:[%s4483_s27 + $0x8] sm:$0xff] %vm1117_vm1, %v2468_v50 }
 0x9ed   : > { %v2462_v46 = vpop.f32.mrf.mxu1 }
 0x9ee   : > { %v2463_v47 = vadd.f32 %v3724_v38, %v2462_v46 }
 0x9f0   : > { %v2469_v48 = vadd.f32 %v2463_v47, %v4431_v1 }
 0x9f2   : > { %2473 = vst.msk [vmem:[%s4483_s27 + $0x10] sm:$0xff] %vm1117_vm1, %v2469_v48 }
 0x9f5   : > { %v2464_v49 = vpop.f32.mrf.mxu1 }
 0x9f6   : > { %v2465_v15 = vadd.f32 %v3724_v38, %v2464_v49  ;;  %2478 = sbr.rel (%p3559_p4) target bundleno = 3748 (0xea4), region = 136 }
 0x9f8   : > { %v2470_v51 = vadd.f32 %v2465_v15, %v4439_v8 }
 0x9fa   : > { %2474 = vst.msk [vmem:[%s4483_s27 + $0x18] sm:$0xff] %vm1117_vm1, %v2470_v51 }
 0x9fb   : > { %v4499_v53 = vld [vmem:[%s4483_s27 + $0x10] sm:$0xff]  ;;  %v4502_v23 = vld [vmem:[%s4483_s27] sm:$0xff]  ;;  %2691 = vmatpush.msra.mxu1 %v4169_v58  ;;  %v4517_v55 = vld [vmem:[%s4483_s27 + $0x8] sm:$0xff] }
 0x9fc   : > { %v2491_v1 = vsel %vm1117_vm1, %v4499_v53, 0.0  ;;  %v2503_v8 = vmul.f32 %v4499_v53, %v4499_v53  ;;  %v2485_v52 = vsel %vm1117_vm1, %v4502_v23, 0.0  ;;  %v2488_v61 = vsel %vm1117_vm1, %v4517_v55, 0.0  ;;  %v3670_v40 = vld [vmem:[%s4722_s18 + $0x8] sm:$0xff]  ;;  %v3669_v11 = vld [vmem:[%s4722_s18] sm:$0xff] }
 0x9fd   : > { %2492 = vadd.xlane.f32.xlu0 %v2491_v1  ;;  %2486 = vadd.xlane.f32.xlu2 %v2485_v52  ;;  %v2501_v62 = vmul.f32 %v4502_v23, %v4502_v23  ;;  %v2502_v63 = vmul.f32 %v4517_v55, %v4517_v55  ;;  %v3823_v1 = vld [vmem:[%s4720_s16] ss:$0 sm:$0xff] }
 0x9fe   : > { %v2511_v54 = vsel %vm1117_vm1, %v2503_v8, 0.0  ;;  %2692 = vmatpush.msra.mxu1 %v4174_v57  ;;  %3685 = vmatpush.bf16.msra.mxu2 %v3670_v40 }
 0x9ff   : > { %2512 = vadd.xlane.f32.xlu1 %v2511_v54  ;;  %v2505_v0 = vsel %vm1117_vm1, %v2501_v62, 0.0  ;;  %v2508_v2 = vsel %vm1117_vm1, %v2502_v63, 0.0  ;;  %2634 = vmatpush.bf16.msra.mxu0 %v3670_v40 }
 0xa00   : > { %2693 = vmatpush.msra.mxu1 %v4181_v59 }
 0xa01   : > { %v4512_v18 = vld [vmem:[%s4483_s27 + $0x18] sm:$0xff] }
 0xa02   : > { %v2504_v56 = vmul.f32 %v4512_v18, %v4512_v18  ;;  %v2494_v60 = vsel %vm1117_vm1, %v4512_v18, 0.0  ;;  %2694 = vmatpush.msra.mxu1 %v4199_v5  ;;  %3686 = vmatpush.bf16.msra.mxu2 %v3669_v11 }
 0xa03   : > { %2635 = vmatpush.bf16.msra.mxu0 %v3669_v11 }
 0xa04   : > { %v2514_v27 = vsel %vm1117_vm1, %v2504_v56, 0.0 }
 0xa05   : > { %2495 = vadd.xlane.f32.xlu0 %v2494_v60  ;;  %2489 = vadd.xlane.f32.xlu2 %v2488_v61 }
 0xa06   : > { %2736 = vmatpush.msrb.mxu2 %v4169_v58 }
 0xa07   : > { %2515 = vadd.xlane.f32.xlu1 %v2514_v27 }
 0xa08   : > { %2737 = vmatpush.msrb.mxu2 %v4174_v57 }
 0xa0a   : > { %2738 = vmatpush.msrb.mxu2 %v4181_v59 }
 0xa0c   : > { %2739 = vmatpush.msrb.mxu2 %v4199_v5 }
 0xa0d   : > { %2506 = vadd.xlane.f32.xlu0 %v2505_v0  ;;  %v3824_v0 = vld [vmem:[%s4721_s17] ss:$0 sm:$0xff] }
 0xa0f   : > { %2509 = vadd.xlane.f32.xlu1 %v2508_v2 }
 0xa70   : > { %v2493_v33 = vpop.xlane.xlu0 %2492  ;;  %v2487_v3 = vpop.xlane.xlu2 %2486 }
 0xa71   : > { %v2499_v6 = vmul.f32 %v2493_v33, %v4136_v37  ;;  %v4547_v22 = vmul.f32 %v2487_v3, %v4136_v37 }
 0xa72   : > { %v2513_v7 = vpop.xlane.xlu1 %2512 }
 0xa73   : > { %v2523_v9 = vmul.f32 %v2499_v6, %v2499_v6  ;;  %v2519_v10 = vmul.f32 %v2513_v7, %v4136_v37  ;;  %v2521_v29 = vmul.f32 %v4547_v22, %v4547_v22  ;;  %v2531_v47 = vsub.f32 %v4499_v53, %v2499_v6 }
 0xa74   : > { %v2529_v40 = vsub.f32 %v4502_v23, %v4547_v22 }
 0xa75   : > { %v2527_v4 = vsub.f32 %v2519_v10, %v2523_v9 }
 0xa77   : > { %v2535_v13 = vadd.f32 1e-05, %v2527_v4 }
 0xa78   : > { %v2496_v14 = vpop.xlane.xlu0 %2495  ;;  %v2490_v12 = vpop.xlane.xlu2 %2489 }
 0xa79   : > { %3831 = vrsqrt.f32 %v2535_v13  ;;  %v2500_v16 = vmul.f32 %v2496_v14, %v4136_v37  ;;  %v4550_v19 = vmul.f32 %v2490_v12, %v4136_v37  ;;  %vm2563_vm7 = vweird.f32 %v2535_v13 }
 0xa7a   : > { %v2516_v17 = vpop.xlane.xlu1 %2515 }
 0xa7b   : > { %v2524_v20 = vmul.f32 %v2500_v16, %v2500_v16  ;;  %v2520_v21 = vmul.f32 %v2516_v17, %v4136_v37  ;;  %v2522_v30 = vmul.f32 %v4550_v19, %v4550_v19  ;;  %v2532_v56 = vsub.f32 %v4512_v18, %v2500_v16 }
 0xa7d   : > { %v2528_v24 = vsub.f32 %v2520_v21, %v2524_v20 }
 0xa7f   : > { %v3832_v25 = vpop.eup %3831  ;;  %v2536_v26 = vadd.f32 1e-05, %v2528_v24 }
 0xa80   : > { %v2558_v58 = vmul.f32 %v3832_v25, %v2535_v13  ;;  %v2507_v28 = vpop.xlane.xlu0 %2506  ;;  %vm2564_vm6 = vweird.f32 %v3832_v25  ;;  %v2530_v13 = vsub.f32 %v4517_v55, %v4550_v19 }
 0xa81   : > { %3833 = vrsqrt.f32 %v2536_v26  ;;  %v2517_v57 = vmul.f32 %v2507_v28, %v4136_v37  ;;  %vm2565_vm8 = vmor %vm2563_vm7, %vm2564_vm6  ;;  %vm2573_vm10 = vweird.f32 %v2536_v26 }
 0xa82   : > { %v2559_v31 = vmul.f32 %v3832_v25, %v2558_v58  ;;  %v2510_v32 = vpop.xlane.xlu1 %2509 }
 0xa83   : > { %v2525_v39 = vsub.f32 %v2517_v57, %v2521_v29  ;;  %v2518_v59 = vmul.f32 %v2510_v32, %v4136_v37 }
 0xa84   : > { %v2560_v35 = vmul.f32 0.5, %v2559_v31 }
 0xa85   : > { %v2533_v34 = vadd.f32 1e-05, %v2525_v39  ;;  %v2526_v36 = vsub.f32 %v2518_v59, %v2522_v30 }
 0xa86   : > { %v2561_v5 = vsub.f32 1.5, %v2560_v35 }
 0xa87   : > { %v3834_v38 = vpop.eup %3833  ;;  %3835 = vrsqrt.f32 %v2533_v34  ;;  %v2534_v41 = vadd.f32 1e-05, %v2526_v36  ;;  %vm2543_vm13 = vweird.f32 %v2533_v34 }
 0xa88   : > { %v2562_v45 = vmul.f32 %v3832_v25, %v2561_v5  ;;  %v2568_v42 = vmul.f32 %v3834_v38, %v2536_v26  ;;  %vm2574_vm9 = vweird.f32 %v3834_v38  ;;  %v3825_v26 = vld [vmem:[%s4723_s19] ss:$0 sm:$0xff] }
 0xa89   : > { %3837 = vrsqrt.f32 %v2534_v41  ;;  %vm2575_vm11 = vmor %vm2573_vm10, %vm2574_vm9  ;;  %vm2553_vm0 = vweird.f32 %v2534_v41 }
 0xa8a   : > { %v2569_v43 = vmul.f32 %v3834_v38, %v2568_v42  ;;  %v2566_v50 = vsel %vm2565_vm8, %v3832_v25, %v2562_v45 }
 0xa8b   : > { %v2579_v51 = vmul.f32 %v2566_v50, %v2531_v47  ;;  %v3672_v50 = vld [vmem:[%s4724_s20 + $0x8] sm:$0xff] }
 0xa8c   : > { %v2570_v44 = vmul.f32 0.5, %v2569_v43  ;;  %2846 = vmatpush.bf16.msra.mxu3 %v3672_v50 }
 0xa8d   : > { %v3836_v46 = vpop.eup %3835  ;;  %v2586_v63 = vmul.f32 %v3823_v1, %v2579_v51 }
 0xa8e   : > { %v2571_v48 = vsub.f32 1.5, %v2570_v44  ;;  %v2538_v49 = vmul.f32 %v3836_v46, %v2533_v34  ;;  %vm2544_vm12 = vweird.f32 %v3836_v46 }
 0xa8f   : > { %v3838_v15 = vpop.eup %3837  ;;  %vm2545_vm15 = vmor %vm2543_vm13, %vm2544_vm12  ;;  %v2593_v9 = vadd.f32 %v3824_v0, %v2586_v63 }
 0xa90   : > { %v2572_v8 = vmul.f32 %v3834_v38, %v2571_v48  ;;  %v2539_v52 = vmul.f32 %v3836_v46, %v2538_v49  ;;  %v2548_v54 = vmul.f32 %v3838_v15, %v2534_v41  ;;  %vm2554_vm14 = vweird.f32 %v3838_v15  ;;  %v3671_v49 = vld [vmem:[%s4724_s20] sm:$0xff] }
 0xa91   : > { %vm2555_vm2 = vmor %vm2553_vm0, %vm2554_vm14  ;;  %2847 = vmatpush.bf16.msra.mxu3 %v3671_v49 }
 0xa92   : > { %v2540_v60 = vmul.f32 0.5, %v2539_v52  ;;  %v2549_v61 = vmul.f32 %v3838_v15, %v2548_v54  ;;  %v2576_v27 = vsel %vm2575_vm11, %v3834_v38, %v2572_v8 }
 0xa93   : > { %v2580_v62 = vmul.f32 %v2576_v27, %v2532_v56 }
 0xa94   : > { %v2541_v2 = vsub.f32 1.5, %v2540_v60  ;;  %v2550_v33 = vmul.f32 0.5, %v2549_v61 }
 0xa95   : > { %v2587_v3 = vmul.f32 %v3823_v1, %v2580_v62 }
 0xa96   : > { %v2542_v6 = vmul.f32 %v3836_v46, %v2541_v2  ;;  %v2551_v7 = vsub.f32 1.5, %v2550_v33 }
 0xa97   : > { %v2594_v10 = vadd.f32 %v3824_v0, %v2587_v3 }
 0xa98   : > { %v2552_v4 = vmul.f32 %v3838_v15, %v2551_v7  ;;  %v2546_v11 = vsel %vm2545_vm15, %v3836_v46, %v2542_v6 }
 0xa99   : > { %v2606_v14 = vpack.c.bf16 %v2594_v10, %v2593_v9  ;;  %v2577_v16 = vmul.f32 %v2546_v11, %v2529_v40 }
 0xa9a   : > { %v2556_v17 = vsel %vm2555_vm2, %v3838_v15, %v2552_v4 }
 0xa9b   : > { %3569 = vmatmul.msk.bf16.vlgmr.msra.gmra.mxu2 %vm1117_vm1, %v2606_v14  ;;  %v2578_v12 = vmul.f32 %v2556_v17, %v2530_v13  ;;  %v2584_v20 = vmul.f32 %v3823_v1, %v2577_v16 }
 0xa9d   : > { %v2585_v21 = vmul.f32 %v3823_v1, %v2578_v12  ;;  %v2591_v24 = vadd.f32 %v3824_v0, %v2584_v20 }
 0xa9f   : > { %v2592_v22 = vadd.f32 %v3824_v0, %v2585_v21 }
 0xaa1   : > { %v2605_v25 = vpack.c.bf16 %v2592_v22, %v2591_v24 }
 0xaa3   : > { %3568 = vmatmul.msk.bf16.vlgmr.msra.gmra.mxu0 %vm1117_vm1, %v2605_v25 }
 0xb1e   : > { %v2642_v58 = vpop.f32.mrf.mxu2 }
 0xb1f   : > { %v2643_v19 = vadd.f32 %v3825_v26, %v2642_v58 }
 0xb20   : > { %v2637_v28 = vpop.f32.mrf.mxu0 }
 0xb21   : > { %v2638_v29 = vadd.f32 %v3825_v26, %v2637_v28  ;;  %2655 = vrot.lane.b32.xlu2 %v2643_v19, %s3890_s2 }
 0xb23   : > { %2651 = vrot.lane.b32.xlu0 %v2638_v29, %s3890_s2 }
 0xb26   : > { %v2644_v57 = vpop.f32.mrf.mxu2 }
 0xb27   : > { %v2645_v30 = vadd.f32 %v3825_v26, %v2644_v57 }
 0xb28   : > { %v2639_v31 = vpop.f32.mrf.mxu0 }
 0xb29   : > { %v2640_v32 = vadd.f32 %v3825_v26, %v2639_v31  ;;  %2657 = vrot.lane.b32.xlu1 %v2645_v30, %s3890_s2 }
 0xb2b   : > { %2653 = vrot.lane.b32.xlu2 %v2640_v32, %s3890_s2  ;;  %2781 = vrot.lane.b32.xlu0 %v2638_v29, %s3891_s25  ;;  %s4783_s2 = sld [smem:[#allocation20_spill]] }
 0xb31   : > { %2785 = vrot.lane.b32.xlu1 %v2643_v19, %s3891_s25 }
 0xb33   : > { %2783 = vrot.lane.b32.xlu2 %v2640_v32, %s3891_s25  ;;  %2787 = vrot.lane.b32.xlu0 %v2645_v30, %s3891_s25  ;;  %s4785_s25 = sld [smem:[#allocation21_spill]] }
 0xb7b   : > { %v2656_v39 = vpop.permute.xlu2 %2655 }
 0xb7c   : > { %v2708_v59 = vmul.f32 %v2656_v39, %v2638_v29  ;;  %v2665_v42 = vmul.f32 %v2656_v39, %v2643_v19 }
 0xb7e   : > { %3574 = vmatmul.msk.f32.vlgmr.msrb.gmra.mxu2 %vm1117_vm1, %v2708_v59 }
 0xb85   : > { %v2654_v36 = vpop.permute.xlu2 %2653 }
 0xb86   : > { %v2664_v41 = vmul.f32 %v2654_v36, %v2640_v32  ;;  %v2711_v43 = vmul.f32 %v2654_v36, %v2645_v30 }
 0xb8d   : > { %v2784_v14 = vpop.permute.xlu2 %2783 }
 0xb95   : > { %v2652_v35 = vpop.permute.xlu0 %2651 }
 0xb96   : > { %v2663_v34 = vmul.f32 %v2652_v35, %v2638_v29  ;;  %v2710_v45 = vmul.f32 %v2652_v35, %v2643_v19 }
 0xb98   : > { %3570 = vmatmul.msk.f32.vlgmr.msra.gmra.mxu1 %vm1117_vm1, %v2663_v34 }
 0xb9b   : > { %v2658_v5 = vpop.permute.xlu1 %2657 }
 0xb9c   : > { %v2709_v38 = vmul.f32 %v2658_v5, %v2640_v32  ;;  %v2666_v44 = vmul.f32 %v2658_v5, %v2645_v30 }
 0xb9d   : > { %v2782_v2 = vpop.permute.xlu0 %2781 }
 0xb9e   : > { %3575 = vmatmul.msk.f32.gmra.mxu2 %vm1117_vm1, %v2709_v38 }
 0xba0   : > { %3571 = vmatmul.msk.f32.gmra.mxu1 %vm1117_vm1, %v2664_v41 }
 0xba3   : > { %v2786_v20 = vpop.permute.xlu1 %2785 }
 0xba5   : > { %v2788_v21 = vpop.permute.xlu0 %2787 }
 0xba6   : > { %3576 = vmatmul.msk.f32.gmra.mxu2 %vm1117_vm1, %v2710_v45 }
 0xba8   : > { %3572 = vmatmul.msk.f32.gmra.mxu1 %vm1117_vm1, %v2665_v42 }
 0xbae   : > { %3577 = vmatmul.msk.f32.gmra.mxu2 %vm1117_vm1, %v2711_v43 }
 0xbb0   : > { %3573 = vmatmul.msk.f32.gmra.mxu1 %vm1117_vm1, %v2666_v44 }
 0xc01   : > { %v2741_v46 = vpop.f32.mrf.mxu2 }
 0xc15   : > { %v2696_v47 = vpop.f32.mrf.mxu1 }
 0xc16   : > { %v2753_v48 = vmax.f32 %v2696_v47, %v2741_v46 }
 0xc18   : > { %v2757_v15 = vsub.f32 %v2696_v47, %v2753_v48  ;;  %v2769_v51 = vsub.f32 %v2741_v46, %v2753_v48 }
 0xc1a   : > { %v2761_v8 = vmul.f32 1.442695, %v2757_v15  ;;  %v2773_v52 = vmul.f32 1.442695, %v2769_v51 }
 0xc1c   : > { %3839 = vpow2.f32 %v2761_v8 }
 0xc1d   : > { %v2699_v1 = vpop.f32.mrf.mxu1  ;;  %3841 = vpow2.f32 %v2773_v52  ;;  %v3826_v52 = vld [vmem:[%s4725_s21] ss:$0 sm:$0xff] }
 0xc21   : > { %v2744_v54 = vpop.f32.mrf.mxu2 }
 0xc22   : > { %v2754_v56 = vmax.f32 %v2699_v1, %v2744_v54  ;;  %v3840_v0 = vpop.eup %3839 }
 0xc23   : > { %v3842_v33 = vpop.eup %3841  ;;  %v2793_v22 = vmul.f32 %v3840_v0, %v2782_v2 }
 0xc24   : > { %v2758_v60 = vsub.f32 %v2699_v1, %v2754_v56  ;;  %v2770_v61 = vsub.f32 %v2744_v54, %v2754_v56  ;;  %v2797_v7 = vadd.f32 %v3842_v33, %v3840_v0  ;;  %v2801_v26 = vmul.f32 %v3842_v33, %v2786_v20 }
 0xc25   : > { %v2702_v63 = vpop.f32.mrf.mxu1 }
 0xc26   : > { %v2763_v27 = vmul.f32 1.442695, %v2758_v60  ;;  %v2775_v62 = vmul.f32 1.442695, %v2770_v61  ;;  %v2805_v32 = vadd.f32 %v2801_v26, %v2793_v22 }
 0xc28   : > { %3843 = vpow2.f32 %v2763_v27 }
 0xc29   : > { %3845 = vpow2.f32 %v2775_v62  ;;  %v2747_v3 = vpop.f32.mrf.mxu2 }
 0xc2a   : > { %v2755_v6 = vmax.f32 %v2702_v63, %v2747_v3  ;;  %3847 = vrcp.f32 %v2797_v7 }
 0xc2c   : > { %v2759_v40 = vsub.f32 %v2702_v63, %v2755_v6  ;;  %v2771_v9 = vsub.f32 %v2747_v3, %v2755_v6 }
 0xc2d   : > { %v2705_v17 = vpop.f32.mrf.mxu1 }
 0xc2e   : > { %v3844_v10 = vpop.eup %3843  ;;  %v2765_v4 = vmul.f32 1.442695, %v2759_v40  ;;  %v2777_v13 = vmul.f32 1.442695, %v2771_v9 }
 0xc2f   : > { %v3846_v11 = vpop.eup %3845  ;;  %v2794_v25 = vmul.f32 %v3844_v10, %v2784_v14 }
 0xc30   : > { %v2798_v16 = vadd.f32 %v3846_v11, %v3844_v10  ;;  %3849 = vpow2.f32 %v2765_v4  ;;  %v2802_v58 = vmul.f32 %v3846_v11, %v2788_v21  ;;  %v3848_v29 = vpop.eup %3847 }
 0xc31   : > { %v2750_v12 = vpop.f32.mrf.mxu2  ;;  %v2813_v34 = vmul.f32 %v3848_v29, %v2805_v32 }
 0xc32   : > { %3851 = vrcp.f32 %v2798_v16  ;;  %v2756_v24 = vmax.f32 %v2705_v17, %v2750_v12  ;;  %v2806_v39 = vadd.f32 %v2802_v58, %v2794_v25  ;;  %v3673_v25 = vld [vmem:[%s4728_s24] sm:$0xff] }
 0xc33   : > { %3853 = vpow2.f32 %v2777_v13 }
 0xc34   : > { %v2760_v19 = vsub.f32 %v2705_v17, %v2756_v24  ;;  %v2772_v28 = vsub.f32 %v2750_v12, %v2756_v24 }
 0xc36   : > { %v2767_v57 = vmul.f32 1.442695, %v2760_v19  ;;  %v2779_v30 = vmul.f32 1.442695, %v2772_v28  ;;  %v3850_v31 = vpop.eup %3849 }
 0xc37   : > { %v2795_v43 = vmul.f32 %v3850_v31, %v2786_v20 }
 0xc38   : > { %v3852_v59 = vpop.eup %3851  ;;  %3855 = vpow2.f32 %v2767_v57 }
 0xc39   : > { %v3854_v35 = vpop.eup %3853  ;;  %3857 = vpow2.f32 %v2779_v30  ;;  %v2814_v36 = vmul.f32 %v3852_v59, %v2806_v39 }
 0xc3a   : > { %v2799_v38 = vadd.f32 %v3854_v35, %v3850_v31  ;;  %v2803_v50 = vmul.f32 %v3854_v35, %v2782_v2 }
 0xc3b   : > { %v2817_v5 = vpack.c.bf16 %v2814_v36, %v2813_v34 }
 0xc3c   : > { %3859 = vrcp.f32 %v2799_v38  ;;  %v2807_v48 = vadd.f32 %v2803_v50, %v2795_v43 }
 0xc3d   : > { %3586 = vmatmul.msk.bf16.vlgmr.msra.gmra.mxu3 %vm1117_vm1, %v2817_v5 }
 0xc3e   : > { %v3856_v41 = vpop.eup %3855 }
 0xc3f   : > { %v3858_v45 = vpop.eup %3857  ;;  %v2796_v44 = vmul.f32 %v3856_v41, %v2788_v21  ;;  %v3674_v21 = vld [vmem:[%s4728_s24 + $0x8] sm:$0xff] }
 0xc40   : > { %v2800_v42 = vadd.f32 %v3858_v45, %v3856_v41  ;;  %v2804_v46 = vmul.f32 %v3858_v45, %v2784_v14  ;;  %3026 = vmatpush.bf16.msrb.mxu0 %v3674_v21 }
 0xc42   : > { %3861 = vrcp.f32 %v2800_v42  ;;  %v3860_v47 = vpop.eup %3859  ;;  %v2808_v49 = vadd.f32 %v2804_v46, %v2796_v44 }
 0xc43   : > { %v2815_v51 = vmul.f32 %v3860_v47, %v2807_v48 }
 0xc44   : > { %3027 = vmatpush.bf16.msrb.mxu0 %v3673_v25 }
 0xc48   : > { %v3862_v15 = vpop.eup %3861 }
 0xc49   : > { %v2816_v1 = vmul.f32 %v3862_v15, %v2808_v49 }
 0xc4b   : > { %v2818_v8 = vpack.c.bf16 %v2816_v1, %v2815_v51 }
 0xc4d   : > { %3587 = vmatmul.msk.bf16.gmra.mxu3 %vm1117_vm1, %v2818_v8 }
 0xcc0   : > { %v2849_v54 = vpop.f32.mrf.mxu3 }
 0xcc1   : > { %v2850_v56 = vadd.f32 %v3826_v52, %v2849_v54 }
 0xcc3   : > { %v4597_v60 = vadd.f32 %v2850_v56, %v4502_v23 }
 0xcc5   : > { %v2865_v61 = vsel %vm1117_vm1, %v4597_v60, 0.0  ;;  %v2881_v27 = vmul.f32 %v4597_v60, %v4597_v60 }
 0xcc6   : > { %2866 = vadd.xlane.f32.xlu2 %v2865_v61 }
 0xcc7   : > { %v2885_v62 = vsel %vm1117_vm1, %v2881_v27, 0.0 }
 0xcc8   : > { %v2851_v63 = vpop.f32.mrf.mxu3  ;;  %2886 = vadd.xlane.f32.xlu0 %v2885_v62 }
 0xcc9   : > { %v2852_v0 = vadd.f32 %v3826_v52, %v2851_v63 }
 0xccb   : > { %v4605_v2 = vadd.f32 %v2852_v0, %v4517_v55  ;;  %v3827_v0 = vld [vmem:[%s4781_s29] ss:$0 sm:$0xff] }
 0xccd   : > { %v2868_v33 = vsel %vm1117_vm1, %v4605_v2, 0.0  ;;  %v2882_v23 = vmul.f32 %v4605_v2, %v4605_v2 }
 0xcce   : > { %2869 = vadd.xlane.f32.xlu1 %v2868_v33 }
 0xccf   : > { %v2888_v3 = vsel %vm1117_vm1, %v2882_v23, 0.0 }
 0xcd0   : > { %v2854_v6 = vpop.f32.mrf.mxu3  ;;  %2889 = vadd.xlane.f32.xlu2 %v2888_v3 }
 0xcd1   : > { %v2855_v7 = vadd.f32 %v3826_v52, %v2854_v6 }
 0xcd3   : > { %v4613_v40 = vadd.f32 %v2855_v7, %v4499_v53 }
 0xcd5   : > { %v2871_v9 = vsel %vm1117_vm1, %v4613_v40, 0.0  ;;  %v2883_v55 = vmul.f32 %v4613_v40, %v4613_v40 }
 0xcd6   : > { %2872 = vadd.xlane.f32.xlu1 %v2871_v9 }
 0xcd7   : > { %v2891_v10 = vsel %vm1117_vm1, %v2883_v55, 0.0  ;;  %v3828_v55 = vld [vmem:[%s4782_s9] ss:$0 sm:$0xff] }
 0xcd8   : > { %v2856_v4 = vpop.f32.mrf.mxu3  ;;  %2892 = vadd.xlane.f32.xlu2 %v2891_v10 }
 0xcd9   : > { %v2857_v11 = vadd.f32 %v3826_v52, %v2856_v4 }
 0xcdb   : > { %v4621_v13 = vadd.f32 %v2857_v11, %v4512_v18 }
 0xcdd   : > { %v2874_v14 = vsel %vm1117_vm1, %v4621_v13, 0.0  ;;  %v2884_v53 = vmul.f32 %v4621_v13, %v4621_v13 }
 0xcde   : > { %2875 = vadd.xlane.f32.xlu0 %v2874_v14 }
 0xcdf   : > { %v2894_v16 = vsel %vm1117_vm1, %v2884_v53, 0.0 }
 0xce0   : > { %2895 = vadd.xlane.f32.xlu1 %v2894_v16 }
 0xd39   : > { %v2867_v17 = vpop.xlane.xlu2 %2866 }
 0xd3a   : > { %v2877_v12 = vmul.f32 %v2867_v17, %v4136_v37 }
 0xd3b   : > { %v2887_v20 = vpop.xlane.xlu0 %2886 }
 0xd3c   : > { %v2901_v18 = vmul.f32 %v2877_v12, %v2877_v12  ;;  %v2897_v24 = vmul.f32 %v2887_v20, %v4136_v37  ;;  %v2909_v54 = vsub.f32 %v4597_v60, %v2877_v12 }
 0xd3e   : > { %v2905_v22 = vsub.f32 %v2897_v24, %v2901_v18 }
 0xd40   : > { %v2913_v26 = vadd.f32 1e-05, %v2905_v22 }
 0xd41   : > { %v2870_v58 = vpop.xlane.xlu1 %2869 }
 0xd42   : > { %3863 = vrsqrt.f32 %v2913_v26  ;;  %v2878_v19 = vmul.f32 %v2870_v58, %v4136_v37  ;;  %vm2923_vm4 = vweird.f32 %v2913_v26 }
 0xd43   : > { %v2890_v28 = vpop.xlane.xlu2 %2889 }
 0xd44   : > { %v2902_v29 = vmul.f32 %v2878_v19, %v2878_v19  ;;  %v2898_v57 = vmul.f32 %v2890_v28, %v4136_v37  ;;  %v2910_v3 = vsub.f32 %v4605_v2, %v2878_v19 }
 0xd46   : > { %v2906_v30 = vsub.f32 %v2898_v57, %v2902_v29 }
 0xd48   : > { %v3864_v31 = vpop.eup %3863  ;;  %v2914_v32 = vadd.f32 1e-05, %v2906_v30 }
 0xd49   : > { %v2918_v39 = vmul.f32 %v3864_v31, %v2913_v26  ;;  %v2873_v59 = vpop.xlane.xlu1 %2872  ;;  %vm2924_vm3 = vweird.f32 %v3864_v31 }
 0xd4a   : > { %3865 = vrsqrt.f32 %v2914_v32  ;;  %v4639_v35 = vmul.f32 %v2873_v59, %v4136_v37  ;;  %vm2925_vm5 = vmor %vm2923_vm4, %vm2924_vm3  ;;  %vm2933_vm7 = vweird.f32 %v2914_v32  ;;  %v3682_v59 = vld [vmem:[%s4783_s2 + $0x38] sm:$0xff] }
 0xd4b   : > { %v2919_v34 = vmul.f32 %v3864_v31, %v2918_v39  ;;  %v2893_v36 = vpop.xlane.xlu2 %2892  ;;  %3128 = vmatpush.bf16.msrb.mxu1 %v3682_v59  ;;  %3687 = vmatpush.bf16.msrb.mxu3 %v3682_v59 }
 0xd4c   : > { %v2903_v5 = vmul.f32 %v4639_v35, %v4639_v35  ;;  %v2899_v38 = vmul.f32 %v2893_v36, %v4136_v37  ;;  %v2911_v22 = vsub.f32 %v4613_v40, %v4639_v35  ;;  %v3681_v35 = vld [vmem:[%s4783_s2 + $0x30] sm:$0xff]  ;;  %v3679_v36 = vld [vmem:[%s4783_s2 + $0x20] sm:$0xff] }
 0xd4d   : > { %v2920_v41 = vmul.f32 0.5, %v2919_v34  ;;  %v3680_v34 = vld [vmem:[%s4783_s2 + $0x28] sm:$0xff] }
 0xd4e   : > { %v2907_v45 = vsub.f32 %v2899_v38, %v2903_v5  ;;  %v3678_v5 = vld [vmem:[%s4783_s2 + $0x18] sm:$0xff]  ;;  %v3677_v38 = vld [vmem:[%s4783_s2 + $0x10] sm:$0xff] }
 0xd4f   : > { %v2921_v42 = vsub.f32 1.5, %v2920_v41  ;;  %3129 = vmatpush.bf16.msrb.mxu1 %v3681_v35  ;;  %3688 = vmatpush.bf16.msrb.mxu3 %v3681_v35  ;;  %v3676_v41 = vld [vmem:[%s4783_s2 + $0x8] sm:$0xff] }
 0xd50   : > { %v3866_v43 = vpop.eup %3865  ;;  %v2915_v44 = vadd.f32 1e-05, %v2907_v45  ;;  %v3829_v45 = vld [vmem:[%s4784_s4] ss:$0 sm:$0xff] }
 0xd51   : > { %v2922_v50 = vmul.f32 %v3864_v31, %v2921_v42  ;;  %v2928_v46 = vmul.f32 %v3866_v43, %v2914_v32  ;;  %v2876_v47 = vpop.xlane.xlu0 %2875  ;;  %vm2934_vm6 = vweird.f32 %v3866_v43  ;;  %v3675_v42 = vld [vmem:[%s4783_s2] sm:$0xff] }
 0xd52   : > { %3867 = vrsqrt.f32 %v2915_v44  ;;  %v2880_v48 = vmul.f32 %v2876_v47, %v4136_v37  ;;  %vm2935_vm8 = vmor %vm2933_vm7, %vm2934_vm6  ;;  %vm2943_vm10 = vweird.f32 %v2915_v44 }
 0xd53   : > { %v2929_v49 = vmul.f32 %v3866_v43, %v2928_v46  ;;  %v2896_v15 = vpop.xlane.xlu1 %2895  ;;  %v2926_v8 = vsel %vm2925_vm5, %v3864_v31, %v2922_v50  ;;  %3130 = vmatpush.bf16.msrb.mxu1 %v3680_v34  ;;  %3689 = vmatpush.bf16.msrb.mxu3 %v3680_v34 }
 0xd54   : > { %v2904_v51 = vmul.f32 %v2880_v48, %v2880_v48  ;;  %v2900_v1 = vmul.f32 %v2896_v15, %v4136_v37  ;;  %v2957_v63 = vmul.f32 %v2926_v8, %v2909_v54  ;;  %v2912_v19 = vsub.f32 %v4621_v13, %v2880_v48 }
 0xd55   : > { %v2930_v52 = vmul.f32 0.5, %v2929_v49 }
 0xd56   : > { %v2908_v56 = vsub.f32 %v2900_v1, %v2904_v51  ;;  %v2964_v9 = vmul.f32 %v3827_v0, %v2957_v63 }
 0xd57   : > { %v2931_v61 = vsub.f32 1.5, %v2930_v52  ;;  %3131 = vmatpush.bf16.msrb.mxu1 %v3679_v36  ;;  %3690 = vmatpush.bf16.msrb.mxu3 %v3679_v36 }
 0xd58   : > { %v3868_v27 = vpop.eup %3867  ;;  %v2916_v62 = vadd.f32 1e-05, %v2908_v56  ;;  %v2971_v53 = vadd.f32 %v3828_v55, %v2964_v9 }
 0xd59   : > { %v2932_v33 = vmul.f32 %v3866_v43, %v2931_v61  ;;  %v2938_v23 = vmul.f32 %v3868_v27, %v2915_v44  ;;  %vm2944_vm9 = vweird.f32 %v3868_v27 }
 0xd5a   : > { %3869 = vrsqrt.f32 %v2916_v62  ;;  %vm2945_vm11 = vmor %vm2943_vm10, %vm2944_vm9  ;;  %vm2953_vm13 = vweird.f32 %v2916_v62 }
 0xd5b   : > { %v2936_v37 = vsel %vm2935_vm8, %v3866_v43, %v2932_v33  ;;  %v2939_v6 = vmul.f32 %v3868_v27, %v2938_v23  ;;  %3132 = vmatpush.bf16.msrb.mxu1 %v3678_v5  ;;  %3691 = vmatpush.bf16.msrb.mxu3 %v3678_v5 }
 0xd5c   : > { %v2958_v7 = vmul.f32 %v2936_v37, %v2910_v3 }
 0xd5d   : > { %v2940_v10 = vmul.f32 0.5, %v2939_v6 }
 0xd5e   : > { %v2965_v4 = vmul.f32 %v3827_v0, %v2958_v7 }
 0xd5f   : > { %v2941_v11 = vsub.f32 1.5, %v2940_v10  ;;  %3133 = vmatpush.bf16.msrb.mxu1 %v3677_v38  ;;  %3692 = vmatpush.bf16.msrb.mxu3 %v3677_v38 }
 0xd60   : > { %v3870_v14 = vpop.eup %3869  ;;  %v2972_v16 = vadd.f32 %v3828_v55, %v2965_v4 }
 0xd61   : > { %v2942_v17 = vmul.f32 %v3868_v27, %v2941_v11  ;;  %v2948_v12 = vmul.f32 %v3870_v14, %v2916_v62  ;;  %vm2954_vm12 = vweird.f32 %v3870_v14 }
 0xd62   : > { %v2997_v20 = vpack.c.bf16 %v2972_v16, %v2971_v53  ;;  %vm2955_vm14 = vmor %vm2953_vm13, %vm2954_vm12 }
 0xd63   : > { %v2949_v21 = vmul.f32 %v3870_v14, %v2948_v12  ;;  %v2946_v24 = vsel %vm2945_vm11, %v3868_v27, %v2942_v17  ;;  %3134 = vmatpush.bf16.msrb.mxu1 %v3676_v41  ;;  %3693 = vmatpush.bf16.msrb.mxu3 %v3676_v41 }
 0xd64   : > { %3596 = vmatmul.msk.bf16.vlgmr.msrb.gmra.mxu0 %vm1117_vm1, %v2997_v20  ;;  %v2959_v26 = vmul.f32 %v2946_v24, %v2911_v22 }
 0xd65   : > { %v2950_v18 = vmul.f32 0.5, %v2949_v21 }
 0xd66   : > { %v2966_v57 = vmul.f32 %v3827_v0, %v2959_v26 }
 0xd67   : > { %v2951_v25 = vsub.f32 1.5, %v2950_v18  ;;  %3135 = vmatpush.bf16.msrb.mxu1 %v3675_v42  ;;  %3694 = vmatpush.bf16.msrb.mxu3 %v3675_v42 }
 0xd68   : > { %v2973_v31 = vadd.f32 %v3828_v55, %v2966_v57  ;;  %v3830_v57 = vld [vmem:[%s4785_s25] ss:$0 sm:$0xff] }
 0xd69   : > { %v2952_v58 = vmul.f32 %v3870_v14, %v2951_v25 }
 0xd6b   : > { %v2956_v28 = vsel %vm2955_vm14, %v3870_v14, %v2952_v58 }
 0xd6c   : > { %v2960_v29 = vmul.f32 %v2956_v28, %v2912_v19 }
 0xd6e   : > { %v2967_v30 = vmul.f32 %v3827_v0, %v2960_v29 }
 0xd70   : > { %v2974_v32 = vadd.f32 %v3828_v55, %v2967_v30 }
 0xd72   : > { %v2998_v39 = vpack.c.bf16 %v2974_v32, %v2973_v31 }
 0xd74   : > { %3597 = vmatmul.msk.bf16.gmra.mxu0 %vm1117_vm1, %v2998_v39 }
 0xde1   : > { %v3029_v43 = vpop.f32.mrf.mxu0 }
 0xde2   : > { %v3030_v44 = vadd.f32 %v3829_v45, %v3029_v43 }
 0xde4   : > { %v3043_v50 = vmul.f32 0.044715, %v3030_v44  ;;  %v3039_v55 = vmul.f32 0.5, %v3030_v44 }
 0xde6   : > { %v3047_v46 = vmul.f32 %v3043_v50, %v3030_v44 }
 0xde8   : > { %v3051_v47 = vmul.f32 %v3047_v46, %v3030_v44 }
 0xde9   : > { %v3031_v48 = vpop.f32.mrf.mxu0 }
 0xdea   : > { %v3032_v49 = vadd.f32 %v3829_v45, %v3031_v48  ;;  %v3055_v15 = vadd.f32 %v3051_v47, %v3030_v44 }
 0xdec   : > { %v3044_v51 = vmul.f32 0.044715, %v3032_v49  ;;  %v3059_v8 = vmul.f32 0.7978846, %v3055_v15  ;;  %v3040_v10 = vmul.f32 0.5, %v3032_v49 }
 0xdee   : > { %v3048_v1 = vmul.f32 %v3044_v51, %v3032_v49  ;;  %3871 = vtanh.f32 %v3059_v8 }
 0xdf0   : > { %v3052_v52 = vmul.f32 %v3048_v1, %v3032_v49 }
 0xdf1   : > { %v3034_v54 = vpop.f32.mrf.mxu0 }
 0xdf2   : > { %v3035_v56 = vadd.f32 %v3829_v45, %v3034_v54  ;;  %v3056_v61 = vadd.f32 %v3052_v52, %v3032_v49 }
 0xdf4   : > { %v3045_v27 = vmul.f32 0.044715, %v3035_v56  ;;  %v3060_v62 = vmul.f32 0.7978846, %v3056_v61  ;;  %v3872_v0 = vpop.eup %3871  ;;  %v3041_v25 = vmul.f32 0.5, %v3035_v56 }
 0xdf5   : > { %v3067_v6 = vadd.f32 1.0, %v3872_v0 }
 0xdf6   : > { %v3049_v63 = vmul.f32 %v3045_v27, %v3035_v56  ;;  %3873 = vtanh.f32 %v3060_v62 }
 0xdf7   : > { %v3071_v53 = vmul.f32 %v3067_v6, %v3039_v55 }
 0xdf8   : > { %v3053_v33 = vmul.f32 %v3049_v63, %v3035_v56 }
 0xdf9   : > { %v3036_v23 = vpop.f32.mrf.mxu0 }
 0xdfa   : > { %v3037_v3 = vadd.f32 %v3829_v45, %v3036_v23  ;;  %v3057_v37 = vadd.f32 %v3053_v33, %v3035_v56 }
 0xdfc   : > { %v3874_v7 = vpop.eup %3873  ;;  %v3046_v9 = vmul.f32 0.044715, %v3037_v3  ;;  %v3061_v14 = vmul.f32 0.7978846, %v3057_v37  ;;  %v3042_v26 = vmul.f32 0.5, %v3037_v3 }
 0xdfd   : > { %v3068_v4 = vadd.f32 1.0, %v3874_v7 }
 0xdfe   : > { %v3050_v11 = vmul.f32 %v3046_v9, %v3037_v3  ;;  %3875 = vtanh.f32 %v3061_v14 }
 0xdff   : > { %v3072_v16 = vmul.f32 %v3068_v4, %v3040_v10 }
 0xe00   : > { %v3054_v17 = vmul.f32 %v3050_v11, %v3037_v3 }
 0xe01   : > { %v3075_v12 = vpack.c.bf16 %v3072_v16, %v3071_v53 }
 0xe02   : > { %v3058_v20 = vadd.f32 %v3054_v17, %v3037_v3 }
 0xe03   : > { %3136 = vmatmul.bf16.vlgmr.msrb.gmra.mxu1 %v3075_v12 }
 0xe04   : > { %v3062_v21 = vmul.f32 0.7978846, %v3058_v20  ;;  %v3876_v18 = vpop.eup %3875 }
 0xe05   : > { %v3069_v24 = vadd.f32 1.0, %v3876_v18 }
 0xe06   : > { %3877 = vtanh.f32 %v3062_v21 }
 0xe07   : > { %v3073_v19 = vmul.f32 %v3069_v24, %v3041_v25 }
 0xe0c   : > { %v3878_v22 = vpop.eup %3877 }
 0xe0d   : > { %v3070_v58 = vadd.f32 1.0, %v3878_v22 }
 0xe0f   : > { %v3074_v28 = vmul.f32 %v3070_v58, %v3042_v26 }
 0xe11   : > { %v3076_v29 = vpack.c.bf16 %v3074_v28, %v3073_v19 }
 0xe13   : > { %3141 = vmatmul.bf16.vlgmr.msrb.gmra.mxu3 %v3076_v29 }
 0xe80   : > { %v3137_v30 = vpop.f32.mrf.mxu1 }
 0xe81   : > { %v3138_v31 = vadd.f32 %v3830_v57, %v3137_v30 }
 0xe83   : > { %v3147_v32 = vadd.f32 %v3138_v31, %v4597_v60 }
 0xe85   : > { %3151 = vst.msk [vmem:[%s4483_s27] sm:$0xff] %vm1117_vm1, %v3147_v32 }
 0xe88   : > { %v3139_v39 = vpop.f32.mrf.mxu1 }
 0xe89   : > { %v3140_v59 = vadd.f32 %v3830_v57, %v3139_v39 }
 0xe8b   : > { %v3148_v35 = vadd.f32 %v3140_v59, %v4605_v2 }
 0xe8d   : > { %3152 = vst.msk [vmem:[%s4483_s27 + $0x8] sm:$0xff] %vm1117_vm1, %v3148_v35 }
 0xe96   : > { %v3142_v34 = vpop.f32.mrf.mxu3 }
 0xe97   : > { %v3143_v36 = vadd.f32 %v3830_v57, %v3142_v34 }
 0xe99   : > { %v3149_v5 = vadd.f32 %v3143_v36, %v4613_v40 }
 0xe9b   : > { %3153 = vst.msk [vmem:[%s4483_s27 + $0x10] sm:$0xff] %vm1117_vm1, %v3149_v5 }
 0xe9e   : > { %v3144_v38 = vpop.f32.mrf.mxu3 }
 0xe9f   : > { %v3145_v41 = vadd.f32 %v3830_v57, %v3144_v38 }
 0xea1   : > { %v3150_v45 = vadd.f32 %v3145_v41, %v4621_v13 }
 0xea3   : > { %3154 = vst.msk [vmem:[%s4483_s27 + $0x18] sm:$0xff] %vm1117_vm1, %v3150_v45 }
 0xea4 PF: > { %s4786_s26 = sld [smem:[#allocation2_spill]] }
 0xeaa   : > { %s38_s8 = sadd.s32 1, %s4786_s26  }
 0xeab   : > { %p35_p5 = scmp.ge.s32.totalorder %s38_s8, 4  }
 0xead   :  { %37 = sbr.rel (!%p35_p5) target bundleno = 20 (0x14), region = 211 }

</bundles_post_ra>
